<compile_context>
chip_gen: v5e
topology: v5e:2x2
jax: 0.10.0
libtpu: 0.0.40
codegen_flags: <defaults>
</compile_context>

<pallas_src>
import jax
import jax.numpy as jnp
from jax.experimental import pallas as pl
from jax.experimental.pallas import tpu as pltpu


def _vmem_limit_bytes():
    # Leave headroom below the physical per-core capacity (v7x: 64 MiB/TC,
    # v5e/v6e: 128 MiB). Falls back to a v7x-safe value if the query fails.
    try:
        cap = pltpu.get_tpu_info().vmem_capacity_bytes
    except Exception:  # pragma: no cover - conservative fallback
        cap = 64 * 1024 * 1024
    return min(int(cap) * 3 // 4, 100 * 1024 * 1024)


_VMEM_LIMIT = _vmem_limit_bytes()
_TILE_BUDGET = max(_VMEM_LIMIT // 4, 8 * 1024 * 1024)


# ----------------------------- tiling model --------------------------------

def _conv_live_bytes(th, w, cin, cout, cskip, in_item, out_item, fuse_taps, whole):
    """Approximate live VMEM bytes for one grid step (double-buffered blocks)."""
    m = th * w
    wp = w + 2
    b = 0
    if whole:
        b += 2 * th * w * cin * in_item          # double-buffered unpadded input block
        b += (th + 2) * wp * cin * in_item       # in-kernel padded scratch
    else:
        b += 2 * (th + 2) * wp * cin * in_item   # double-buffered halo'd row slab
    if cskip:
        b += 2 * m * cskip * in_item             # double-buffered skip block
    b += 2 * m * cout * out_item                 # double-buffered output block
    b += m * cout * 4                            # f32 accumulator temp
    if fuse_taps:
        b += m * 9 * cin * in_item               # concatenated (M, 9*cin) patches temp
    b += 2 * 9 * cin * cout * in_item            # weights (double-buffered, small)
    return b


def _pick_tile_rows(h, w, cin, cout, cskip, in_item, out_item, fuse_taps,
                    budget=_TILE_BUDGET):
    """(tile_rows, whole_image): prefer the whole-image (no HBM halo) path."""
    if _conv_live_bytes(h, w, cin, cout, cskip, in_item, out_item,
                        fuse_taps, True) <= budget:
        return h, True
    for th in range(h, 0, -1):            # largest divisor of H that fits the budget
        if h % th:
            continue
        if _conv_live_bytes(th, w, cin, cout, cskip, in_item, out_item,
                            fuse_taps, False) <= budget:
            # TODO(synk): enforce th*w >= 256 (MXU row utilisation) when divisors allow.
            return th, False
    return 1, False


# ----------------------------- Pallas kernel -------------------------------

def _make_conv_kernel(*, th, w_out, cin, relu, fuse_taps, has_skip, whole):
    """3x3 conv (stride 1, pad 1) [+ReLU] [+ fused skip 1x1 conv + bias + ReLU + add].

    Ref order: x, [skip], w(9*cin,cout), bias(1,cout), [ws(cskip,cout), bs(1,cout)],
               out(th*w_out, cout), [pad scratch (th+2, w_out+2, cin) when whole].
    """
    def kernel(*refs):
        refs = list(refs)
        x_ref = refs.pop(0)
        s_ref = refs.pop(0) if has_skip else None
        w_ref = refs.pop(0)
        b_ref = refs.pop(0)
        ws_ref = refs.pop(0) if has_skip else None
        bs_ref = refs.pop(0) if has_skip else None
        o_ref = refs.pop(0)
        pad_ref = refs.pop(0) if whole else None

        if whole:
            # Build the zero-padded slab in VMEM from the unpadded input block:
            # zero only the halo rows/cols (cheap), then copy the interior.
            dt = x_ref.dtype
            zrow = jnp.zeros((1, w_out + 2, cin), dt)
            pad_ref[0:1, :, :] = zrow
            pad_ref[th + 1:th + 2, :, :] = zrow
            zcol = jnp.zeros((th, 1, cin), dt)
            pad_ref[1:th + 1, 0:1, :] = zcol
            pad_ref[1:th + 1, w_out + 1:w_out + 2, :] = zcol
            pad_ref[1:th + 1, 1:w_out + 1, :] = x_ref[...]
            src = pad_ref
        else:
            src = x_ref   # already a zero-padded halo'd slab

        m = th * w_out
        taps = [src[dy:dy + th, dx:dx + w_out, :].reshape(m, cin)
                for dy in range(3) for dx in range(3)]
        if fuse_taps:
            # Small cin: fold the 9 taps into one deep contraction (K = 9*cin).
            patches = jnp.concatenate(taps, axis=-1)
            acc = jnp.dot(patches, w_ref[...], preferred_element_type=jnp.float32)
        else:
            # Large cin: 9 accumulating full-K matmuls, no (M, 9*cin) temp.
            acc = jnp.dot(taps[0], w_ref[0:cin, :], preferred_element_type=jnp.float32)
            for k in range(1, 9):
                acc = acc + jnp.dot(taps[k], w_ref[k * cin:(k + 1) * cin, :],
                                    preferred_element_type=jnp.float32)
        acc = acc + b_ref[...]
        if relu:
            acc = jnp.maximum(acc, 0.0)
        if has_skip:
            sk = jnp.dot(s_ref[...], ws_ref[...], preferred_element_type=jnp.float32)
            sk = jnp.maximum(sk + bs_ref[...], 0.0)
            acc = acc + sk
        o_ref[...] = acc.astype(o_ref.dtype)

    return kernel


# ----------------------------- block factory -------------------------------

def make_conv3x3_block(w_oihw, b, *, relu, skip_w_oihw=None, skip_b=None,
                       tile_rows=None, compute_dtype=jnp.bfloat16, out_dtype=None):
    """Conv2d(k=3,s=1,p=1) [+ReLU] [+ fused skip Conv1x1+ReLU + residual add] on NHWC.

    Returns callable(x_nhwc[, skip_nhwc]) -> (N, H, W, cout) in `out_dtype`.
    MXU operands run in `compute_dtype` (bf16 by default); accumulation/epilogue f32.
    """
    cout, cin, kh, kw = w_oihw.shape
    assert (kh, kw) == (3, 3)
    w = jnp.transpose(w_oihw, (2, 3, 1, 0)).reshape(9 * cin, cout).astype(compute_dtype)
    bias = jnp.asarray(b, jnp.float32).reshape(1, cout)

    has_skip = skip_w_oihw is not None
    if has_skip:
        cs_out, cskip, skh, skw = skip_w_oihw.shape
        assert (skh, skw) == (1, 1) and cs_out == cout
        ws = jnp.transpose(skip_w_oihw[:, :, 0, 0], (1, 0)).astype(compute_dtype)
        bs = jnp.asarray(skip_b, jnp.float32).reshape(1, cout)
    else:
        cskip = 0

    out_dtype = out_dtype or compute_dtype
    fuse_taps = (9 * cin <= 288)      # concat taps only when cin is small
    in_item = jnp.dtype(compute_dtype).itemsize
    out_item = jnp.dtype(out_dtype).itemsize

    def block(x_nhwc, skip_nhwc=None):
        assert (skip_nhwc is not None) == has_skip
        n, h, wdim, c = x_nhwc.shape
        assert c == cin, (c, cin)
        if has_skip:
            # TODO(synk): mismatched spatial shapes would need add_fusion's
            # replicate spatial_pad_as; fused epilogue assumes equal shapes.
            assert skip_nhwc.shape == (n, h, wdim, cskip), skip_nhwc.shape

        if tile_rows is not None:
            th, whole = tile_rows, (tile_rows == h)
            assert h % th == 0, (h, th)
        else:
            th, whole = _pick_tile_rows(h, wdim, cin, cout, cskip,
                                        in_item, out_item, fuse_taps)
        nh = h // th
        x = x_nhwc.astype(compute_dtype)
        kernel = _make_conv_kernel(th=th, w_out=wdim, cin=cin, relu=relu,
                                   fuse_taps=fuse_taps, has_skip=has_skip,
                                   whole=whole)
        cparams = pltpu.CompilerParams(
            dimension_semantics=("parallel",) * (1 if whole else 2),
            vmem_limit_bytes=_VMEM_LIMIT)
        # TODO(synk): single-buffer the tiny weight/bias blocks (pl.Buffered(1)) if safe.

        if whole:
            ins = [x]
            in_specs = [pl.BlockSpec((None, h, wdim, cin), lambda ni: (ni, 0, 0, 0))]
            if has_skip:
                ins.append(skip_nhwc.astype(compute_dtype).reshape(n, h * wdim, cskip))
                in_specs.append(pl.BlockSpec((None, h * wdim, cskip),
                                             lambda ni: (ni, 0, 0)))
            ins += [w, bias]
            in_specs += [pl.BlockSpec((9 * cin, cout), lambda ni: (0, 0)),
                         pl.BlockSpec((1, cout), lambda ni: (0, 0))]
            if has_skip:
                ins += [ws, bs]
                in_specs += [pl.BlockSpec((cskip, cout), lambda ni: (0, 0)),
                             pl.BlockSpec((1, cout), lambda ni: (0, 0))]
            out = pl.pallas_call(
                kernel,
                out_shape=jax.ShapeDtypeStruct((n, h * wdim, cout), out_dtype),
                grid=(n,),
                in_specs=in_specs,
                out_specs=pl.BlockSpec((None, h * wdim, cout), lambda ni: (ni, 0, 0)),
                scratch_shapes=[pltpu.VMEM((h + 2, wdim + 2, cin), compute_dtype)],
                compiler_params=cparams,
            )(*ins)
        else:
            wp = wdim + 2
            xp = jnp.pad(x, ((0, 0), (1, 1), (1, 1), (0, 0)))
            # Halo'd row slabs: (th+2)/th read duplication only (th chosen large).
            slabs = jnp.stack([xp[:, i * th:i * th + th + 2] for i in range(nh)], axis=1)
            ins = [slabs]
            in_specs = [pl.BlockSpec((None, None, th + 2, wp, cin),
                                     lambda ni, hi: (ni, hi, 0, 0, 0))]
            if has_skip:
                ins.append(skip_nhwc.astype(compute_dtype).reshape(n, nh, th * wdim, cskip))
                in_specs.append(pl.BlockSpec((None, None, th * wdim, cskip),
                                             lambda ni, hi: (ni, hi, 0, 0)))
            ins += [w, bias]
            in_specs += [pl.BlockSpec((9 * cin, cout), lambda ni, hi: (0, 0)),
                         pl.BlockSpec((1, cout), lambda ni, hi: (0, 0))]
            if has_skip:
                ins += [ws, bs]
                in_specs += [pl.BlockSpec((cskip, cout), lambda ni, hi: (0, 0)),
                             pl.BlockSpec((1, cout), lambda ni, hi: (0, 0))]
            out = pl.pallas_call(
                kernel,
                out_shape=jax.ShapeDtypeStruct((n, nh, th * wdim, cout), out_dtype),
                grid=(n, nh),
                in_specs=in_specs,
                out_specs=pl.BlockSpec((None, None, th * wdim, cout),
                                       lambda ni, hi: (ni, hi, 0, 0)),
                compiler_params=cparams,
            )(*ins)
        return out.reshape(n, h, wdim, cout)

    return block


# ------------------------------ decoder glue --------------------------------

class BaseUnetDecoderPallas:
    """Forward-pass composition of BaseUnetDecoder (all blocks optional)."""

    def __init__(self, first_block, fusion, skip_block, final_block):
        self.first_block = first_block
        self.fusion = fusion
        self.skip_block = skip_block
        self.final_block = final_block

    def __call__(self, x, skip):
        x = self.first_block(x) if self.first_block is not None else x
        if skip is not None and self.fusion is not None:
            skip = self.skip_block(skip) if self.skip_block is not None else skip
            x = self.fusion(x, skip)
        return self.final_block(x) if self.final_block is not None else x


def decoder_forward_nchw(decoder, x_nchw, skip_nchw):
    """NCHW public API: transpose once in, run NHWC decoder, transpose once out."""
    x = jnp.transpose(x_nchw, (0, 2, 3, 1))
    s = None if skip_nchw is None else jnp.transpose(skip_nchw, (0, 2, 3, 1))
    y = decoder(x, s)
    return jnp.transpose(y, (0, 3, 1, 2))


# ------------------------------ reference ---------------------------------

def _ref_conv(x, w, b, pad):
    y = jax.lax.conv_general_dilated(
        x, w, window_strides=(1, 1), padding=[(pad, pad), (pad, pad)],
        dimension_numbers=("NCHW", "OIHW", "NCHW"),
        precision=jax.lax.Precision.HIGHEST)
    return y + b[None, :, None, None]


def ref_forward(x, skip, w1, b1, ws, bs, wf, bf):
    h = jax.nn.relu(_ref_conv(x, w1, b1, 1))
    s = jax.nn.relu(_ref_conv(skip, ws, bs, 0))
    h = h + s                         # matching spatial shapes -> replicate pad is identity
    return _ref_conv(h, wf, bf, 1)


# --------------------------------- main ------------------------------------

if __name__ == "__main__":
    key = jax.random.PRNGKey(0)
    N, C_in, C_skip, C_mid, C_out, H, W = 2, 4, 4, 8, 8, 16, 16

    k_x, k_s, k1, k2, k3, k4, k5, k6 = jax.random.split(key, 8)
    x = jax.random.normal(k_x, (N, C_in, H, W), jnp.float32)
    skip = jax.random.normal(k_s, (N, C_skip, H, W), jnp.float32)

    # Deterministic synthetic parameters (PyTorch Conv2d weight layout: OIHW).
    w1 = 0.1 * jax.random.normal(k1, (C_mid, C_in, 3, 3), jnp.float32)
    b1 = 0.1 * jax.random.normal(k2, (C_mid,), jnp.float32)
    ws = 0.1 * jax.random.normal(k3, (C_mid, C_skip, 1, 1), jnp.float32)
    bs = 0.1 * jax.random.normal(k4, (C_mid,), jnp.float32)
    wf = 0.1 * jax.random.normal(k5, (C_out, C_mid, 3, 3), jnp.float32)
    bf = 0.1 * jax.random.normal(k6, (C_out,), jnp.float32)

    # first_block (3x3+ReLU), skip_block (1x1+ReLU) and add_fusion are all folded
    # into ONE pallas_call; expressed through the decoder class via the `fusion`
    # slot (first_block/skip_block = None), forward semantics unchanged.
    fused_first = make_conv3x3_block(
        w1, b1, relu=True, skip_w_oihw=ws, skip_b=bs,
        tile_rows=8,                       # exercises the halo'd-slab path (nh > 1)
        out_dtype=jnp.bfloat16)            # bf16 intermediate halves HBM traffic
    final = make_conv3x3_block(wf, bf, relu=False, out_dtype=jnp.float32)  # whole-image path

    decoder = BaseUnetDecoderPallas(first_block=None, fusion=fused_first,
                                    skip_block=None, final_block=final)

    fwd = jax.jit(lambda xx, ss: decoder_forward_nchw(decoder, xx, ss))
    out = jax.block_until_ready(fwd(x, skip))

    ref = jax.block_until_ready(ref_forward(x, skip, w1, b1, ws, bs, wf, bf))
    assert out.shape == (N, C_out, H, W), out.shape
    err = float(jnp.max(jnp.abs(out - ref)))
    # bf16 MXU operands + bf16 stored intermediate => looser tolerance than f32.
    assert jnp.allclose(out, ref, atol=3e-2, rtol=3e-2), err

    print("KERNEL_OK")
</pallas_src>

<mosaic_0001>
module attributes {stable_mosaic.version = 11 : i64} {
  func.func @kernel(%arg0: i32, %arg1: i32, %arg2: memref<1x1x10x18x4xbf16, #tpu.memory_space<vmem>>, %arg3: memref<1x1x128x4xbf16, #tpu.memory_space<vmem>>, %arg4: memref<36x8xbf16, #tpu.memory_space<vmem>>, %arg5: memref<1x8xf32, #tpu.memory_space<vmem>>, %arg6: memref<4x8xbf16, #tpu.memory_space<vmem>>, %arg7: memref<1x8xf32, #tpu.memory_space<vmem>>, %arg8: memref<1x1x128x8xbf16, #tpu.memory_space<vmem>>) attributes {dimension_semantics = [#tpu.dimension_semantics<parallel>, #tpu.dimension_semantics<parallel>], iteration_bounds = array<i64: 2, 2>, scalar_prefetch = 0 : i64, scratch_operands = 0 : i64, tpu.core_type = #tpu.core_type<tc>, window_params = [{transform_indices = @transform_0, window_bounds = array<i64: 1, 1, 10, 18, 4>}, {transform_indices = @transform_1, window_bounds = array<i64: 1, 1, 128, 4>}, {pipeline_mode = #tpu.pipeline_mode<synchronous>, transform_indices = @transform_2, window_bounds = array<i64: 36, 8>}, {pipeline_mode = #tpu.pipeline_mode<synchronous>, transform_indices = @transform_3, window_bounds = array<i64: 1, 8>}, {pipeline_mode = #tpu.pipeline_mode<synchronous>, transform_indices = @transform_4, window_bounds = array<i64: 4, 8>}, {pipeline_mode = #tpu.pipeline_mode<synchronous>, transform_indices = @transform_5, window_bounds = array<i64: 1, 8>}, {transform_indices = @transform_6, window_bounds = array<i64: 1, 1, 128, 8>}]} {
    %c0 = arith.constant 0 : index
    %c0_0 = arith.constant 0 : index
    %c0_1 = arith.constant 0 : index
    %c0_2 = arith.constant 0 : index
    %c0_3 = arith.constant 0 : index
    %0 = vector.load %arg2[%c0, %c0_0, %c0_1, %c0_2, %c0_3] : memref<1x1x10x18x4xbf16, #tpu.memory_space<vmem>>, vector<1x1x8x16x4xbf16>
    %1 = vector.shape_cast %0 : vector<1x1x8x16x4xbf16> to vector<8x16x4xbf16>
    %2 = vector.shape_cast %1 : vector<8x16x4xbf16> to vector<128x4xbf16>
    %c0_4 = arith.constant 0 : index
    %c0_5 = arith.constant 0 : index
    %c0_6 = arith.constant 0 : index
    %c1 = arith.constant 1 : index
    %c0_7 = arith.constant 0 : index
    %3 = vector.load %arg2[%c0_4, %c0_5, %c0_6, %c1, %c0_7] : memref<1x1x10x18x4xbf16, #tpu.memory_space<vmem>>, vector<1x1x8x16x4xbf16>
    %4 = vector.shape_cast %3 : vector<1x1x8x16x4xbf16> to vector<8x16x4xbf16>
    %5 = vector.shape_cast %4 : vector<8x16x4xbf16> to vector<128x4xbf16>
    %c0_8 = arith.constant 0 : index
    %c0_9 = arith.constant 0 : index
    %c0_10 = arith.constant 0 : index
    %c2 = arith.constant 2 : index
    %c0_11 = arith.constant 0 : index
    %6 = vector.load %arg2[%c0_8, %c0_9, %c0_10, %c2, %c0_11] : memref<1x1x10x18x4xbf16, #tpu.memory_space<vmem>>, vector<1x1x8x16x4xbf16>
    %7 = vector.shape_cast %6 : vector<1x1x8x16x4xbf16> to vector<8x16x4xbf16>
    %8 = vector.shape_cast %7 : vector<8x16x4xbf16> to vector<128x4xbf16>
    %c0_12 = arith.constant 0 : index
    %c0_13 = arith.constant 0 : index
    %c1_14 = arith.constant 1 : index
    %c0_15 = arith.constant 0 : index
    %c0_16 = arith.constant 0 : index
    %9 = vector.load %arg2[%c0_12, %c0_13, %c1_14, %c0_15, %c0_16] : memref<1x1x10x18x4xbf16, #tpu.memory_space<vmem>>, vector<1x1x8x16x4xbf16>
    %10 = vector.shape_cast %9 : vector<1x1x8x16x4xbf16> to vector<8x16x4xbf16>
    %11 = vector.shape_cast %10 : vector<8x16x4xbf16> to vector<128x4xbf16>
    %c0_17 = arith.constant 0 : index
    %c0_18 = arith.constant 0 : index
    %c1_19 = arith.constant 1 : index
    %c1_20 = arith.constant 1 : index
    %c0_21 = arith.constant 0 : index
    %12 = vector.load %arg2[%c0_17, %c0_18, %c1_19, %c1_20, %c0_21] : memref<1x1x10x18x4xbf16, #tpu.memory_space<vmem>>, vector<1x1x8x16x4xbf16>
    %13 = vector.shape_cast %12 : vector<1x1x8x16x4xbf16> to vector<8x16x4xbf16>
    %14 = vector.shape_cast %13 : vector<8x16x4xbf16> to vector<128x4xbf16>
    %c0_22 = arith.constant 0 : index
    %c0_23 = arith.constant 0 : index
    %c1_24 = arith.constant 1 : index
    %c2_25 = arith.constant 2 : index
    %c0_26 = arith.constant 0 : index
    %15 = vector.load %arg2[%c0_22, %c0_23, %c1_24, %c2_25, %c0_26] : memref<1x1x10x18x4xbf16, #tpu.memory_space<vmem>>, vector<1x1x8x16x4xbf16>
    %16 = vector.shape_cast %15 : vector<1x1x8x16x4xbf16> to vector<8x16x4xbf16>
    %17 = vector.shape_cast %16 : vector<8x16x4xbf16> to vector<128x4xbf16>
    %c0_27 = arith.constant 0 : index
    %c0_28 = arith.constant 0 : index
    %c2_29 = arith.constant 2 : index
    %c0_30 = arith.constant 0 : index
    %c0_31 = arith.constant 0 : index
    %18 = vector.load %arg2[%c0_27, %c0_28, %c2_29, %c0_30, %c0_31] : memref<1x1x10x18x4xbf16, #tpu.memory_space<vmem>>, vector<1x1x8x16x4xbf16>
    %19 = vector.shape_cast %18 : vector<1x1x8x16x4xbf16> to vector<8x16x4xbf16>
    %20 = vector.shape_cast %19 : vector<8x16x4xbf16> to vector<128x4xbf16>
    %c0_32 = arith.constant 0 : index
    %c0_33 = arith.constant 0 : index
    %c2_34 = arith.constant 2 : index
    %c1_35 = arith.constant 1 : index
    %c0_36 = arith.constant 0 : index
    %21 = vector.load %arg2[%c0_32, %c0_33, %c2_34, %c1_35, %c0_36] : memref<1x1x10x18x4xbf16, #tpu.memory_space<vmem>>, vector<1x1x8x16x4xbf16>
    %22 = vector.shape_cast %21 : vector<1x1x8x16x4xbf16> to vector<8x16x4xbf16>
    %23 = vector.shape_cast %22 : vector<8x16x4xbf16> to vector<128x4xbf16>
    %c0_37 = arith.constant 0 : index
    %c0_38 = arith.constant 0 : index
    %c2_39 = arith.constant 2 : index
    %c2_40 = arith.constant 2 : index
    %c0_41 = arith.constant 0 : index
    %24 = vector.load %arg2[%c0_37, %c0_38, %c2_39, %c2_40, %c0_41] : memref<1x1x10x18x4xbf16, #tpu.memory_space<vmem>>, vector<1x1x8x16x4xbf16>
    %25 = vector.shape_cast %24 : vector<1x1x8x16x4xbf16> to vector<8x16x4xbf16>
    %26 = vector.shape_cast %25 : vector<8x16x4xbf16> to vector<128x4xbf16>
    %27 = tpu.concatenate %2, %5, %8, %11, %14, %17, %20, %23, %26 in 1 : vector<128x4xbf16>, vector<128x4xbf16>, vector<128x4xbf16>, vector<128x4xbf16>, vector<128x4xbf16>, vector<128x4xbf16>, vector<128x4xbf16>, vector<128x4xbf16>, vector<128x4xbf16> -> vector<128x36xbf16>
    %c0_42 = arith.constant 0 : index
    %c0_43 = arith.constant 0 : index
    %28 = vector.load %arg4[%c0_42, %c0_43] : memref<36x8xbf16, #tpu.memory_space<vmem>>, vector<36x8xbf16>
    %cst = arith.constant dense<0.000000e+00> : vector<128x8xf32>
    %29 = tpu.matmul %27, %28, %cst {dimension_numbers = #tpu.dot_dimension_numbers<[1], [0], [0], [1], [0, 0, 1, 1], [], []>} : vector<128x36xbf16>, vector<36x8xbf16>, vector<128x8xf32> -> vector<128x8xf32>
    %c0_44 = arith.constant 0 : index
    %c0_45 = arith.constant 0 : index
    %30 = vector.load %arg5[%c0_44, %c0_45] : memref<1x8xf32, #tpu.memory_space<vmem>>, vector<1x8xf32>
    %31 = vector.broadcast %30 : vector<1x8xf32> to vector<128x8xf32>
    %32 = arith.addf %29, %31 : vector<128x8xf32>
    %cst_46 = arith.constant 0.000000e+00 : f32
    %33 = vector.broadcast %cst_46 : f32 to vector<128x8xf32>
    %34 = arith.maximumf %32, %33 : vector<128x8xf32>
    %c0_47 = arith.constant 0 : index
    %c0_48 = arith.constant 0 : index
    %c0_49 = arith.constant 0 : index
    %c0_50 = arith.constant 0 : index
    %35 = vector.load %arg3[%c0_47, %c0_48, %c0_49, %c0_50] : memref<1x1x128x4xbf16, #tpu.memory_space<vmem>>, vector<1x1x128x4xbf16>
    %36 = vector.shape_cast %35 : vector<1x1x128x4xbf16> to vector<128x4xbf16>
    %c0_51 = arith.constant 0 : index
    %c0_52 = arith.constant 0 : index
    %37 = vector.load %arg6[%c0_51, %c0_52] : memref<4x8xbf16, #tpu.memory_space<vmem>>, vector<4x8xbf16>
    %cst_53 = arith.constant dense<0.000000e+00> : vector<128x8xf32>
    %38 = tpu.matmul %36, %37, %cst_53 {dimension_numbers = #tpu.dot_dimension_numbers<[1], [0], [0], [1], [0, 0, 1, 1], [], []>} : vector<128x4xbf16>, vector<4x8xbf16>, vector<128x8xf32> -> vector<128x8xf32>
    %c0_54 = arith.constant 0 : index
    %c0_55 = arith.constant 0 : index
    %39 = vector.load %arg7[%c0_54, %c0_55] : memref<1x8xf32, #tpu.memory_space<vmem>>, vector<1x8xf32>
    %40 = vector.broadcast %39 : vector<1x8xf32> to vector<128x8xf32>
    %41 = arith.addf %38, %40 : vector<128x8xf32>
    %cst_56 = arith.constant 0.000000e+00 : f32
    %42 = vector.broadcast %cst_56 : f32 to vector<128x8xf32>
    %43 = arith.maximumf %41, %42 : vector<128x8xf32>
    %44 = arith.addf %34, %43 : vector<128x8xf32>
    %45 = arith.truncf %44 : vector<128x8xf32> to vector<128x8xbf16>
    %c0_57 = arith.constant 0 : index
    %c0_58 = arith.constant 0 : index
    %c0_59 = arith.constant 0 : index
    %c0_60 = arith.constant 0 : index
    %46 = vector.load %arg8[%c0_57, %c0_58, %c0_59, %c0_60] : memref<1x1x128x8xbf16, #tpu.memory_space<vmem>>, vector<1x1x128x8xbf16>
    %47 = vector.shape_cast %46 : vector<1x1x128x8xbf16> to vector<128x8xbf16>
    %48 = vector.shape_cast %45 : vector<128x8xbf16> to vector<1x1x128x8xbf16>
    tpu.vector_store %arg8[%c0_57, %c0_58, %c0_59, %c0_60], %48 {strides = array<i32>} : memref<1x1x128x8xbf16, #tpu.memory_space<vmem>>, vector<1x1x128x8xbf16>,
    return
  }
  func.func @transform_0(%arg0: i32, %arg1: i32) -> (i32, i32, i32, i32, i32) {
    %c0_i32 = arith.constant 0 : i32
    %c0_i32_0 = arith.constant 0 : i32
    %c0_i32_1 = arith.constant 0 : i32
    %c0_i32_2 = arith.constant 0 : i32
    return %arg0, %arg1, %c0_i32, %c0_i32_0, %c0_i32_1 : i32, i32, i32, i32, i32
  }
  func.func @transform_1(%arg0: i32, %arg1: i32) -> (i32, i32, i32, i32) {
    %c0_i32 = arith.constant 0 : i32
    %c0_i32_0 = arith.constant 0 : i32
    %c0_i32_1 = arith.constant 0 : i32
    return %arg0, %arg1, %c0_i32, %c0_i32_0 : i32, i32, i32, i32
  }
  func.func @transform_2(%arg0: i32, %arg1: i32) -> (i32, i32) {
    %c0_i32 = arith.constant 0 : i32
    %c0_i32_0 = arith.constant 0 : i32
    %c0_i32_1 = arith.constant 0 : i32
    return %c0_i32, %c0_i32_0 : i32, i32
  }
  func.func @transform_3(%arg0: i32, %arg1: i32) -> (i32, i32) {
    %c0_i32 = arith.constant 0 : i32
    %c0_i32_0 = arith.constant 0 : i32
    %c0_i32_1 = arith.constant 0 : i32
    return %c0_i32, %c0_i32_0 : i32, i32
  }
  func.func @transform_4(%arg0: i32, %arg1: i32) -> (i32, i32) {
    %c0_i32 = arith.constant 0 : i32
    %c0_i32_0 = arith.constant 0 : i32
    %c0_i32_1 = arith.constant 0 : i32
    return %c0_i32, %c0_i32_0 : i32, i32
  }
  func.func @transform_5(%arg0: i32, %arg1: i32) -> (i32, i32) {
    %c0_i32 = arith.constant 0 : i32
    %c0_i32_0 = arith.constant 0 : i32
    %c0_i32_1 = arith.constant 0 : i32
    return %c0_i32, %c0_i32_0 : i32, i32
  }
  func.func @transform_6(%arg0: i32, %arg1: i32) -> (i32, i32, i32, i32) {
    %c0_i32 = arith.constant 0 : i32
    %c0_i32_0 = arith.constant 0 : i32
    %c0_i32_1 = arith.constant 0 : i32
    return %arg0, %arg1, %c0_i32, %c0_i32_0 : i32, i32, i32, i32
  }
}

module attributes {stable_mosaic.version = 11 : i64} {
  func.func @kernel(%arg0: i32, %arg1: memref<1x16x16x8xbf16, #tpu.memory_space<vmem>>, %arg2: memref<72x8xbf16, #tpu.memory_space<vmem>>, %arg3: memref<1x8xf32, #tpu.memory_space<vmem>>, %arg4: memref<1x256x8xf32, #tpu.memory_space<vmem>>, %arg5: memref<18x18x8xbf16, #tpu.memory_space<vmem>>) attributes {dimension_semantics = [#tpu.dimension_semantics<parallel>], iteration_bounds = array<i64: 2>, scalar_prefetch = 0 : i64, scratch_operands = 1 : i64, tpu.core_type = #tpu.core_type<tc>, window_params = [{transform_indices = @transform_0, window_bounds = array<i64: 1, 16, 16, 8>}, {pipeline_mode = #tpu.pipeline_mode<synchronous>, transform_indices = @transform_1, window_bounds = array<i64: 72, 8>}, {pipeline_mode = #tpu.pipeline_mode<synchronous>, transform_indices = @transform_2, window_bounds = array<i64: 1, 8>}, {transform_indices = @transform_3, window_bounds = array<i64: 1, 256, 8>}]} {
    %cst = arith.constant 0.000000e+00 : bf16
    %0 = vector.broadcast %cst : bf16 to vector<1x18x8xbf16>
    %c0 = arith.constant 0 : index
    %c0_0 = arith.constant 0 : index
    %c0_1 = arith.constant 0 : index
    %1 = vector.load %arg5[%c0, %c0_0, %c0_1] : memref<18x18x8xbf16, #tpu.memory_space<vmem>>, vector<1x18x8xbf16>
    tpu.vector_store %arg5[%c0, %c0_0, %c0_1], %0 {strides = array<i32>} : memref<18x18x8xbf16, #tpu.memory_space<vmem>>, vector<1x18x8xbf16>,
    %c17 = arith.constant 17 : index
    %c0_2 = arith.constant 0 : index
    %c0_3 = arith.constant 0 : index
    %2 = vector.load %arg5[%c17, %c0_2, %c0_3] : memref<18x18x8xbf16, #tpu.memory_space<vmem>>, vector<1x18x8xbf16>
    tpu.vector_store %arg5[%c17, %c0_2, %c0_3], %0 {strides = array<i32>} : memref<18x18x8xbf16, #tpu.memory_space<vmem>>, vector<1x18x8xbf16>,
    %cst_4 = arith.constant 0.000000e+00 : bf16
    %3 = vector.broadcast %cst_4 : bf16 to vector<16x1x8xbf16>
    %c1 = arith.constant 1 : index
    %c0_5 = arith.constant 0 : index
    %c0_6 = arith.constant 0 : index
    %4 = vector.load %arg5[%c1, %c0_5, %c0_6] : memref<18x18x8xbf16, #tpu.memory_space<vmem>>, vector<16x1x8xbf16>
    tpu.vector_store %arg5[%c1, %c0_5, %c0_6], %3 {strides = array<i32>} : memref<18x18x8xbf16, #tpu.memory_space<vmem>>, vector<16x1x8xbf16>,
    %c1_7 = arith.constant 1 : index
    %c17_8 = arith.constant 17 : index
    %c0_9 = arith.constant 0 : index
    %5 = vector.load %arg5[%c1_7, %c17_8, %c0_9] : memref<18x18x8xbf16, #tpu.memory_space<vmem>>, vector<16x1x8xbf16>
    tpu.vector_store %arg5[%c1_7, %c17_8, %c0_9], %3 {strides = array<i32>} : memref<18x18x8xbf16, #tpu.memory_space<vmem>>, vector<16x1x8xbf16>,
    %c0_10 = arith.constant 0 : index
    %c0_11 = arith.constant 0 : index
    %c0_12 = arith.constant 0 : index
    %c0_13 = arith.constant 0 : index
    %6 = vector.load %arg1[%c0_10, %c0_11, %c0_12, %c0_13] : memref<1x16x16x8xbf16, #tpu.memory_space<vmem>>, vector<1x16x16x8xbf16>
    %7 = vector.shape_cast %6 : vector<1x16x16x8xbf16> to vector<16x16x8xbf16>
    %c1_14 = arith.constant 1 : index
    %c1_15 = arith.constant 1 : index
    %c0_16 = arith.constant 0 : index
    %8 = vector.load %arg5[%c1_14, %c1_15, %c0_16] : memref<18x18x8xbf16, #tpu.memory_space<vmem>>, vector<16x16x8xbf16>
    tpu.vector_store %arg5[%c1_14, %c1_15, %c0_16], %7 {strides = array<i32>} : memref<18x18x8xbf16, #tpu.memory_space<vmem>>, vector<16x16x8xbf16>,
    %c0_17 = arith.constant 0 : index
    %c0_18 = arith.constant 0 : index
    %c0_19 = arith.constant 0 : index
    %9 = vector.load %arg5[%c0_17, %c0_18, %c0_19] : memref<18x18x8xbf16, #tpu.memory_space<vmem>>, vector<16x16x8xbf16>
    %10 = vector.shape_cast %9 : vector<16x16x8xbf16> to vector<256x8xbf16>
    %c0_20 = arith.constant 0 : index
    %c1_21 = arith.constant 1 : index
    %c0_22 = arith.constant 0 : index
    %11 = vector.load %arg5[%c0_20, %c1_21, %c0_22] : memref<18x18x8xbf16, #tpu.memory_space<vmem>>, vector<16x16x8xbf16>
    %12 = vector.shape_cast %11 : vector<16x16x8xbf16> to vector<256x8xbf16>
    %c0_23 = arith.constant 0 : index
    %c2 = arith.constant 2 : index
    %c0_24 = arith.constant 0 : index
    %13 = vector.load %arg5[%c0_23, %c2, %c0_24] : memref<18x18x8xbf16, #tpu.memory_space<vmem>>, vector<16x16x8xbf16>
    %14 = vector.shape_cast %13 : vector<16x16x8xbf16> to vector<256x8xbf16>
    %c1_25 = arith.constant 1 : index
    %c0_26 = arith.constant 0 : index
    %c0_27 = arith.constant 0 : index
    %15 = vector.load %arg5[%c1_25, %c0_26, %c0_27] : memref<18x18x8xbf16, #tpu.memory_space<vmem>>, vector<16x16x8xbf16>
    %16 = vector.shape_cast %15 : vector<16x16x8xbf16> to vector<256x8xbf16>
    %c1_28 = arith.constant 1 : index
    %c1_29 = arith.constant 1 : index
    %c0_30 = arith.constant 0 : index
    %17 = vector.load %arg5[%c1_28, %c1_29, %c0_30] : memref<18x18x8xbf16, #tpu.memory_space<vmem>>, vector<16x16x8xbf16>
    %18 = vector.shape_cast %17 : vector<16x16x8xbf16> to vector<256x8xbf16>
    %c1_31 = arith.constant 1 : index
    %c2_32 = arith.constant 2 : index
    %c0_33 = arith.constant 0 : index
    %19 = vector.load %arg5[%c1_31, %c2_32, %c0_33] : memref<18x18x8xbf16, #tpu.memory_space<vmem>>, vector<16x16x8xbf16>
    %20 = vector.shape_cast %19 : vector<16x16x8xbf16> to vector<256x8xbf16>
    %c2_34 = arith.constant 2 : index
    %c0_35 = arith.constant 0 : index
    %c0_36 = arith.constant 0 : index
    %21 = vector.load %arg5[%c2_34, %c0_35, %c0_36] : memref<18x18x8xbf16, #tpu.memory_space<vmem>>, vector<16x16x8xbf16>
    %22 = vector.shape_cast %21 : vector<16x16x8xbf16> to vector<256x8xbf16>
    %c2_37 = arith.constant 2 : index
    %c1_38 = arith.constant 1 : index
    %c0_39 = arith.constant 0 : index
    %23 = vector.load %arg5[%c2_37, %c1_38, %c0_39] : memref<18x18x8xbf16, #tpu.memory_space<vmem>>, vector<16x16x8xbf16>
    %24 = vector.shape_cast %23 : vector<16x16x8xbf16> to vector<256x8xbf16>
    %c2_40 = arith.constant 2 : index
    %c2_41 = arith.constant 2 : index
    %c0_42 = arith.constant 0 : index
    %25 = vector.load %arg5[%c2_40, %c2_41, %c0_42] : memref<18x18x8xbf16, #tpu.memory_space<vmem>>, vector<16x16x8xbf16>
    %26 = vector.shape_cast %25 : vector<16x16x8xbf16> to vector<256x8xbf16>
    %27 = tpu.concatenate %10, %12, %14, %16, %18, %20, %22, %24, %26 in 1 : vector<256x8xbf16>, vector<256x8xbf16>, vector<256x8xbf16>, vector<256x8xbf16>, vector<256x8xbf16>, vector<256x8xbf16>, vector<256x8xbf16>, vector<256x8xbf16>, vector<256x8xbf16> -> vector<256x72xbf16>
    %c0_43 = arith.constant 0 : index
    %c0_44 = arith.constant 0 : index
    %28 = vector.load %arg2[%c0_43, %c0_44] : memref<72x8xbf16, #tpu.memory_space<vmem>>, vector<72x8xbf16>
    %cst_45 = arith.constant dense<0.000000e+00> : vector<256x8xf32>
    %29 = tpu.matmul %27, %28, %cst_45 {dimension_numbers = #tpu.dot_dimension_numbers<[1], [0], [0], [1], [0, 0, 1, 1], [], []>} : vector<256x72xbf16>, vector<72x8xbf16>, vector<256x8xf32> -> vector<256x8xf32>
    %c0_46 = arith.constant 0 : index
    %c0_47 = arith.constant 0 : index
    %30 = vector.load %arg3[%c0_46, %c0_47] : memref<1x8xf32, #tpu.memory_space<vmem>>, vector<1x8xf32>
    %31 = vector.broadcast %30 : vector<1x8xf32> to vector<256x8xf32>
    %32 = arith.addf %29, %31 : vector<256x8xf32>
    %c0_48 = arith.constant 0 : index
    %c0_49 = arith.constant 0 : index
    %c0_50 = arith.constant 0 : index
    %33 = vector.load %arg4[%c0_48, %c0_49, %c0_50] : memref<1x256x8xf32, #tpu.memory_space<vmem>>, vector<1x256x8xf32>
    %34 = vector.shape_cast %33 : vector<1x256x8xf32> to vector<256x8xf32>
    %35 = vector.shape_cast %32 : vector<256x8xf32> to vector<1x256x8xf32>
    tpu.vector_store %arg4[%c0_48, %c0_49, %c0_50], %35 {strides = array<i32>} : memref<1x256x8xf32, #tpu.memory_space<vmem>>, vector<1x256x8xf32>,
    return
  }
  func.func @transform_0(%arg0: i32) -> (i32, i32, i32, i32) {
    %c0_i32 = arith.constant 0 : i32
    %c0_i32_0 = arith.constant 0 : i32
    %c0_i32_1 = arith.constant 0 : i32
    %c0_i32_2 = arith.constant 0 : i32
    return %arg0, %c0_i32, %c0_i32_0, %c0_i32_1 : i32, i32, i32, i32
  }
  func.func @transform_1(%arg0: i32) -> (i32, i32) {
    %c0_i32 = arith.constant 0 : i32
    %c0_i32_0 = arith.constant 0 : i32
    %c0_i32_1 = arith.constant 0 : i32
    return %c0_i32, %c0_i32_0 : i32, i32
  }
  func.func @transform_2(%arg0: i32) -> (i32, i32) {
    %c0_i32 = arith.constant 0 : i32
    %c0_i32_0 = arith.constant 0 : i32
    %c0_i32_1 = arith.constant 0 : i32
    return %c0_i32, %c0_i32_0 : i32, i32
  }
  func.func @transform_3(%arg0: i32) -> (i32, i32, i32) {
    %c0_i32 = arith.constant 0 : i32
    %c0_i32_0 = arith.constant 0 : i32
    %c0_i32_1 = arith.constant 0 : i32
    return %arg0, %c0_i32, %c0_i32_0 : i32, i32, i32
  }
}

</mosaic_0001>

<bundles_post_ra>
// kernel: _lambda_.2
= control target key start
LH: loop header
LB: loop body
LE: loop exit
PB: predicated region body
PF: predicated region fallthrough
CT: control target
= control target key end

     0   :  { %s2610_s21 = smov 0   ;;  %s2612_s22 = smov 0   ;;  %s3498_s0 = inlined_call_operand.vmem [shape: bf16[2,2,10,18,4], index: 0, kind: input, shape index: {}]   ;;  %s3499_s1 = inlined_call_operand.vmem [shape: bf16[2,2,128,4], index: 1, kind: input, shape index: {}]   ;;  %s3500_s2 = inlined_call_operand.vmem [shape: bf16[36,8], index: 2, kind: input, shape index: {}]   ;;  %s3501_s3 = inlined_call_operand.vmem [shape: f32[1,8], index: 3, kind: input, shape index: {}]   ;;  %s3502_s4 = inlined_call_operand.vmem [shape: bf16[4,8], index: 4, kind: input, shape index: {}]   ;;  %s3503_s5 = inlined_call_operand.vmem [shape: f32[1,8], index: 5, kind: input, shape index: {}]   ;;  %s3504_s6 = inlined_call_operand.vmem [shape: bf16[2,2,128,8], index: 6, kind: output, shape index: {}]  }
   0x1   :  { %s2614_s23 = smov 0   ;;  %s2616_s24 = smov 0  }
   0x2   :  { %s2618_s25 = smov 0  }
   0x3 LB: > { %s25_s26 = sadd.s32 1, %s2557_s23  ;;  %s28_s27 = sadd.s32 1, %s2561_s24  ;;  %s2565_s25 = sphi %s2618_s25, %s16_s25   ;;  %s2561_s24 = sphi %s2616_s24, %s3512_s24   ;;  %s2557_s23 = sphi %s2614_s23, %s3511_s23   ;;  %s2553_s22 = sphi %s2612_s22, %s3510_s22   ;;  %s2549_s21 = sphi %s2610_s21, %s3509_s21  }
   0x4   : > { %p26_p0 = scmp.ge.s32.totalorder %s25_s26, 2  ;;  %p2187_p1 = scmp.ge.s32.totalorder %s2565_s25, 1 }
   0x5   : > { %p248_p2 = scmp.lt.s32.totalorder %s2565_s25, 5 }
   0x6   : > { %s3514_s26 = smov (%p26_p0, %s25_s26), 0  ;;  %s3516_s27 = smov (!%p26_p0, %s28_s27), %s2561_s24 }
   0x7   : > { %p249_p3 = pnand %p2187_p1, %p248_p2  ;;  %p30_p4 = scmp.ge.s32.totalorder %s3516_s27, 2 }
   0x8   : > { %p295_p5 = scmp.lt.s32.totalorder (!%p249_p3), %s2553_s22, 1  ;;  %p297_p6 = scmp.lt.s32.totalorder (!%p249_p3), %s2549_s21, 1 }
   0x9   : > { %s3518_s27 = smov (%p30_p4, %s3516_s27), 0  ;;  %252 = sbr.rel (%p249_p3) target bundleno = 466 (0x1d2), region = 44 }
   0xa   : > { %s2567_s14 = smov (!%p249_p3), 12   ;;  %s2568_s15 = smov (!%p249_p3), 24  }
   0xb   : > { %s2569_s16 = smov (!%p249_p3), 8   ;;  %s2570_s17 = smov (!%p249_p3), 16  }
   0xc   : > { %s2571_s18 = smov (!%p249_p3), 4   ;;  %s2572_s19 = smov (!%p249_p3), 28  }
   0xd   : > { %s2573_s20 = smov (!%p249_p3), 20  }
   0xe   : > { %s3520_s22 = smov (!%p295_p5, %s2553_s22), 1  ;;  %s3522_s21 = smov (!%p297_p6, %s2549_s21), 1  ;;  %vm574_vm0 = vcmask 1042432   ;;  %vm575_vm1 = vcmask 1046532   ;;  %vm347_vm2 = vsmask.f32 3328 }
   0xf   : > { %s2476_s28 = smul.u32 60, %s3520_s22  ;;  %vm348_vm3 = vsmask.f32 7440  ;;  %s2189_s11 = sshll.u32 %s3522_s21, 4  ;;  %vm2649_vm4 = vmor %vm574_vm0, %vm575_vm1  ;;  %vm1796_vm6 = vcmask 1041408   ;;  %vm1611_vm7 = vcmask 31744  }
  0x10   : > { %s2475_s29 = smul.u32 30, %s3522_s21  ;;  %s2190_s12 = sshll.u32 %s3520_s22, 5  ;;  %vm2678_vm5 = vmor %vm347_vm2, %vm348_vm3  ;;  %vm1636_vm8 = vcmask 64512   ;;  %vm1653_vm9 = vcmask 97280   ;;  %vm1670_vm10 = vcmask 130048   ;;  %vm1687_vm11 = vcmask 162816  }
  0x11   : > { %s2653_s13 = sadd.s32 %s2190_s12, %s2189_s11  ;;  %s2574_s21 = smov 32   ;;  %vm1704_vm12 = vcmask 195584   ;;  %vm1721_vm13 = vcmask 228352   ;;  %vm1738_vm14 = vcmask 261120   ;;  %vm1779_vm15 = vcmask 293888  }
  0x12   : > { %s301_s30 = sadd.s32 %s2476_s28, %s2475_s29  ;;  %s2191_s22 = sshll.u32 %s2653_s13, 2  ;;  %vm2050_vm0 = vcmask 60416  }
  0x13   : > { %s2188_s7 = sshll.u32 %s301_s30, 2  ;;  %s2921_s8 = scalar_lea.vmem %s3499_s1, %s2191_s22 }
  0x14   : > { %s2643_s10 = scalar_lea.vmem %s3498_s0, %s2188_s7 }
  0x15   : > { %v2449_v0 = vld [vmem:[%s2643_s10 + $0x3c] sm:$0xff]  ;;  %v332_v1 = vld [vmem:[%s2643_s10 + $0x34] sm:$0xf]  ;;  %v343_v2 = vld [vmem:[%s2643_s10 + $0x38] sm:$0x1] }
  0x16   : > { %v466_v3 = vshll.u32 %v343_v2, 16  ;;  %v546_v4 = vld [vmem:[%s2643_s10 + $0x30] sm:$0xe]  ;;  %v607_v6 = vrot.slane %v332_v1, 5  ;;  %v610_v7 = vrot.slane %v343_v2, 5  ;;  %v460_v8 = vshrl.u32 %v332_v1, 16  ;;  %1395 = vrot.lane.b32.xlu1 %v2449_v0, %s2567_s14 }
  0x17   : > { %v2199_v9 = vrot.slane %v546_v4, 9  ;;  %v2211_v10 = vld [vmem:[%s2643_s10 + $0x3c] sm:$0xf]  ;;  %v2658_v11 = vld [vmem:[%s2643_s10 + $0x40] sm:$0xf]  ;;  %v456_v12 = vshll.u32 %v332_v1, 16 }
  0x18   : > { %v609_v13 = vrot.slane %v607_v6, 4  ;;  %v2661_v14 = vld [vmem:[%s2643_s10 + $0x44] sm:$0x1]  ;;  %v755_v15 = vshrl.u32 %v2211_v10, 16  ;;  %v758_v16 = vshll.u32 %v2211_v10, 16  ;;  %v764_v17 = vshll.u32 %v2658_v11, 16 }
  0x19   : > { %v608_v18 = vsel %vm2649_vm4, %v2199_v9, %v607_v6  ;;  %v768_v19 = vshrl.u32 %v2658_v11, 16  ;;  %v774_v20 = vshll.u32 %v2661_v14, 16  ;;  %v331_v21 = vld [vmem:[%s2643_s10 + $0x30] sm:$0xf]  ;;  %v458_v22 = vrot.slane %v456_v12, 5  ;;  %v2457_v32 = vld [vmem:[%s2643_s10 + $0x48] sm:$0xff] }
  0x1a   : > { %v611_v23 = vsel %vm2649_vm4, %v609_v13, %v610_v7  ;;  %v1323_v24 = vunpack.c.l.b16 %v608_v18  ;;  %v757_v25 = vrot.slane %v755_v15, 4  ;;  %v760_v26 = vrot.slane %v758_v16, 5  ;;  %v2251_v27 = vld [vmem:[%s2643_s10 + $0x48] sm:$0xf]  ;;  %v2674_v37 = vld [vmem:[%s2643_s10 + $0x4c] sm:$0xf]  ;;  %1523 = vrot.lane.b32.xlu2 %v2457_v32, %s2568_s15 }
  0x1b   : > { %v1324_v28 = vunpack.c.l.b16 %v611_v23  ;;  %v766_v29 = vrot.slane %v764_v17, 5  ;;  %v770_v30 = vrot.slane %v768_v19, 4  ;;  %v776_v31 = vrot.slane %v774_v20, 5  ;;  %v2688_v54 = vld [vmem:[%s2643_s10 + $0x50] sm:$0x1] }
  0x1c   : > { %v761_v33 = vor.u32 %v760_v26, %v757_v25  ;;  %v447_v34 = vshrl.u32 %v331_v21, 16  ;;  %v450_v35 = vshll.u32 %v331_v21, 16  ;;  %v462_v36 = vrot.slane %v460_v8, 4  ;;  %v323_v56 = vld [vmem:[%s2643_s10] sm:$0xf] }
  0x1d   : > { %v1335_v38 = vpack.c.b16 %v1324_v28, %v1323_v24  ;;  %v771_v40 = vor.u32 %v770_v30, %v766_v29  ;;  %v468_v41 = vrot.slane %v466_v3, 5  ;;  %v1060_v42 = vshrl.u32 %v2251_v27, 16  ;;  %v2698_v4 = vld [vmem:[%s2643_s10 + $0x4] sm:$0xf]  ;;  %v2703_v10 = vld [vmem:[%s2643_s10 + $0x8] sm:$0x1] }
  0x1e   : > { %v762_v43 = vrot.slane %v761_v33, 4  ;;  %v449_v44 = vrot.slane %v447_v34, 4  ;;  %v452_v45 = vrot.slane %v450_v35, 5  ;;  %v463_v46 = vor.u32 %v462_v36, %v458_v22  ;;  %v2271_v13 = vld [vmem:[%s2643_s10 + $0x48] sm:$0xe] }
  0x1f   : > { %1347 = vrot.lane.b32.xlu0 %v1335_v38, %s2569_s16  ;;  %v772_v47 = vrot.slane %v771_v40, 4  ;;  %v1062_v48 = vrot.slane %v1060_v42, 4  ;;  %v1063_v49 = vshll.u32 %v2251_v27, 16  ;;  %v1069_v50 = vshll.u32 %v2674_v37, 16  ;;  %v2231_v27 = vld [vmem:[%s2643_s10 + $0x3c] sm:$0xe] }
  0x20   : > { %v767_v51 = vsel %vm2678_vm5, %v762_v43, %v766_v29  ;;  %v453_v52 = vor.u32 %v452_v45, %v449_v44  ;;  %v464_v53 = vrot.slane %v463_v46, 4  ;;  %v1073_v55 = vshrl.u32 %v2674_v37, 16  ;;  %v2722_v46 = vld [vmem:[%s2643_s10 + $0x10] sm:$0xf] }
  0x21   : > { %v777_v57 = vsel %vm2678_vm5, %v772_v47, %v776_v31  ;;  %v1411_v58 = vunpack.c.l.b16 %v767_v51  ;;  %v1065_v59 = vrot.slane %v1063_v49, 5  ;;  %v1071_v60 = vrot.slane %v1069_v50, 5  ;;  %v2227_v47 = vld [vmem:[%s2643_s10 + $0xc] sm:$0xe]  ;;  %v2730_v51 = vld [vmem:[%s2643_s10 + $0x14] sm:$0x1] }
  0x22   : > { %v1412_v61 = vunpack.c.l.b16 %v777_v57  ;;  %v454_v62 = vrot.slane %v453_v52, 4  ;;  %v469_v63 = vsel %vm2678_vm5, %v464_v53, %v468_v41  ;;  %v1075_v0 = vrot.slane %v1073_v55, 4 }
  0x23   : > { %v1284_v1 = vunpack.c.l.b16 %v469_v63  ;;  %v1066_v2 = vor.u32 %v1065_v59, %v1062_v48  ;;  %v1079_v3 = vshll.u32 %v2688_v54, 16  ;;  %v351_v6 = vshrl.u32 %v323_v56, 16 }
  0x24   : > { %v1423_v7 = vpack.c.b16 %v1412_v61, %v1411_v58  ;;  %v459_v8 = vsel %vm2678_vm5, %v454_v62, %v458_v22  ;;  %v1076_v9 = vor.u32 %v1075_v0, %v1071_v60  ;;  %v354_v12 = vshll.u32 %v323_v56, 16 }
  0x25   : > { %v1283_v15 = vunpack.c.l.b16 %v459_v8  ;;  %v1067_v16 = vrot.slane %v1066_v2, 4  ;;  %v1081_v17 = vrot.slane %v1079_v3, 5  ;;  %v353_v18 = vrot.slane %v351_v6, 4  ;;  %v2749_v6 = vld [vmem:[%s2643_s10 + $0x44] sm:$0x1] }
  0x26   : > { %1435 = vrot.lane.b32.xlu1 %v1423_v7, %s2570_s17  ;;  %v1077_v19 = vrot.slane %v1076_v9, 4  ;;  %v356_v20 = vrot.slane %v354_v12, 5  ;;  %v360_v21 = vshll.u32 %v2698_v4, 16  ;;  %v364_v23 = vshrl.u32 %v2698_v4, 16  ;;  %v542_v7 = vld [vmem:[%s2643_s10] sm:$0xe] }
  0x27   : > { %v1295_v22 = vpack.c.b16 %v1284_v1, %v1283_v15  ;;  %v1072_v24 = vsel %vm2678_vm5, %v1067_v16, %v1071_v60  ;;  %v370_v25 = vshll.u32 %v2703_v10, 16  ;;  %v2279_v26 = vrot.slane %v2271_v13, 9  ;;  %v2445_v16 = vld [vmem:[%s2643_s10 + $0xc] sm:$0xff] }
  0x28   : > { %v1082_v28 = vsel %vm2678_vm5, %v1077_v19, %v1081_v17  ;;  %v1539_v29 = vunpack.c.l.b16 %v1072_v24  ;;  %v357_v30 = vor.u32 %v356_v20, %v353_v18  ;;  %v362_v31 = vrot.slane %v360_v21, 5  ;;  %v2267_v20 = vld [vmem:[%s2643_s10 + $0x18] sm:$0xe] }
  0x29   : > { %1307 = vrot.lane.b32.xlu0 %v1295_v22, %s2571_s18  ;;  %v1540_v32 = vunpack.c.l.b16 %v1082_v28  ;;  %v366_v33 = vrot.slane %v364_v23, 4  ;;  %v372_v34 = vrot.slane %v370_v25, 5  ;;  %v1217_v35 = vrot.slane %v2674_v37, 5  ;;  %v2760_v25 = vld [vmem:[%s2643_s10 + $0x1c] sm:$0xf] }
  0x2a   : > { %v358_v36 = vrot.slane %v357_v30, 4  ;;  %v1220_v38 = vrot.slane %v2688_v54, 5  ;;  %v2239_v40 = vrot.slane %v2231_v27, 9  ;;  %v912_v41 = vrot.slane %v2658_v11, 5  ;;  %v333_v11 = vld [vmem:[%s2643_s10 + $0x3c] sm:$0xf] }
  0x2b   : > { %v1551_v42 = vpack.c.b16 %v1540_v32, %v1539_v29  ;;  %v367_v43 = vor.u32 %v366_v33, %v362_v31  ;;  %v1218_v44 = vsel %vm2649_vm4, %v2279_v26, %v1217_v35  ;;  %v1219_v45 = vrot.slane %v1217_v35, 4  ;;  %v2766_v30 = vld [vmem:[%s2643_s10 + $0x20] sm:$0x1]  ;;  %v2213_v35 = vld [vmem:[%s2643_s10 + $0x48] sm:$0xf] }
  0x2c   : > { %v363_v48 = vsel %vm2678_vm5, %v358_v36, %v362_v31  ;;  %v1579_v37 = vunpack.c.l.b16 %v1218_v44  ;;  %v913_v49 = vsel %vm2649_vm4, %v2239_v40, %v912_v41  ;;  %v914_v50 = vrot.slane %v912_v41, 4 }
  0x2d   : > { %v368_v52 = vrot.slane %v367_v43, 4  ;;  %v1275_v53 = vunpack.c.l.b16 %v363_v48  ;;  %v1221_v54 = vsel %vm2649_vm4, %v1219_v45, %v1220_v38  ;;  %v915_v55 = vrot.slane %v2661_v14, 5  ;;  %v2744_v14 = vld [vmem:[%s2643_s10 + $0x40] sm:$0xf] }
  0x2e   : > { %1563 = vrot.lane.b32.xlu1 %v1551_v42, %s2572_s19  ;;  %v1580_v56 = vunpack.c.l.b16 %v1221_v54  ;;  %v1451_v57 = vunpack.c.l.b16 %v913_v49  ;;  %v2235_v58 = vrot.slane %v2227_v47, 9  ;;  %v884_v59 = vrot.slane %v2722_v46, 5  ;;  %v2453_v54 = vld [vmem:[%s2643_s10 + $0x18] sm:$0xff] }
  0x2f   : > { %v373_v60 = vsel %vm2678_vm5, %v368_v52, %v372_v34  ;;  %v916_v61 = vsel %vm2649_vm4, %v914_v50, %v915_v55  ;;  %v887_v62 = vrot.slane %v2730_v51, 5  ;;  %v471_v63 = vshrl.u32 %v333_v11, 16  ;;  %v2784_v52 = vld [vmem:[%s2643_s10 + $0x4c] sm:$0xf] }
  0x30   : > { %v1276_v0 = vunpack.c.l.b16 %v373_v60  ;;  %v1591_v1 = vpack.c.b16 %v1580_v56, %v1579_v37  ;;  %v1452_v2 = vunpack.c.l.b16 %v916_v61  ;;  %v885_v3 = vsel %vm2649_vm4, %v2235_v58, %v884_v59 }
  0x31   : > { %v886_v8 = vrot.slane %v884_v59, 4  ;;  %v1443_v9 = vunpack.c.l.b16 %v885_v3  ;;  %v473_v12 = vrot.slane %v471_v63, 4  ;;  %v474_v13 = vshll.u32 %v333_v11, 16  ;;  %v2203_v59 = vld [vmem:[%s2643_s10 + $0xc] sm:$0xf] }
  0x32   : > { %v1291_v15 = vpack.c.b16 %v1276_v0, %v1275_v53  ;;  %v1463_v17 = vpack.c.b16 %v1452_v2, %v1451_v57  ;;  %v480_v18 = vshll.u32 %v2744_v14, 16  ;;  %v484_v19 = vshrl.u32 %v2744_v14, 16  ;;  %v2787_v53 = vld [vmem:[%s2643_s10 + $0x50] sm:$0x1] }
  0x33   : > { %v888_v21 = vsel %vm2649_vm4, %v886_v8, %v887_v62  ;;  %v476_v23 = vrot.slane %v474_v13, 5  ;;  %v490_v22 = vshll.u32 %v2749_v6, 16  ;;  %v2195_v24 = vrot.slane %v542_v7, 9 }
  0x34   : > { %1299 = vrot.lane.b32.xlu0 %v1291_v15, %s2571_s18  ;;  %1475 = vrot.lane.b32.xlu2 %v1463_v17, %s2573_s20  ;;  %v1444_v26 = vunpack.c.l.b16 %v888_v21  ;;  %v482_v27 = vrot.slane %v480_v18, 5  ;;  %v486_v28 = vrot.slane %v484_v19, 4  ;;  %v579_v29 = vrot.slane %v2698_v4, 5  ;;  %v325_v15 = vld [vmem:[%s2643_s10 + $0xc] sm:$0xf] }
  0x35   : > { %v477_v31 = vor.u32 %v476_v23, %v473_v12  ;;  %v492_v32 = vrot.slane %v490_v22, 5  ;;  %v582_v33 = vrot.slane %v2703_v10, 5  ;;  %v2275_v34 = vrot.slane %v2267_v20, 9 }
  0x36   : > { %1387 = vrot.lane.b32.xlu1 %v2445_v16, %s2567_s14  ;;  %v2771_v36 = vpack.c.b16 %v1444_v26, %v1443_v9  ;;  %v487_v38 = vor.u32 %v486_v28, %v482_v27  ;;  %v580_v40 = vsel %vm2649_vm4, %v2195_v24, %v579_v29  ;;  %v581_v4 = vrot.slane %v579_v29, 4 }
  0x37   : > { %v478_v41 = vrot.slane %v477_v31, 4  ;;  %v1315_v42 = vunpack.c.l.b16 %v580_v40  ;;  %v1189_v43 = vrot.slane %v2760_v25, 5  ;;  %v1192_v10 = vrot.slane %v2766_v30, 5 }
  0x38   : > { %v488_v44 = vrot.slane %v487_v38, 4  ;;  %v583_v45 = vsel %vm2649_vm4, %v581_v4, %v582_v33  ;;  %v779_v47 = vshrl.u32 %v2213_v35, 16  ;;  %v782_v48 = vshll.u32 %v2213_v35, 16  ;;  %v2813_v33 = vld [vmem:[%s2643_s10 + $0x14] sm:$0x1] }
  0x39   : > { %v483_v37 = vsel %vm2678_vm5, %v478_v41, %v482_v27  ;;  %v1316_v49 = vunpack.c.l.b16 %v583_v45  ;;  %v1190_v50 = vsel %vm2649_vm4, %v2275_v34, %v1189_v43  ;;  %v1191_v11 = vrot.slane %v1189_v43, 4  ;;  %v2808_v27 = vld [vmem:[%s2643_s10 + $0x10] sm:$0xf] }
  0x3a   : > { %v493_v55 = vsel %vm2678_vm5, %v488_v44, %v492_v32  ;;  %v1285_v56 = vunpack.c.l.b16 %v483_v37  ;;  %v1571_v57 = vunpack.c.l.b16 %v1190_v50  ;;  %v781_v58 = vrot.slane %v779_v47, 4  ;;  %v2243_v47 = vld [vmem:[%s2643_s10 + $0x18] sm:$0xf] }
  0x3b   : > { %v1286_v60 = vunpack.c.l.b16 %v493_v55  ;;  %v1331_v61 = vpack.c.b16 %v1316_v49, %v1315_v42  ;;  %v1193_v62 = vsel %vm2649_vm4, %v1191_v11, %v1192_v10  ;;  %v784_v63 = vrot.slane %v782_v48, 5 }
  0x3c   : > { %1603 = vrot.lane.b32.xlu0 %v1591_v1, %s2574_s21  ;;  %v1572_v0 = vunpack.c.l.b16 %v1193_v62  ;;  %v788_v2 = vshll.u32 %v2784_v52, 16  ;;  %v792_v3 = vshrl.u32 %v2784_v52, 16  ;;  %v798_v7 = vshll.u32 %v2787_v53, 16 }
  0x3d   : > { %v1296_v8 = vpack.c.b16 %v1286_v60, %v1285_v56  ;;  %1339 = vrot.lane.b32.xlu2 %v1331_v61, %s2569_s16  ;;  %v785_v9 = vor.u32 %v784_v63, %v781_v58  ;;  %v659_v12 = vshrl.u32 %v2203_v59, 16  ;;  %v662_v13 = vshll.u32 %v2203_v59, 16 }
  0x3e   : > { %1515 = vrot.lane.b32.xlu1 %v2453_v54, %s2568_s15  ;;  %v2802_v16 = vpack.c.b16 %v1572_v0, %v1571_v57  ;;  %v790_v1 = vrot.slane %v788_v2, 5  ;;  %v794_v17 = vrot.slane %v792_v3, 4  ;;  %v800_v18 = vrot.slane %v798_v7, 5  ;;  %v2272_v0 = vld [vmem:[%s2643_s10 + $0x54] sm:$0xe] }
  0x3f   : > { %v786_v19 = vrot.slane %v785_v9, 4  ;;  %v661_v20 = vrot.slane %v659_v12, 4  ;;  %v664_v21 = vrot.slane %v662_v13, 5  ;;  %v668_v23 = vshll.u32 %v2722_v46, 16  ;;  %v2834_v9 = vld [vmem:[%s2643_s10 + $0x58] sm:$0xf] }
  0x40   : > { %v795_v22 = vor.u32 %v794_v17, %v790_v1  ;;  %v672_v24 = vshrl.u32 %v2722_v46, 16  ;;  %v678_v26 = vshll.u32 %v2730_v51, 16  ;;  %v375_v28 = vshrl.u32 %v325_v15, 16  ;;  %v2837_v12 = vld [vmem:[%s2643_s10 + $0x5c] sm:$0x1] }
  0x41   : > { %v791_v29 = vsel %vm2678_vm5, %v786_v19, %v790_v1  ;;  %v665_v31 = vor.u32 %v664_v21, %v661_v20  ;;  %v670_v32 = vrot.slane %v668_v23, 5  ;;  %v378_v34 = vshll.u32 %v325_v15, 16 }
  0x42   : > { %v796_v35 = vrot.slane %v795_v22, 4  ;;  %v1413_v38 = vunpack.c.l.b16 %v791_v29  ;;  %v674_v40 = vrot.slane %v672_v24, 4  ;;  %v680_v4 = vrot.slane %v678_v26, 5 }
  0x43   : > { %v666_v41 = vrot.slane %v665_v31, 4  ;;  %v377_v46 = vrot.slane %v375_v28, 4  ;;  %v380_v42 = vrot.slane %v378_v34, 5  ;;  %v384_v51 = vshll.u32 %v2808_v27, 16 }
  0x44   : > { %1467 = vrot.lane.b32.xlu0 %v2771_v36, %s2573_s20  ;;  %v801_v43 = vsel %vm2678_vm5, %v796_v35, %v800_v18  ;;  %v675_v10 = vor.u32 %v674_v40, %v670_v32  ;;  %v388_v44 = vshrl.u32 %v2808_v27, 16  ;;  %v394_v45 = vshll.u32 %v2813_v33, 16  ;;  %v547_v18 = vld [vmem:[%s2643_s10 + $0x3c] sm:$0xe] }
  0x45   : > { %v1414_v48 = vunpack.c.l.b16 %v801_v43  ;;  %v671_v37 = vsel %vm2678_vm5, %v666_v41, %v670_v32  ;;  %v381_v49 = vor.u32 %v380_v42, %v377_v46  ;;  %v386_v50 = vrot.slane %v384_v51, 5  ;;  %v543_v46 = vld [vmem:[%s2643_s10 + $0xc] sm:$0xe]  ;;  %v2228_v42 = vld [vmem:[%s2643_s10 + $0x18] sm:$0xe] }
  0x46   : > { %1309 = vrot.lane.b32.xlu1 %v1296_v8, %s2571_s18  ;;  %v676_v11 = vrot.slane %v675_v10, 4  ;;  %v1403_v36 = vunpack.c.l.b16 %v671_v37  ;;  %v390_v54 = vrot.slane %v388_v44, 4  ;;  %v396_v55 = vrot.slane %v394_v45, 5  ;;  %v2450_v51 = vld [vmem:[%s2643_s10 + $0x48] sm:$0xff]  ;;  %v2206_v45 = vld [vmem:[%s2643_s10 + $0x1c] sm:$0xf] }
  0x47   : > { %v1424_v56 = vpack.c.b16 %v1414_v48, %v1413_v38  ;;  %v382_v57 = vrot.slane %v381_v49, 4  ;;  %v964_v58 = vshrl.u32 %v2243_v47, 16  ;;  %v967_v59 = vshll.u32 %v2243_v47, 16 }
  0x48   : > { %v681_v60 = vsel %vm2678_vm5, %v676_v11, %v680_v4  ;;  %v391_v61 = vor.u32 %v390_v54, %v386_v50  ;;  %v973_v62 = vshll.u32 %v2760_v25, 16  ;;  %v977_v63 = vshrl.u32 %v2760_v25, 16 }
  0x49   : > { %v1404_v2 = vunpack.c.l.b16 %v681_v60  ;;  %v387_v3 = vsel %vm2678_vm5, %v382_v57, %v386_v50  ;;  %v966_v7 = vrot.slane %v964_v58, 4  ;;  %v969_v8 = vrot.slane %v967_v59, 5 }
  0x4a   : > { %v392_v13 = vrot.slane %v391_v61, 4  ;;  %v1277_v15 = vunpack.c.l.b16 %v387_v3  ;;  %v975_v1 = vrot.slane %v973_v62, 5  ;;  %v979_v17 = vrot.slane %v977_v63, 4 }
  0x4b   : > { %v1419_v19 = vpack.c.b16 %v1404_v2, %v1403_v36  ;;  %v970_v20 = vor.u32 %v969_v8, %v966_v7  ;;  %v983_v25 = vshll.u32 %v2766_v30, 16  ;;  %v2280_v21 = vrot.slane %v2272_v0, 9 }
  0x4c   : > { %1595 = vrot.lane.b32.xlu0 %v2802_v16, %s2574_s21  ;;  %v397_v23 = vsel %vm2678_vm5, %v392_v13, %v396_v55  ;;  %v980_v22 = vor.u32 %v979_v17, %v975_v1  ;;  %v1224_v24 = vrot.slane %v2834_v9, 5  ;;  %v1227_v26 = vrot.slane %v2837_v12, 5  ;;  %v2232_v55 = vld [vmem:[%s2643_s10 + $0x48] sm:$0xe] }
  0x4d   : > { %1427 = vrot.lane.b32.xlu2 %v1419_v19, %s2570_s17  ;;  %v1278_v28 = vunpack.c.l.b16 %v397_v23  ;;  %v971_v29 = vrot.slane %v970_v20, 4  ;;  %v985_v30 = vrot.slane %v983_v25, 5  ;;  %v2200_v31 = vrot.slane %v547_v18, 9  ;;  %v2458_v20 = vld [vmem:[%s2643_s10 + $0x54] sm:$0xff] }
  0x4e   : > { %1437 = vrot.lane.b32.xlu1 %v1424_v56, %s2570_s17  ;;  %v981_v16 = vrot.slane %v980_v22, 4  ;;  %v1225_v32 = vsel %vm2649_vm4, %v2280_v21, %v1224_v24  ;;  %v1226_v34 = vrot.slane %v1224_v24, 4  ;;  %v614_v35 = vrot.slane %v2744_v14, 5  ;;  %v2268_v24 = vld [vmem:[%s2643_s10 + $0x24] sm:$0xe] }
  0x4f   : > { %v1292_v38 = vpack.c.b16 %v1278_v28, %v1277_v15  ;;  %v976_v40 = vsel %vm2678_vm5, %v971_v29, %v975_v1  ;;  %v1581_v4 = vunpack.c.l.b16 %v1225_v32  ;;  %v617_v41 = vrot.slane %v2749_v6, 5  ;;  %v2220_v6 = vld [vmem:[%s2643_s10 + $0x20] sm:$0x1] }
  0x50   : > { %v986_v43 = vsel %vm2678_vm5, %v981_v16, %v985_v30  ;;  %v1531_v10 = vunpack.c.l.b16 %v976_v40  ;;  %v1228_v44 = vsel %vm2649_vm4, %v1226_v34, %v1227_v26  ;;  %v615_v14 = vsel %vm2649_vm4, %v2200_v31, %v614_v35  ;;  %v2890_v30 = vld [vmem:[%s2643_s10 + $0x28] sm:$0xf]  ;;  %v2893_v31 = vld [vmem:[%s2643_s10 + $0x2c] sm:$0x1] }
  0x51   : > { %v1532_v47 = vunpack.c.l.b16 %v986_v43  ;;  %v1582_v48 = vunpack.c.l.b16 %v1228_v44  ;;  %v616_v37 = vrot.slane %v614_v35, 4  ;;  %v1325_v49 = vunpack.c.l.b16 %v615_v14  ;;  %v2253_v35 = vld [vmem:[%s2643_s10 + $0x54] sm:$0xf] }
  0x52   : > { %v2196_v50 = vrot.slane %v543_v46, 9  ;;  %v586_v11 = vrot.slane %v2808_v27, 5  ;;  %v589_v36 = vrot.slane %v2813_v33, 5  ;;  %v2236_v54 = vrot.slane %v2228_v42, 9  ;;  %v2205_v27 = vld [vmem:[%s2643_s10 + $0x18] sm:$0xf] }
  0x53   : > { %v1547_v56 = vpack.c.b16 %v1532_v47, %v1531_v10  ;;  %v1592_v57 = vpack.c.b16 %v1582_v48, %v1581_v4  ;;  %v618_v58 = vsel %vm2649_vm4, %v616_v37, %v617_v41  ;;  %v891_v59 = vrot.slane %v2206_v45, 5 }
  0x54   : > { %1397 = vrot.lane.b32.xlu0 %v2450_v51, %s2567_s14  ;;  %v1326_v60 = vunpack.c.l.b16 %v618_v58  ;;  %v587_v61 = vsel %vm2649_vm4, %v2196_v50, %v586_v11  ;;  %v588_v62 = vrot.slane %v586_v11, 4  ;;  %v894_v63 = vrot.slane %v2220_v6, 5  ;;  %v1881_v58 = vld [vmem:[%s3502_s4] sm:$0x3] }
  0x55   : > { %1555 = vrot.lane.b32.xlu2 %v1547_v56, %s2572_s19  ;;  %v1317_v33 = vunpack.c.l.b16 %v587_v61  ;;  %v892_v0 = vsel %vm2649_vm4, %v2236_v54, %v891_v59  ;;  %v893_v2 = vrot.slane %v891_v59, 4  ;;  %v2240_v3 = vrot.slane %v2232_v55, 9 }
  0x56   : > { %1301 = vrot.lane.b32.xlu1 %v1292_v38, %s2571_s18  ;;  %v1336_v7 = vpack.c.b16 %v1326_v60, %v1325_v49  ;;  %v590_v8 = vsel %vm2649_vm4, %v588_v62, %v589_v36  ;;  %v1445_v13 = vunpack.c.l.b16 %v892_v0  ;;  %v919_v15 = vrot.slane %v2784_v52, 5 }
  0x57   : > { %v1318_v1 = vunpack.c.l.b16 %v590_v8  ;;  %v895_v17 = vsel %vm2649_vm4, %v893_v2, %v894_v63  ;;  %v922_v18 = vrot.slane %v2787_v53, 5  ;;  %v683_v19 = vshrl.u32 %v2205_v27, 16  ;;  %v2245_v63 = vld [vmem:[%s2643_s10 + $0x24] sm:$0xf] }
  0x58   : > { %v1446_v25 = vunpack.c.l.b16 %v895_v17  ;;  %v920_v21 = vsel %vm2649_vm4, %v2240_v3, %v919_v15  ;;  %v921_v23 = vrot.slane %v919_v15, 4  ;;  %v686_v22 = vshll.u32 %v2205_v27, 16  ;;  %v2463_v17 = vld [vmem:[%s2921_s8] sm:$0xff] }
  0x59   : > { %v1332_v26 = vpack.c.b16 %v1318_v1, %v1317_v33  ;;  %v1453_v28 = vunpack.c.l.b16 %v920_v21  ;;  %v685_v52 = vrot.slane %v683_v19, 4  ;;  %v692_v29 = vshll.u32 %v2206_v45, 16  ;;  %v548_v21 = vld [vmem:[%s2643_s10 + $0x48] sm:$0xe] }
  0x5a   : > { %v1460_v16 = vpack.c.b16 %v1446_v25, %v1445_v13  ;;  %v923_v53 = vsel %vm2649_vm4, %v921_v23, %v922_v18  ;;  %v688_v32 = vrot.slane %v686_v22, 5  ;;  %v696_v34 = vshrl.u32 %v2206_v45, 16  ;;  %v2937_v25 = vld [vmem:[%s2643_s10 + $0x4c] sm:$0xf] }
  0x5b   : > { %v1454_v38 = vunpack.c.l.b16 %v923_v53  ;;  %v694_v40 = vrot.slane %v692_v29, 5  ;;  %v702_v4 = vshll.u32 %v2220_v6, 16  ;;  %v2276_v41 = vrot.slane %v2268_v24, 9 }
  0x5c   : > { %1525 = vrot.lane.b32.xlu0 %v2458_v20, %s2568_s15  ;;  %v689_v46 = vor.u32 %v688_v32, %v685_v52  ;;  %v698_v42 = vrot.slane %v696_v34, 4  ;;  %v1196_v51 = vrot.slane %v2890_v30, 5  ;;  %v1199_v43 = vrot.slane %v2893_v31, 5 }
  0x5d   : > { %1349 = vrot.lane.b32.xlu2 %v1336_v7, %s2569_s16  ;;  %v1464_v10 = vpack.c.b16 %v1454_v38, %v1453_v28  ;;  %v704_v44 = vrot.slane %v702_v4, 5  ;;  %v1084_v14 = vshrl.u32 %v2253_v35, 16  ;;  %v1087_v45 = vshll.u32 %v2253_v35, 16  ;;  %v2942_v28 = vld [vmem:[%s2643_s10 + $0x50] sm:$0x1] }
  0x5e   : > { %1605 = vrot.lane.b32.xlu1 %v1592_v57, %s2574_s21  ;;  %v690_v47 = vrot.slane %v689_v46, 4  ;;  %v699_v48 = vor.u32 %v698_v42, %v694_v40  ;;  %v1197_v37 = vsel %vm2649_vm4, %v2276_v41, %v1196_v51  ;;  %v1198_v49 = vrot.slane %v1196_v51, 4  ;;  %v2951_v38 = vld [vmem:[%s2643_s10 + $0x58] sm:$0xf] }
  0x5f   : > { %v1573_v6 = vunpack.c.l.b16 %v1197_v37  ;;  %v1086_v50 = vrot.slane %v1084_v14, 4  ;;  %v1089_v11 = vrot.slane %v1087_v45, 5  ;;  %v1093_v36 = vshll.u32 %v2834_v9, 16  ;;  %v544_v42 = vld [vmem:[%s2643_s10 + $0x18] sm:$0xe] }
  0x60   : > { %v695_v54 = vsel %vm2678_vm5, %v690_v47, %v694_v40  ;;  %v700_v55 = vrot.slane %v699_v48, 4  ;;  %v1200_v56 = vsel %vm2649_vm4, %v1198_v49, %v1199_v43  ;;  %v1097_v57 = vshrl.u32 %v2834_v9, 16  ;;  %v2962_v37 = vld [vmem:[%s2643_s10 + $0x1c] sm:$0xf] }
  0x61   : > { %v1405_v59 = vunpack.c.l.b16 %v695_v54  ;;  %v1574_v60 = vunpack.c.l.b16 %v1200_v56  ;;  %v1090_v61 = vor.u32 %v1089_v11, %v1086_v50  ;;  %v1095_v62 = vrot.slane %v1093_v36, 5  ;;  %v2971_v11 = vld [vmem:[%s2643_s10 + $0x20] sm:$0x1]  ;;  %v335_v54 = vld [vmem:[%s2643_s10 + $0x48] sm:$0xf] }
  0x62   : > { %v705_v27 = vsel %vm2678_vm5, %v700_v55, %v704_v44  ;;  %v1099_v9 = vrot.slane %v1097_v57, 4  ;;  %v1103_v33 = vshll.u32 %v2837_v12, 16  ;;  %v1951_v7 = vsel %vm1796_vm6, %v1881_v58, 0 }
  0x63   : > { %v1406_v0 = vunpack.c.l.b16 %v705_v27  ;;  %v2926_v2 = vpack.c.b16 %v1574_v60, %v1573_v6  ;;  %v1091_v3 = vrot.slane %v1090_v61, 4  ;;  %1960 = vmatpush.bf16.msra.mxu1 %v1951_v7  ;;  %v988_v15 = vshrl.u32 %v2245_v63, 16  ;;  %2474 = vmatpush.bf16.msra.mxu3 %v1951_v7  ;;  %v2255_v7 = vld [vmem:[%s2643_s10 + $0x60] sm:$0xf] }
  0x64   : > { %1341 = vrot.lane.b32.xlu0 %v1332_v26, %s2569_s16  ;;  %v1100_v8 = vor.u32 %v1099_v9, %v1095_v62  ;;  %v1105_v13 = vrot.slane %v1103_v33, 5  ;;  %v991_v1 = vshll.u32 %v2245_v63, 16  ;;  %v997_v19 = vshll.u32 %v2890_v30, 16 }
  0x65   : > { %1477 = vrot.lane.b32.xlu2 %v1464_v10, %s2573_s20  ;;  %v1420_v12 = vpack.c.b16 %v1406_v0, %v1405_v59  ;;  %v1096_v18 = vsel %vm2678_vm5, %v1091_v3, %v1095_v62  ;;  %v1001_v20 = vshrl.u32 %v2890_v30, 16  ;;  %v990_v24 = vrot.slane %v988_v15, 4  ;;  %v2233_v30 = vld [vmem:[%s2643_s10 + $0x54] sm:$0xe] }
  0x66   : > { %1469 = vrot.lane.b32.xlu1 %v1460_v16, %s2573_s20  ;;  %v1101_v23 = vrot.slane %v1100_v8, 4  ;;  %v1541_v22 = vunpack.c.l.b16 %v1096_v18  ;;  %v993_v26 = vrot.slane %v991_v1, 5  ;;  %v999_v52 = vrot.slane %v997_v19, 5  ;;  %2427 = vmatmul.msk.bf16.vlgmr.msra.gmra.mxu1 %vm1611_vm7, %v2463_v17  ;;  %v2446_v8 = vld [vmem:[%s2643_s10 + $0x18] sm:$0xff] }
  0x67   : > { %v1003_v29 = vrot.slane %v1001_v20, 4  ;;  %v1007_v53 = vshll.u32 %v2893_v31, 16  ;;  %v2201_v16 = vrot.slane %v548_v21, 9  ;;  %v621_v35 = vrot.slane %v2937_v25, 5  ;;  %v2955_v31 = vld [vmem:[%s2643_s10 + $0x5c] sm:$0x1] }
  0x68   : > { %v1106_v32 = vsel %vm2678_vm5, %v1101_v23, %v1105_v13  ;;  %v994_v34 = vor.u32 %v993_v26, %v990_v24  ;;  %v624_v46 = vrot.slane %v2942_v28, 5  ;;  %v2241_v44 = vrot.slane %v2233_v30, 9  ;;  %v2998_v23 = vld [vmem:[%s2643_s10 + $0x64] sm:$0xf] }
  0x69   : > { %v1542_v40 = vunpack.c.l.b16 %v1106_v32  ;;  %v1004_v4 = vor.u32 %v1003_v29, %v999_v52  ;;  %v1009_v41 = vrot.slane %v1007_v53, 5  ;;  %v622_v43 = vsel %vm2649_vm4, %v2201_v16, %v621_v35  ;;  %v2464_v53 = vld [vmem:[%s2921_s8 + $0x8] sm:$0xff]  ;;  %v2207_v16 = vld [vmem:[%s2643_s10 + $0x24] sm:$0xf] }
  0x6a   : > { %v995_v51 = vrot.slane %v994_v34, 4  ;;  %v623_v10 = vrot.slane %v621_v35, 4  ;;  %v1327_v47 = vunpack.c.l.b16 %v622_v43  ;;  %v926_v48 = vrot.slane %v2951_v38, 5  ;;  %v3015_v43 = vld [vmem:[%s2643_s10 + $0x28] sm:$0xf] }
  0x6b   : > { %v1552_v14 = vpack.c.b16 %v1542_v40, %v1541_v22  ;;  %v1005_v45 = vrot.slane %v1004_v4, 4  ;;  %v929_v50 = vrot.slane %v2955_v31, 5  ;;  %v2197_v36 = vrot.slane %v544_v42, 9 }
  0x6c   : > { %1429 = vrot.lane.b32.xlu0 %v1420_v12, %s2570_s17  ;;  %v1000_v49 = vsel %vm2678_vm5, %v995_v51, %v999_v52  ;;  %v625_v6 = vsel %vm2649_vm4, %v623_v10, %v624_v46  ;;  %v927_v58 = vsel %vm2649_vm4, %v2241_v44, %v926_v48  ;;  %v928_v60 = vrot.slane %v926_v48, 4  ;;  %v2451_v12 = vld [vmem:[%s2643_s10 + $0x54] sm:$0xff]  ;;  %v3004_v52 = vld [vmem:[%s2643_s10 + $0x68] sm:$0x1] }
  0x6d   : > { %1565 = vrot.lane.b32.xlu2 %v1552_v14, %s2572_s19  ;;  %v1010_v55 = vsel %vm2678_vm5, %v1005_v45, %v1009_v41  ;;  %v1533_v56 = vunpack.c.l.b16 %v1000_v49  ;;  %v1328_v57 = vunpack.c.l.b16 %v625_v6  ;;  %v593_v61 = vrot.slane %v2962_v37, 5 }
  0x6e   : > { %1597 = vrot.lane.b32.xlu1 %v2926_v2, %s2574_s21  ;;  %v1534_v59 = vunpack.c.l.b16 %v1010_v55  ;;  %v1455_v62 = vunpack.c.l.b16 %v927_v58  ;;  %v596_v63 = vrot.slane %v2971_v11, 5  ;;  %v495_v27 = vshrl.u32 %v335_v54, 16  ;;  %v2215_v58 = vld [vmem:[%s2643_s10 + $0x54] sm:$0xf] }
  0x6f   : > { %v498_v9 = vshll.u32 %v335_v54, 16  ;;  %v930_v0 = vsel %vm2649_vm4, %v928_v60, %v929_v50  ;;  %v2987_v3 = vsel %vm2649_vm4, %v2197_v36, %v593_v61  ;;  %v595_v2 = vrot.slane %v593_v61, 4  ;;  %v3024_v36 = vld [vmem:[%s2643_s10 + $0x2c] sm:$0x1] }
  0x70   : > { %v1548_v33 = vpack.c.b16 %v1534_v59, %v1533_v56  ;;  %v1337_v13 = vpack.c.b16 %v1328_v57, %v1327_v47  ;;  %v1456_v15 = vunpack.c.l.b16 %v930_v0  ;;  %v497_v1 = vrot.slane %v495_v27, 4  ;;  %v2454_v47 = vld [vmem:[%s2643_s10 + $0x24] sm:$0xff] }
  0x71   : > { %v500_v17 = vrot.slane %v498_v9, 5  ;;  %v597_v18 = vsel %vm2649_vm4, %v595_v2, %v596_v63  ;;  %v504_v19 = vshll.u32 %v2937_v25, 16  ;;  %v508_v20 = vshrl.u32 %v2937_v25, 16  ;;  %v2459_v59 = vld [vmem:[%s2643_s10 + $0x60] sm:$0xff] }
  0x72   : > { %v514_v21 = vshll.u32 %v2942_v28, 16  ;;  %v3000_v22 = vpack.c.b16 %v1456_v15, %v1455_v62  ;;  %v1319_v24 = vunpack.c.l.b16 %v2987_v3  ;;  %v1108_v29 = vshrl.u32 %v2255_v7, 16 }
  0x73   : > { %v501_v26 = vor.u32 %v500_v17, %v497_v1  ;;  %v1320_v30 = vunpack.c.l.b16 %v597_v18  ;;  %v506_v32 = vrot.slane %v504_v19, 5  ;;  %v510_v34 = vrot.slane %v508_v20, 4 }
  0x74   : > { %1557 = vrot.lane.b32.xlu0 %v1548_v33, %s2572_s19  ;;  %v1111_v25 = vshll.u32 %v2255_v7, 16  ;;  %v516_v35 = vrot.slane %v514_v21, 5  ;;  %v1110_v40 = vrot.slane %v1108_v29, 4  ;;  %v1117_v4 = vshll.u32 %v2998_v23, 16  ;;  %v2247_v21 = vld [vmem:[%s2643_s10 + $0x30] sm:$0xf] }
  0x75   : > { %1389 = vrot.lane.b32.xlu2 %v2446_v8, %s2567_s14  ;;  %v502_v28 = vrot.slane %v501_v26, 4  ;;  %v511_v41 = vor.u32 %v510_v34, %v506_v32  ;;  %v1121_v42 = vshrl.u32 %v2998_v23, 16  ;;  %v1127_v51 = vshll.u32 %v3004_v52, 16 }
  0x76   : > { %1399 = vrot.lane.b32.xlu1 %v2451_v12, %s2567_s14  ;;  %v1113_v46 = vrot.slane %v1111_v25, 5  ;;  %v1119_v44 = vrot.slane %v1117_v4, 5  ;;  %v707_v14 = vshrl.u32 %v2207_v16, 16  ;;  %v710_v45 = vshll.u32 %v2207_v16, 16  ;;  %2428 = vmatmul.msk.bf16.gmra.mxu1 %vm1611_vm7, %v2464_v53  ;;  %v3052_v16 = vld [vmem:[%s2643_s10 + $0x34] sm:$0xf] }
  0x77   : > { %v507_v10 = vsel %vm2678_vm5, %v502_v28, %v506_v32  ;;  %v512_v48 = vrot.slane %v511_v41, 4  ;;  %v1123_v50 = vrot.slane %v1121_v42, 4  ;;  %v1129_v54 = vrot.slane %v1127_v51, 5  ;;  %v3057_v4 = vld [vmem:[%s2643_s10 + $0x38] sm:$0x1] }
  0x78   : > { %v3021_v49 = vunpack.c.l.b16 %v507_v10  ;;  %v1114_v6 = vor.u32 %v1113_v46, %v1110_v40  ;;  %v709_v55 = vrot.slane %v707_v14, 4  ;;  %v712_v56 = vrot.slane %v710_v45, 5  ;;  %v327_v10 = vld [vmem:[%s2643_s10 + $0x18] sm:$0xf] }
  0x79   : > { %v716_v57 = vshll.u32 %v3015_v43, 16  ;;  %v517_v60 = vsel %vm2678_vm5, %v512_v48, %v516_v35  ;;  %v1124_v62 = vor.u32 %v1123_v50, %v1119_v44  ;;  %v720_v63 = vshrl.u32 %v3015_v43, 16  ;;  %v2465_v48 = vld [vmem:[%s2921_s8 + $0x10] sm:$0xff] }
  0x7a   : > { %v1115_v61 = vrot.slane %v1114_v6, 4  ;;  %v1288_v27 = vunpack.c.l.b16 %v517_v60  ;;  %v713_v9 = vor.u32 %v712_v56, %v709_v55  ;;  %v726_v0 = vshll.u32 %v3024_v36, 16 }
  0x7b   : > { %v718_v33 = vrot.slane %v716_v57, 5  ;;  %v1125_v2 = vrot.slane %v1124_v62, 4  ;;  %v722_v7 = vrot.slane %v720_v63, 4  ;;  %v803_v8 = vshrl.u32 %v2215_v58, 16 }
  0x7c   : > { %1351 = vrot.lane.b32.xlu0 %v1337_v13, %s2569_s16  ;;  %v1120_v3 = vsel %vm2678_vm5, %v1115_v61, %v1119_v44  ;;  %v1333_v15 = vpack.c.b16 %v1320_v30, %v1319_v24  ;;  %v714_v17 = vrot.slane %v713_v9, 4  ;;  %v728_v12 = vrot.slane %v726_v0, 5 }
  0x7d   : > { %1517 = vrot.lane.b32.xlu2 %v2454_v47, %s2568_s15  ;;  %v3037_v1 = vunpack.c.l.b16 %v1120_v3  ;;  %v1130_v18 = vsel %vm2678_vm5, %v1125_v2, %v1129_v54  ;;  %v723_v13 = vor.u32 %v722_v7, %v718_v33  ;;  %v805_v19 = vrot.slane %v803_v8, 4  ;;  %v3079_v2 = vld [vmem:[%s2643_s10 + $0x58] sm:$0xf]  ;;  %v3082_v8 = vpop.permute.xlu2 %1523 }
  0x7e   : > { %1527 = vrot.lane.b32.xlu1 %v2459_v59, %s2568_s15  ;;  %v806_v20 = vshll.u32 %v2215_v58, 16  ;;  %v3043_v26 = vunpack.c.l.b16 %v1130_v18  ;;  %v719_v24 = vsel %vm2678_vm5, %v714_v17, %v718_v33  ;;  %v812_v29 = vshll.u32 %v2951_v38, 16 }
  0x7f   : > { %v816_v53 = vshrl.u32 %v2951_v38, 16  ;;  %v1297_v30 = vpack.c.b16 %v1288_v27, %v3021_v49  ;;  %v724_v32 = vrot.slane %v723_v13, 4  ;;  %v822_v25 = vshll.u32 %v2955_v31, 16 }
  0x80   : > { %v808_v34 = vrot.slane %v806_v20, 5  ;;  %v3054_v28 = vunpack.c.l.b16 %v719_v24  ;;  %v814_v35 = vrot.slane %v812_v29, 5  ;;  %v1012_v41 = vshrl.u32 %v2247_v21, 16 }
  0x81   : > { %v818_v40 = vrot.slane %v816_v53, 4  ;;  %v1553_v46 = vpack.c.b16 %v3043_v26, %v3037_v1  ;;  %v729_v38 = vsel %vm2678_vm5, %v724_v32, %v728_v12  ;;  %v1015_v51 = vshll.u32 %v2247_v21, 16  ;;  %v549_v12 = vld [vmem:[%s2643_s10 + $0x54] sm:$0xe]  ;;  %v3090_v21 = vld [vmem:[%s2643_s10 + $0x5c] sm:$0x1] }
  0x82   : > { %v809_v42 = vor.u32 %v808_v34, %v805_v19  ;;  %v824_v44 = vrot.slane %v822_v25, 5  ;;  %v1014_v14 = vrot.slane %v1012_v41, 4  ;;  %v1021_v45 = vshll.u32 %v3052_v16, 16  ;;  %v2273_v53 = vld [vmem:[%s2643_s10 + $0x60] sm:$0xe] }
  0x83   : > { %v819_v31 = vor.u32 %v818_v40, %v814_v35  ;;  %v1017_v49 = vrot.slane %v1015_v51, 5  ;;  %v1025_v6 = vshrl.u32 %v3052_v16, 16  ;;  %v1031_v50 = vshll.u32 %v3057_v4, 16 }
  0x84   : > { %1479 = vrot.lane.b32.xlu0 %v3000_v22, %s2573_s20  ;;  %v810_v47 = vrot.slane %v809_v42, 4  ;;  %v1408_v54 = vunpack.c.l.b16 %v729_v38  ;;  %v1023_v56 = vrot.slane %v1021_v45, 5  ;;  %v399_v57 = vshrl.u32 %v327_v10, 16 }
  0x85   : > { %1311 = vrot.lane.b32.xlu2 %v1297_v30, %s2571_s18  ;;  %v820_v55 = vrot.slane %v819_v31, 4  ;;  %v1018_v22 = vor.u32 %v1017_v49, %v1014_v14  ;;  %v1027_v59 = vrot.slane %v1025_v6, 4  ;;  %v1033_v60 = vrot.slane %v1031_v50, 5  ;;  %v337_v49 = vld [vmem:[%s2643_s10 + $0x54] sm:$0xf] }
  0x86   : > { %1343 = vrot.lane.b32.xlu1 %v1333_v15, %s2569_s16  ;;  %v815_v58 = vsel %vm2678_vm5, %v810_v47, %v814_v35  ;;  %v401_v63 = vrot.slane %v399_v57, 4  ;;  %v402_v27 = vshll.u32 %v327_v10, 16  ;;  %2429 = vmatmul.msk.bf16.gmra.mxu1 %vm1611_vm7, %v2465_v48  ;;  %v408_v3 = vshll.u32 %v2962_v37, 16  ;;  %v1759_v57 = vld [vmem:[%s3500_s2 + $0x10] sm:$0x3] }
  0x87   : > { %v825_v61 = vsel %vm2678_vm5, %v820_v55, %v824_v44  ;;  %v1415_v62 = vunpack.c.l.b16 %v815_v58  ;;  %v1019_v33 = vrot.slane %v1018_v22, 4  ;;  %v1028_v0 = vor.u32 %v1027_v59, %v1023_v56  ;;  %v2447_v44 = vld [vmem:[%s2643_s10 + $0x24] sm:$0xff] }
  0x88   : > { %v1416_v9 = vunpack.c.l.b16 %v825_v61  ;;  %v1421_v7 = vpack.c.b16 %v1408_v54, %v3054_v28  ;;  %v404_v15 = vrot.slane %v402_v27, 5  ;;  %v412_v1 = vshrl.u32 %v2962_v37, 16  ;;  %v3100_v40 = vpop.permute.xlu1 %1395  ;;  %v3126_v61 = vld [vmem:[%s2643_s10 + $0x64] sm:$0xf] }
  0x89   : > { %v418_v17 = vshll.u32 %v2971_v11, 16  ;;  %v1024_v13 = vsel %vm2678_vm5, %v1019_v33, %v1023_v56  ;;  %v1029_v19 = vrot.slane %v1028_v0, 4  ;;  %v410_v20 = vrot.slane %v408_v3, 5  ;;  %v2466_v33 = vld [vmem:[%s2921_s8 + $0x18] sm:$0xff]  ;;  %v3133_v0 = vld [vmem:[%s2643_s10 + $0x68] sm:$0x1] }
  0x8a   : > { %v1425_v18 = vpack.c.b16 %v1416_v9, %v1415_v62  ;;  %v1535_v26 = vunpack.c.l.b16 %v1024_v13  ;;  %v405_v24 = vor.u32 %v404_v15, %v401_v63  ;;  %v414_v29 = vrot.slane %v412_v1, 4 }
  0x8b   : > { %v1034_v37 = vsel %vm2678_vm5, %v1029_v19, %v1033_v60  ;;  %v420_v30 = vrot.slane %v418_v17, 5  ;;  %v2202_v11 = vrot.slane %v549_v12, 9  ;;  %v628_v32 = vrot.slane %v3079_v2, 5  ;;  %v2229_v17 = vld [vmem:[%s2643_s10 + $0x24] sm:$0xe] }
  0x8c   : > { %1567 = vrot.lane.b32.xlu0 %v1553_v46, %s2572_s19  ;;  %v1536_v34 = vunpack.c.l.b16 %v1034_v37  ;;  %v406_v25 = vrot.slane %v405_v24, 4  ;;  %v415_v28 = vor.u32 %v414_v29, %v410_v20  ;;  %v631_v35 = vrot.slane %v3090_v21, 5 }
  0x8d   : > { %1439 = vrot.lane.b32.xlu2 %v1425_v18, %s2570_s17  ;;  %v629_v41 = vsel %vm2649_vm4, %v2202_v11, %v628_v32  ;;  %v630_v46 = vrot.slane %v628_v32, 4  ;;  %v2281_v38 = vrot.slane %v2273_v53, 9  ;;  %v1231_v42 = vrot.slane %v2998_v23, 5  ;;  %v2441_v53 = vld [vmem:[%s2643_s10 + $0x30] sm:$0xff] }
  0x8e   : > { %1431 = vrot.lane.b32.xlu1 %v1421_v7, %s2570_s17  ;;  %v411_v51 = vsel %vm2678_vm5, %v406_v25, %v410_v20  ;;  %v416_v10 = vrot.slane %v415_v28, 4  ;;  %v1329_v31 = vunpack.c.l.b16 %v629_v41  ;;  %v1234_v54 = vrot.slane %v3004_v52, 5  ;;  %v3121_v58 = vpop.permute.xlu2 %1475  ;;  %v2234_v52 = vld [vmem:[%s2643_s10 + $0x60] sm:$0xe] }
  0x8f   : > { %v1279_v14 = vunpack.c.l.b16 %v411_v51  ;;  %v632_v45 = vsel %vm2649_vm4, %v630_v46, %v631_v35  ;;  %v1232_v47 = vsel %vm2649_vm4, %v2281_v38, %v1231_v42  ;;  %v1233_v48 = vrot.slane %v1231_v42, 4  ;;  %v2217_v41 = vld [vmem:[%s2643_s10 + $0x60] sm:$0xf] }
  0x90   : > { %v421_v23 = vsel %vm2678_vm5, %v416_v10, %v420_v30  ;;  %v1330_v50 = vunpack.c.l.b16 %v632_v45  ;;  %v1549_v55 = vpack.c.b16 %v1536_v34, %v1535_v26  ;;  %v1583_v59 = vunpack.c.l.b16 %v1232_v47 }
  0x91   : > { %v3113_v6 = vpop.permute.xlu0 %1347  ;;  %v1280_v56 = vunpack.c.l.b16 %v421_v23  ;;  %v1235_v22 = vsel %vm2649_vm4, %v1233_v48, %v1234_v54  ;;  %v519_v60 = vshrl.u32 %v337_v49, 16  ;;  %v522_v27 = vshll.u32 %v337_v49, 16 }
  0x92   : > { %v1338_v63 = vpack.c.b16 %v1330_v50, %v1329_v31  ;;  %v528_v9 = vshll.u32 %v3079_v2, 16  ;;  %v532_v7 = vshrl.u32 %v3079_v2, 16  ;;  %v538_v15 = vshll.u32 %v3090_v21, 16  ;;  %v2455_v21 = vld [vmem:[%s2643_s10 + $0x30] sm:$0xff] }
  0x93   : > { %v1293_v62 = vpack.c.b16 %v1280_v56, %v1279_v14  ;;  %v521_v3 = vrot.slane %v519_v60, 4  ;;  %v1773_v1 = vunpack.c.l.b16 %v1759_v57  ;;  %v1584_v12 = vunpack.c.l.b16 %v1235_v22 }
  0x94   : > { %1391 = vrot.lane.b32.xlu0 %v2447_v44, %s2567_s14  ;;  %v524_v18 = vrot.slane %v522_v27, 5  ;;  %v530_v13 = vrot.slane %v528_v9, 5  ;;  %v2242_v19 = vrot.slane %v2234_v52, 9  ;;  %v534_v20 = vrot.slane %v532_v7, 4  ;;  %v2462_v44 = vld [vmem:[%s3500_s2 + $0x8] sm:$0xff] }
  0x95   : > { %1303 = vrot.lane.b32.xlu2 %v1293_v62, %s2571_s18  ;;  %v540_v26 = vrot.slane %v538_v15, 5  ;;  %v1776_v24 = vpack.c.b16 %v1773_v1, %v1773_v1  ;;  %v933_v2 = vrot.slane %v3126_v61, 5  ;;  %v936_v30 = vrot.slane %v3133_v0, 5  ;;  %v2257_v9 = vld [vmem:[%s2643_s10 + $0x6c] sm:$0xf] }
  0x96   : > { %1559 = vrot.lane.b32.xlu1 %v1549_v55, %s2572_s19  ;;  %v525_v37 = vor.u32 %v524_v18, %v521_v3  ;;  %2430 = vmatmul.msk.bf16.gmra.mxu1 %vm1611_vm7, %v2466_v33  ;;  %v2237_v11 = vrot.slane %v2229_v17, 9  ;;  %v898_v32 = vrot.slane %v3015_v43, 5  ;;  %v535_v34 = vor.u32 %v534_v20, %v530_v13  ;;  %v3182_v15 = vld [vmem:[%s2643_s10 + $0x70] sm:$0xf] }
  0x97   : > { %v1798_v25 = vsel %vm1796_vm6, %v1776_v24, 0  ;;  %v934_v28 = vsel %vm2649_vm4, %v2242_v19, %v933_v2  ;;  %v935_v35 = vrot.slane %v933_v2, 4  ;;  %v1593_v46 = vpack.c.b16 %v1584_v12, %v1583_v59  ;;  %v3164_v54 = vpop.permute.xlu2 %1339 }
  0x98   : > { %v1436_v29 = vpop.permute.xlu1 %1435  ;;  %v526_v38 = vrot.slane %v525_v37, 4  ;;  %2471 = vmatpush.bf16.msra.mxu2 %v1798_v25  ;;  %v1457_v42 = vunpack.c.l.b16 %v934_v28  ;;  %v900_v51 = vrot.slane %v898_v32, 4  ;;  %1805 = vmatpush.bf16.msra.mxu0 %v1798_v25  ;;  %v536_v31 = vrot.slane %v535_v34, 4 }
  0x99   : > { %v937_v43 = vsel %vm2649_vm4, %v935_v35, %v936_v30  ;;  %v899_v14 = vsel %vm2649_vm4, %v2237_v11, %v898_v32  ;;  %v901_v45 = vrot.slane %v3024_v36, 5  ;;  %v827_v23 = vshrl.u32 %v2217_v41, 16  ;;  %v2269_v30 = vld [vmem:[%s2643_s10 + $0x30] sm:$0xe]  ;;  %v2467_v11 = vld [vmem:[%s2921_s8 + $0x20] sm:$0xff] }
  0x9a   : > { %v531_v48 = vsel %vm2678_vm5, %v526_v38, %v530_v13  ;;  %v1458_v49 = vunpack.c.l.b16 %v937_v43  ;;  %v541_v55 = vsel %vm2678_vm5, %v536_v31, %v540_v26  ;;  %v830_v62 = vshll.u32 %v2217_v41, 16  ;;  %v3188_v13 = vld [vmem:[%s2643_s10 + $0x74] sm:$0x1] }
  0x9b   : > { %v1308_v10 = vpop.permute.xlu0 %1307  ;;  %v1289_v56 = vunpack.c.l.b16 %v531_v48  ;;  %v902_v36 = vsel %vm2649_vm4, %v900_v51, %v901_v45  ;;  %v1290_v22 = vunpack.c.l.b16 %v541_v55  ;;  %v829_v52 = vrot.slane %v827_v23, 4 }
  0x9c   : > { %1519 = vrot.lane.b32.xlu0 %v2455_v21, %s2568_s15  ;;  %v1626_v47 = vsel %vm1611_vm7, %v2441_v53, %v1308_v10  ;;  %v1448_v59 = vunpack.c.l.b16 %v902_v36  ;;  %2472 = vmatpush.bf16.msra.mxu2 %v2462_v44  ;;  %v836_v27 = vshll.u32 %v3126_v61, 16  ;;  %v1466_v3 = vpack.c.b16 %v1458_v49, %v1457_v42  ;;  %v3215_v36 = vld [vmem:[%s2643_s10 + $0x28] sm:$0xf] }
  0x9d   : > { %v1646_v50 = vsel %vm1636_vm8, %v1626_v47, %v3113_v6  ;;  %1607 = vrot.lane.b32.xlu2 %v1593_v46, %s2574_s21  ;;  %v1447_v6 = vunpack.c.l.b16 %v899_v14  ;;  %1806 = vmatpush.bf16.msra.mxu0 %v2462_v44  ;;  %v1298_v33 = vpack.c.b16 %v1290_v22, %v1289_v56  ;;  %v840_v7 = vshrl.u32 %v3126_v61, 16  ;;  %v2437_v44 = vld [vmem:[%s2643_s10] sm:$0xff] }
  0x9e   : > { %v1663_v57 = vsel %vm1653_vm9, %v1646_v50, %v3100_v40  ;;  %1353 = vrot.lane.b32.xlu1 %v1338_v63, %s2569_s16  ;;  %v2461_v40 = vld [vmem:[%s3500_s2] sm:$0xff]  ;;  %v832_v17 = vrot.slane %v830_v62, 5  ;;  %v838_v12 = vrot.slane %v836_v27, 5  ;;  %v846_v18 = vshll.u32 %v3133_v0, 16 }
  0x9f   : > { %v1680_v60 = vsel %vm1670_vm10, %v1663_v57, %v1436_v29  ;;  %v1461_v19 = vpack.c.b16 %v1448_v59, %v1447_v6  ;;  %v842_v20 = vrot.slane %v840_v7, 4  ;;  %v1132_v26 = vshrl.u32 %v2257_v9, 16 }
  0xa0   : > { %v1564_v63 = vpop.permute.xlu1 %1563  ;;  %v1697_v1 = vsel %vm1687_vm11, %v1680_v60, %v3121_v58  ;;  %v1135_v24 = vshll.u32 %v2257_v9, 16  ;;  %v833_v2 = vor.u32 %v832_v17, %v829_v52  ;;  %v848_v29 = vrot.slane %v846_v18, 5  ;;  %2473 = vmatpush.bf16.msra.mxu2 %v2461_v40  ;;  %v3222_v52 = vld [vmem:[%s2643_s10 + $0x2c] sm:$0x1] }
  0xa1   : > { %v1141_v61 = vshll.u32 %v3182_v15, 16  ;;  %v1145_v21 = vshrl.u32 %v3182_v15, 16  ;;  %1807 = vmatpush.bf16.msra.mxu0 %v2461_v40  ;;  %v843_v58 = vor.u32 %v842_v20, %v838_v12  ;;  %v1134_v0 = vrot.slane %v1132_v26, 4 }
  0xa2   : > { %v1137_v53 = vrot.slane %v1135_v24, 5  ;;  %v1151_v37 = vshll.u32 %v3188_v13, 16  ;;  %v1714_v32 = vsel %vm1704_vm12, %v1697_v1, %v3082_v8  ;;  %v834_v34 = vrot.slane %v833_v2, 4  ;;  %v329_v8 = vld [vmem:[%s2643_s10 + $0x24] sm:$0xf] }
  0xa3   : > { %v1143_v25 = vrot.slane %v1141_v61, 5  ;;  %v1147_v28 = vrot.slane %v1145_v21, 4  ;;  %v844_v41 = vrot.slane %v843_v58, 4  ;;  %v2277_v31 = vrot.slane %v2269_v30, 9 }
  0xa4   : > { %1313 = vrot.lane.b32.xlu0 %v1298_v33, %s2571_s18  ;;  %v1138_v46 = vor.u32 %v1137_v53, %v1134_v0  ;;  %v839_v42 = vsel %vm2678_vm5, %v834_v34, %v838_v12  ;;  %v1153_v10 = vrot.slane %v1151_v37, 5  ;;  %v1731_v43 = vsel %vm1721_vm13, %v1714_v32, %v1564_v63  ;;  %v2210_v32 = vld [vmem:[%s2643_s10 + $0x34] sm:$0xf] }
  0xa5   : > { %1471 = vrot.lane.b32.xlu2 %v1461_v19, %s2573_s20  ;;  %v1148_v51 = vor.u32 %v1147_v28, %v1143_v25  ;;  %v849_v45 = vsel %vm2678_vm5, %v844_v41, %v848_v29  ;;  %v1417_v47 = vunpack.c.l.b16 %v839_v42  ;;  %v1203_v50 = vrot.slane %v3052_v16, 5  ;;  %v2468_v28 = vld [vmem:[%s2921_s8 + $0x28] sm:$0xff]  ;;  %v2448_v41 = vld [vmem:[%s2643_s10 + $0x30] sm:$0xff]  ;;  %v545_v42 = vld [vmem:[%s2643_s10 + $0x24] sm:$0xe] }
  0xa6   : > { %v1300_v35 = vpop.permute.xlu0 %1299  ;;  %1481 = vrot.lane.b32.xlu1 %v1466_v3, %s2573_s20  ;;  %v1139_v48 = vrot.slane %v1138_v46, 4  ;;  %2431 = vmatmul.msk.bf16.gmra.mxu1 %vm1611_vm7, %v2467_v11  ;;  %v1418_v49 = vunpack.c.l.b16 %v849_v45  ;;  %v1206_v56 = vrot.slane %v3057_v4, 5  ;;  %v423_v57 = vshrl.u32 %v329_v8, 16  ;;  %v2274_v3 = vld [vmem:[%s2643_s10 + $0x6c] sm:$0xe] }
  0xa7   : > { %v3200_v38 = vpop.permute.xlu2 %1427  ;;  %v1149_v23 = vrot.slane %v1148_v51, 4  ;;  %v1204_v60 = vsel %vm2649_vm4, %v2277_v31, %v1203_v50  ;;  %v1614_v16 = vsel %vm1611_vm7, %v2437_v44, %v1300_v35  ;;  %v1205_v27 = vrot.slane %v1203_v50, 4  ;;  %v2230_v46 = vld [vmem:[%s2643_s10 + $0x30] sm:$0xe]  ;;  %2432 = vmatmul.msk.bf16.vlgmr.msra.gmra.mxu3 %vm1611_vm7, %v2468_v28 }
  0xa8   : > { %v1388_v14 = vpop.permute.xlu1 %1387  ;;  %v1144_v55 = vsel %vm2678_vm5, %v1139_v48, %v1143_v25  ;;  %v1426_v22 = vpack.c.b16 %v1418_v49, %v1417_v47  ;;  %v1575_v40 = vunpack.c.l.b16 %v1204_v60  ;;  %v425_v4 = vrot.slane %v423_v57, 4  ;;  %v2452_v49 = vld [vmem:[%s2643_s10 + $0x60] sm:$0xff] }
  0xa9   : > { %v1154_v6 = vsel %vm2678_vm5, %v1149_v23, %v1153_v10  ;;  %v1545_v59 = vunpack.c.l.b16 %v1144_v55  ;;  %v426_v9 = vshll.u32 %v329_v8, 16  ;;  %v432_v63 = vshll.u32 %v3215_v36, 16 }
  0xaa   : > { %v1546_v62 = vunpack.c.l.b16 %v1154_v6  ;;  %v436_v33 = vshrl.u32 %v3215_v36, 16  ;;  %v1207_v17 = vsel %vm2649_vm4, %v1205_v27, %v1206_v56  ;;  %v442_v12 = vshll.u32 %v3222_v52, 16  ;;  %v2250_v27 = vld [vmem:[%s2643_s10 + $0x40] sm:$0xf] }
  0xab   : > { %v1238_v18 = vrot.slane %v3182_v15, 5  ;;  %v1576_v20 = vunpack.c.l.b16 %v1207_v17  ;;  %v428_v24 = vrot.slane %v426_v9, 5  ;;  %v434_v2 = vrot.slane %v432_v63, 5 }
  0xac   : > { %1441 = vrot.lane.b32.xlu0 %v1426_v22, %s2570_s17  ;;  %v1554_v1 = vpack.c.b16 %v1546_v62, %v1545_v59  ;;  %v438_v61 = vrot.slane %v436_v33, 4  ;;  %v2282_v21 = vrot.slane %v2274_v3, 9  ;;  %v1241_v53 = vrot.slane %v3188_v13, 5  ;;  %v2209_v22 = vld [vmem:[%s2643_s10 + $0x30] sm:$0xf]  ;;  %v2456_v33 = vld [vmem:[%s2643_s10 + $0x3c] sm:$0xff] }
  0xad   : > { %v1589_v15 = vpack.c.b16 %v1576_v20, %v1575_v40  ;;  %v429_v58 = vor.u32 %v428_v24, %v425_v4  ;;  %v1240_v0 = vrot.slane %v1238_v18, 4  ;;  %v1638_v37 = vsel %vm1636_vm8, %v1614_v16, %v3164_v54  ;;  %v2442_v20 = vld [vmem:[%s2643_s10 + $0x3c] sm:$0xff] }
  0xae   : > { %v1604_v7 = vpop.permute.xlu0 %1603  ;;  %1569 = vrot.lane.b32.xlu1 %v1554_v1, %s2572_s19  ;;  %v439_v30 = vor.u32 %v438_v61, %v434_v2  ;;  %v444_v11 = vrot.slane %v442_v12, 5  ;;  %v1655_v34 = vsel %vm1653_vm9, %v1638_v37, %v1388_v14  ;;  %v1239_v54 = vsel %vm2649_vm4, %v2282_v21, %v1238_v18  ;;  %v3260_v14 = vld [vmem:[%s2643_s10 + $0x38] sm:$0x1]  ;;  %v2249_v1 = vld [vmem:[%s2643_s10 + $0x3c] sm:$0xf] }
  0xaf   : > { %v1748_v19 = vsel %vm1738_vm14, %v1731_v43, %v1604_v7  ;;  %v3234_v26 = vpop.permute.xlu2 %1555  ;;  %1599 = vrot.lane.b32.xlu2 %v1589_v15, %s2574_s21  ;;  %v430_v25 = vrot.slane %v429_v58, 4  ;;  %v1242_v51 = vsel %vm2649_vm4, %v1240_v0, %v1241_v53  ;;  %v905_v10 = vrot.slane %v2210_v32, 5  ;;  %v2460_v58 = vld [vmem:[%s2643_s10 + $0x6c] sm:$0xff]  ;;  %v2270_v53 = vld [vmem:[%s2643_s10 + $0x3c] sm:$0xe] }
  0xb0   : > { %2391 = vmatmul.msk.bf16.vlgmr.msra.gmra.mxu2 %vm1779_vm15, %v1748_v19  ;;  %v1516_v29 = vpop.permute.xlu1 %1515  ;;  %v440_v35 = vrot.slane %v439_v30, 4  ;;  %v1672_v31 = vsel %vm1670_vm10, %v1655_v34, %v3200_v38  ;;  %v600_v45 = vrot.slane %v3215_v36, 5  ;;  %v2238_v50 = vrot.slane %v2230_v46, 9 }
  0xb1   : > { %v435_v13 = vsel %vm2678_vm5, %v430_v25, %v434_v2  ;;  %v2198_v55 = vrot.slane %v545_v42, 9  ;;  %v1585_v56 = vunpack.c.l.b16 %v1239_v54  ;;  %v1586_v57 = vunpack.c.l.b16 %v1242_v51 }
  0xb2   : > { %v445_v8 = vsel %vm2678_vm5, %v440_v35, %v444_v11  ;;  %v1281_v43 = vunpack.c.l.b16 %v435_v13  ;;  %v907_v59 = vrot.slane %v905_v10, 4  ;;  %v908_v36 = vrot.slane %v3260_v14, 5 }
  0xb3   : > { %v1282_v47 = vunpack.c.l.b16 %v445_v8  ;;  %v602_v16 = vrot.slane %v600_v45, 4  ;;  %v603_v62 = vrot.slane %v3222_v52, 5  ;;  %v906_v40 = vsel %vm2649_vm4, %v2238_v50, %v905_v10 }
  0xb4   : > { %v601_v4 = vsel %vm2649_vm4, %v2198_v55, %v600_v45  ;;  %v731_v9 = vshrl.u32 %v2209_v22, 16  ;;  %v1594_v63 = vpack.c.b16 %v1586_v57, %v1585_v56  ;;  %v734_v3 = vshll.u32 %v2209_v22, 16 }
  0xb5   : > { %v1294_v6 = vpack.c.b16 %v1282_v47, %v1281_v43  ;;  %v740_v7 = vshll.u32 %v2210_v32, 16  ;;  %v744_v52 = vshrl.u32 %v2210_v32, 16  ;;  %v909_v12 = vsel %vm2649_vm4, %v907_v59, %v908_v36  ;;  %v2262_v32 = vld [vmem:[%s2643_s10 + $0x44] sm:$0x1] }
  0xb6   : > { %v1468_v44 = vpop.permute.xlu0 %1467  ;;  %1393 = vrot.lane.b32.xlu1 %v2448_v41, %s2567_s14  ;;  %v1210_v18 = vrot.slane %v2250_v27, 5  ;;  %v733_v19 = vrot.slane %v731_v9, 4  ;;  %v604_v2 = vsel %vm2649_vm4, %v602_v16, %v603_v62  ;;  %v1036_v37 = vshrl.u32 %v2249_v1, 16 }
  0xb7   : > { %v1689_v48 = vsel %vm1687_vm11, %v1672_v31, %v1468_v44  ;;  %v3265_v23 = vpop.permute.xlu2 %1349  ;;  %1305 = vrot.lane.b32.xlu0 %v1294_v6, %s2571_s18  ;;  %1401 = vrot.lane.b32.xlu2 %v2452_v49, %s2567_s14  ;;  %v742_v61 = vrot.slane %v740_v7, 5  ;;  %v746_v21 = vrot.slane %v744_v52, 4  ;;  %v1039_v30 = vshll.u32 %v2249_v1, 16 }
  0xb8   : > { %v1310_v38 = vpop.permute.xlu1 %1309  ;;  %v1706_v60 = vsel %vm1704_vm12, %v1689_v48, %v1516_v29  ;;  %v736_v29 = vrot.slane %v734_v3, 5  ;;  %v1045_v28 = vshll.u32 %v2250_v27, 16  ;;  %v1449_v35 = vunpack.c.l.b16 %v906_v40 }
  0xb9   : > { %v1723_v17 = vsel %vm1721_vm13, %v1706_v60, %v3234_v26  ;;  %v750_v26 = vshll.u32 %v3260_v14, 16  ;;  %v747_v25 = vor.u32 %v746_v21, %v742_v61  ;;  %v1450_v41 = vunpack.c.l.b16 %v909_v12 }
  0xba   : > { %v737_v34 = vor.u32 %v736_v29, %v733_v19  ;;  %v1321_v46 = vunpack.c.l.b16 %v601_v4  ;;  %v1049_v42 = vshrl.u32 %v2250_v27, 16  ;;  %v1629_v13 = vsel %vm1611_vm7, %v2442_v20, %v1310_v38 }
  0xbb   : > { %v1322_v54 = vunpack.c.l.b16 %v604_v2  ;;  %v2278_v51 = vrot.slane %v2270_v53, 9  ;;  %v1212_v10 = vrot.slane %v1210_v18, 4  ;;  %v1213_v31 = vrot.slane %v2262_v32, 5 }
  0xbc   : > { %v752_v8 = vrot.slane %v750_v26, 5  ;;  %v1038_v43 = vrot.slane %v1036_v37, 4  ;;  %v1041_v44 = vrot.slane %v1039_v30, 5  ;;  %v738_v14 = vrot.slane %v737_v34, 4 }
  0xbd   : > { %v748_v45 = vrot.slane %v747_v25, 4  ;;  %v1047_v47 = vrot.slane %v1045_v28, 5  ;;  %v1051_v48 = vrot.slane %v1049_v42, 4  ;;  %v1648_v49 = vsel %vm1636_vm8, %v1629_v13, %v3265_v23  ;;  %v2469_v28 = vld [vmem:[%s2921_s8 + $0x30] sm:$0xff] }
  0xbe   : > { %v1596_v24 = vpop.permute.xlu0 %1595  ;;  %1521 = vrot.lane.b32.xlu1 %v2456_v33, %s2568_s15  ;;  %v1462_v50 = vpack.c.b16 %v1450_v41, %v1449_v35  ;;  %v1211_v38 = vsel %vm2649_vm4, %v2278_v51, %v1210_v18  ;;  %v1334_v56 = vpack.c.b16 %v1322_v54, %v1321_v46  ;;  %v1214_v22 = vsel %vm2649_vm4, %v1212_v10, %v1213_v31  ;;  %v2443_v31 = vld [vmem:[%s2643_s10 + $0x48] sm:$0xff] }
  0xbf   : > { %v1740_v15 = vsel %vm1738_vm14, %v1723_v17, %v1596_v24  ;;  %v1478_v0 = vpop.permute.xlu2 %1477  ;;  %1609 = vrot.lane.b32.xlu0 %v1594_v63, %s2574_s21  ;;  %1529 = vrot.lane.b32.xlu2 %v2460_v58, %s2568_s15  ;;  %v1042_v6 = vor.u32 %v1041_v44, %v1038_v43  ;;  %v1055_v59 = vshll.u32 %v2262_v32, 16  ;;  %v743_v16 = vsel %vm2678_vm5, %v738_v14, %v742_v61 }
  0xc0   : > { %2387 = vmatmul.msk.bf16.vlgmr.msra.gmra.mxu0 %vm1779_vm15, %v1740_v15  ;;  %v1438_v11 = vpop.permute.xlu1 %1437  ;;  %v753_v23 = vsel %vm2678_vm5, %v748_v45, %v752_v8  ;;  %v1052_v62 = vor.u32 %v1051_v48, %v1047_v47  ;;  %v1577_v27 = vunpack.c.l.b16 %v1211_v38  ;;  %v1578_v5 = vunpack.c.l.b16 %v1214_v22  ;;  %v2438_v15 = vld [vmem:[%s2643_s10 + $0xc] sm:$0xff]  ;;  %2433 = vmatmul.msk.bf16.gmra.mxu3 %vm1611_vm7, %v2469_v28 }
  0xc1   : > { %v1409_v4 = vunpack.c.l.b16 %v743_v16  ;;  %v1410_v9 = vunpack.c.l.b16 %v753_v23  ;;  %v1043_v63 = vrot.slane %v1042_v6, 4  ;;  %v1057_v3 = vrot.slane %v1055_v59, 5 }
  0xc2   : > { %v1053_v33 = vrot.slane %v1052_v62, 4  ;;  %v1590_v1 = vpack.c.b16 %v1578_v5, %v1577_v27 }
  0xc3   : > { %v1422_v12 = vpack.c.b16 %v1410_v9, %v1409_v4  ;;  %v1048_v24 = vsel %vm2678_vm5, %v1043_v63, %v1047_v47 }
  0xc4   : > { %v1058_v2 = vsel %vm2678_vm5, %v1053_v33, %v1057_v3  ;;  %v1537_v61 = vunpack.c.l.b16 %v1048_v24 }
  0xc5   : > { %v1538_v21 = vunpack.c.l.b16 %v1058_v2 }
  0xc6   : > { %v1398_v55 = vpop.permute.xlu0 %1397 }
  0xc7   : > { %v1566_v57 = vpop.permute.xlu2 %1565  ;;  %v1665_v36 = vsel %vm1653_vm9, %v1648_v49, %v1398_v55  ;;  %1473 = vrot.lane.b32.xlu0 %v1462_v50, %s2573_s20  ;;  %1345 = vrot.lane.b32.xlu2 %v1334_v56, %s2569_s16  ;;  %v1550_v53 = vpack.c.b16 %v1538_v21, %v1537_v61  ;;  %v2444_v61 = vld [vmem:[%s2643_s10 + $0x54] sm:$0xff] }
  0xc8   : > { %v1302_v60 = vpop.permute.xlu1 %1301  ;;  %v1682_v40 = vsel %vm1670_vm10, %v1665_v36, %v1438_v11 }
  0xc9   : > { %v1699_v7 = vsel %vm1687_vm11, %v1682_v40, %v1478_v0  ;;  %v1617_v37 = vsel %vm1611_vm7, %v2438_v15, %v1302_v60  ;;  %v2439_v60 = vld [vmem:[%s2643_s10 + $0x18] sm:$0xff] }
  0xce   : > { %v1526_v52 = vpop.permute.xlu0 %1525 }
  0xcf   : > { %v1716_v17 = vsel %vm1704_vm12, %v1699_v7, %v1526_v52  ;;  %v1390_v18 = vpop.permute.xlu2 %1389  ;;  %1601 = vrot.lane.b32.xlu0 %v1590_v1, %s2574_s21  ;;  %1433 = vrot.lane.b32.xlu2 %v1422_v12, %s2570_s17 }
  0xd0   : > { %v1606_v19 = vpop.permute.xlu1 %1605  ;;  %v1733_v20 = vsel %vm1721_vm13, %v1716_v17, %v1566_v57 }
  0xd1   : > { %v1750_v29 = vsel %vm1738_vm14, %v1733_v20, %v1606_v19  ;;  %v2470_v19 = vld [vmem:[%s2921_s8 + $0x38] sm:$0xff] }
  0xd2   : > { %2392 = vmatmul.msk.bf16.gmra.mxu2 %vm1779_vm15, %v1750_v29  ;;  %2434 = vmatmul.msk.bf16.gmra.mxu3 %vm1611_vm7, %v2470_v19 }
  0xd6   : > { %v1342_v58 = vpop.permute.xlu0 %1341 }
  0xd7   : > { %v1518_v0 = vpop.permute.xlu2 %1517  ;;  %1561 = vrot.lane.b32.xlu2 %v1550_v53, %s2572_s19  ;;  %v1640_v39 = vsel %vm1636_vm8, %v1617_v37, %v1342_v58  ;;  %s3404_s19 = scalar_lea.vmem %s3504_s6, %s2191_s22 }
  0xd8   : > { %v1470_v26 = vpop.permute.xlu1 %1469  ;;  %v1657_v11 = vsel %vm1653_vm9, %v1640_v39, %v1390_v18 }
  0xde   : > { %v1430_v30 = vpop.permute.xlu0 %1429 }
  0xdf   : > { %v1312_v32 = vpop.permute.xlu2 %1311  ;;  %v1674_v34 = vsel %vm1670_vm10, %v1657_v11, %v1430_v30  ;;  %v3381_v30 = vld [vmem:[%s3503_s5] ss:$0 sm:$0xff] }
  0xe0   : > { %v1598_v25 = vpop.permute.xlu1 %1597  ;;  %v1691_v35 = vsel %vm1687_vm11, %v1674_v34, %v1470_v26  ;;  %v1632_v44 = vsel %vm1611_vm7, %v2443_v31, %v1312_v32 }
  0xe1   : > { %v1708_v46 = vsel %vm1704_vm12, %v1691_v35, %v1518_v0  ;;  %v3388_v35 = vld [vmem:[%s3501_s3] ss:$0 sm:$0xff] }
  0xe3   : > { %v3332_v41 = vpop.f32.mrf.mxu1 }
  0xe6   : > { %v1558_v42 = vpop.permute.xlu0 %1557 }
  0xe7   : > { %v1725_v13 = vsel %vm1721_vm13, %v1708_v46, %v1558_v42  ;;  %v1440_v10 = vpop.permute.xlu2 %1439 }
  0xe8   : > { %v1742_v54 = vsel %vm1738_vm14, %v1725_v13, %v1598_v25  ;;  %v1400_v51 = vpop.permute.xlu1 %1399  ;;  %v2440_v13 = vld [vmem:[%s2643_s10 + $0x24] sm:$0xff] }
  0xe9   : > { %2388 = vmatmul.msk.bf16.gmra.mxu0 %vm1779_vm15, %v1742_v54 }
  0xeb   : > { %v3339_v8 = vpop.f32.mrf.mxu1 }
  0xee   : > { %v1352_v43 = vpop.permute.xlu0 %1351 }
  0xef   : > { %v1304_v45 = vpop.permute.xlu2 %1303  ;;  %v1650_v47 = vsel %vm1636_vm8, %v1632_v44, %v1352_v43 }
  0xf0   : > { %v1528_v14 = vpop.permute.xlu1 %1527  ;;  %v1667_v50 = vsel %vm1653_vm9, %v1650_v47, %v1400_v51  ;;  %v1620_v23 = vsel %vm1611_vm7, %v2439_v60, %v1304_v45 }
  0xf1   : > { %v1684_v55 = vsel %vm1670_vm10, %v1667_v50, %v1440_v10 }
  0xf3   : > { %v3343_v48 = vpop.f32.mrf.mxu1 }
  0xf6   : > { %v1480_v49 = vpop.permute.xlu0 %1479 }
  0xf7   : > { %v1701_v38 = vsel %vm1687_vm11, %v1684_v55, %v1480_v49  ;;  %v1608_v57 = vpop.permute.xlu2 %1607 }
  0xf8   : > { %v1344_v56 = vpop.permute.xlu1 %1343  ;;  %v1718_v6 = vsel %vm1704_vm12, %v1701_v38, %v1528_v14  ;;  %v1963_v38 = vadd.f32 %v3381_v30, %v3332_v41 }
  0xf9   : > { %v1642_v4 = vsel %vm1636_vm8, %v1620_v23, %v1344_v56 }
  0xfb   : > { %v3348_v22 = vpop.f32.mrf.mxu1 }
  0xfe   : > { %v1568_v59 = vpop.permute.xlu0 %1567 }
  0xff   : > { %v1735_v36 = vsel %vm1721_vm13, %v1718_v6, %v1568_v59  ;;  %v1472_v40 = vpop.permute.xlu2 %1471 }
 0x100   : > { %v1752_v16 = vsel %vm1738_vm14, %v1735_v36, %v1608_v57  ;;  %v1432_v62 = vpop.permute.xlu1 %1431 }
 0x101   : > { %2393 = vmatmul.msk.bf16.gmra.mxu2 %vm1779_vm15, %v1752_v16 }
 0x103   : > { %v3356_v27 = vpop.f32.mrf.mxu1 }
 0x106   : > { %v1392_v5 = vpop.permute.xlu0 %1391 }
 0x107   : > { %v1659_v9 = vsel %vm1653_vm9, %v1642_v4, %v1392_v5 }
 0x108   : > { %v1676_v63 = vsel %vm1670_vm10, %v1659_v9, %v1432_v62  ;;  %v1560_v52 = vpop.permute.xlu1 %1559 }
 0x109   : > { %v1693_v3 = vsel %vm1687_vm11, %v1676_v63, %v1472_v40  ;;  %v1600_v17 = vpop.permute.xlu2 %1599  ;;  %v2002_v40 = vmax.f32 %v1963_v38, 0.0 }
 0x10b   : > { %v3361_v33 = vpop.f32.mrf.mxu1 }
 0x10e   : > { %v1520_v7 = vpop.permute.xlu0 %1519 }
 0x10f   : > { %v1710_v1 = vsel %vm1704_vm12, %v1693_v3, %v1520_v7 }
 0x110   : > { %v1727_v12 = vsel %vm1721_vm13, %v1710_v1, %v1560_v52  ;;  %v1354_v24 = vpop.permute.xlu1 %1353  ;;  %v1965_v52 = vadd.f32 %v3381_v30, %v3339_v8 }
 0x111   : > { %v1744_v18 = vsel %vm1738_vm14, %v1727_v12, %v1600_v17  ;;  %v1402_v29 = vpop.permute.xlu2 %1401 }
 0x112   : > { %2389 = vmatmul.msk.bf16.gmra.mxu0 %vm1779_vm15, %v1744_v18 }
 0x113   : > { %v3369_v20 = vpop.f32.mrf.mxu1 }
 0x116   : > { %v1314_v2 = vpop.permute.xlu0 %1313 }
 0x117   : > { %v1635_v0 = vsel %vm1611_vm7, %v2444_v61, %v1314_v2  ;;  %v2003_v61 = vmax.f32 %v1965_v52, 0.0 }
 0x118   : > { %v1482_v15 = vpop.permute.xlu1 %1481  ;;  %v1652_v26 = vsel %vm1636_vm8, %v1635_v0, %v1354_v24 }
 0x119   : > { %v1530_v53 = vpop.permute.xlu2 %1529  ;;  %v1669_v37 = vsel %vm1653_vm9, %v1652_v26, %v1402_v29 }
 0x11b   : > { %v3373_v21 = vpop.f32.mrf.mxu1 }
 0x11e   : > { %v1442_v58 = vpop.permute.xlu0 %1441 }
 0x11f   : > { %v1686_v11 = vsel %vm1670_vm10, %v1669_v37, %v1442_v58 }
 0x120   : > { %v1570_v32 = vpop.permute.xlu1 %1569  ;;  %v1703_v25 = vsel %vm1687_vm11, %v1686_v11, %v1482_v15 }
 0x121   : > { %v1346_v28 = vpop.permute.xlu2 %1345  ;;  %v1720_v42 = vsel %vm1704_vm12, %v1703_v25, %v1530_v53 }
 0x122   : > { %v1737_v31 = vsel %vm1721_vm13, %v1720_v42, %v1570_v32 }
 0x123   : > { %v1982_v39 = vpop.f32.mrf.mxu1 }
 0x124   : > { %v1983_v46 = vadd.f32 %v3381_v30, %v1982_v39 }
 0x126   : > { %v2010_v10 = vmax.f32 %v1983_v46, 0.0 }
 0x128   : > { %v1394_v49 = vpop.permute.xlu1 %1393 }
 0x129   : > { %v1306_v34 = vpop.permute.xlu0 %1305  ;;  %v1434_v57 = vpop.permute.xlu2 %1433 }
 0x12a   : > { %v1623_v47 = vsel %vm1611_vm7, %v2440_v13, %v1306_v34  ;;  %v1987_v26 = vpop.f32.mrf.mxu3 }
 0x12b   : > { %v1984_v44 = vpop.f32.mrf.mxu1  ;;  %v1644_v56 = vsel %vm1636_vm8, %v1623_v47, %v1346_v28  ;;  %v1988_v37 = vadd.f32 %v3381_v30, %v1987_v26 }
 0x12c   : > { %v1985_v55 = vadd.f32 %v3381_v30, %v1984_v44  ;;  %v1661_v59 = vsel %vm1653_vm9, %v1644_v56, %v1394_v49 }
 0x12d   : > { %v1678_v5 = vsel %vm1670_vm10, %v1661_v59, %v1434_v57  ;;  %v2012_v32 = vmax.f32 %v1988_v37, 0.0 }
 0x12e   : > { %v2011_v16 = vmax.f32 %v1985_v55, 0.0 }
 0x130   : > { %v1522_v63 = vpop.permute.xlu1 %1521 }
 0x131   : > { %v1610_v43 = vpop.permute.xlu0 %1609  ;;  %v1562_v17 = vpop.permute.xlu2 %1561 }
 0x132   : > { %v1754_v14 = vsel %vm1738_vm14, %v1737_v31, %v1610_v43  ;;  %v1989_v34 = vpop.f32.mrf.mxu3  ;;  %v1968_v43 = vadd.f32 %v3381_v30, %v3343_v48 }
 0x133   : > { %v1829_v54 = vpop.f32.mrf.mxu2  ;;  %2394 = vmatmul.msk.bf16.gmra.mxu2 %vm1779_vm15, %v1754_v14  ;;  %v1990_v46 = vadd.f32 %v3381_v30, %v1989_v34 }
 0x134   : > { %v1830_v51 = vadd.f32 %v3388_v35, %v1829_v54 }
 0x136   : > { %v1857_v45 = vmax.f32 %v1830_v51, 0.0  ;;  %v2013_v51 = vmax.f32 %v1990_v46, 0.0 }
 0x138   : > { %v2026_v50 = vadd.f32 %v2010_v10, %v1857_v45  ;;  %v2004_v45 = vmax.f32 %v1968_v43, 0.0 }
 0x139   : > { %v1474_v23 = vpop.permute.xlu0 %1473 }
 0x13a   : > { %v2042_v6 = vpack.c.bf16 %v2026_v50, %v2026_v50  ;;  %v1695_v9 = vsel %vm1687_vm11, %v1678_v5, %v1474_v23  ;;  %v1970_v50 = vadd.f32 %v3381_v30, %v3348_v22 }
 0x13b   : > { %v1831_v36 = vpop.f32.mrf.mxu2  ;;  %v1712_v1 = vsel %vm1704_vm12, %v1695_v9, %v1522_v63  ;;  %v1973_v63 = vadd.f32 %v3381_v30, %v3356_v27 }
 0x13c   : > { %2059 = vst.msk [vmem:[%s3404_s19 + $0x20] sm:$0xf] %vm2050_vm0, %v2042_v6  ;;  %v1832_v60 = vadd.f32 %v3388_v35, %v1831_v36  ;;  %v1729_v24 = vsel %vm1721_vm13, %v1712_v1, %v1562_v17  ;;  %v2005_v57 = vmax.f32 %v1970_v50, 0.0 }
 0x13d   : > { %v1809_v62 = vpop.f32.mrf.mxu0 }
 0x13e   : > { %v1858_v4 = vmax.f32 %v1832_v60, 0.0  ;;  %v1810_v41 = vadd.f32 %v3388_v35, %v1809_v62 }
 0x140   : > { %v2027_v3 = vadd.f32 %v2011_v16, %v1858_v4  ;;  %v1849_v7 = vmax.f32 %v1810_v41, 0.0 }
 0x141   : > { %v1602_v2 = vpop.permute.xlu0 %1601 }
 0x142   : > { %v2043_v12 = vpack.c.bf16 %v2027_v3, %v2027_v3  ;;  %v2018_v18 = vadd.f32 %v2002_v40, %v1849_v7  ;;  %v1746_v15 = vsel %vm1738_vm14, %v1729_v24, %v1602_v2 }
 0x143   : > { %2390 = vmatmul.msk.bf16.gmra.mxu0 %vm1779_vm15, %v1746_v15  ;;  %v1992_v60 = vpop.f32.mrf.mxu3 }
 0x144   : > { %2060 = vst.msk [vmem:[%s3404_s19 + $0x24] sm:$0xf] %vm2050_vm0, %v2043_v12  ;;  %v2034_v19 = vpack.c.bf16 %v2018_v18, %v2018_v18  ;;  %v1993_v16 = vadd.f32 %v3381_v30, %v1992_v60  ;;  %v2006_v12 = vmax.f32 %v1973_v63, 0.0 }
 0x145   : > { %v1811_v29 = vpop.f32.mrf.mxu0 }
 0x146   : > { %2051 = vst.msk [vmem:[%s3404_s19] sm:$0xf] %vm2050_vm0, %v2034_v19  ;;  %v1812_v8 = vadd.f32 %v3388_v35, %v1811_v29  ;;  %v2014_v62 = vmax.f32 %v1993_v16, 0.0  ;;  %v1975_v29 = vadd.f32 %v3381_v30, %v3361_v33 }
 0x148   : > { %v1850_v58 = vmax.f32 %v1812_v8, 0.0  ;;  %v2007_v8 = vmax.f32 %v1975_v29, 0.0 }
 0x14a   : > { %v2019_v0 = vadd.f32 %v2003_v61, %v1850_v58 }
 0x14b   : > { %v1994_v40 = vpop.f32.mrf.mxu3 }
 0x14c   : > { %v2035_v53 = vpack.c.bf16 %v2019_v0, %v2019_v0  ;;  %v1995_v41 = vadd.f32 %v3381_v30, %v1994_v40 }
 0x14e   : > { %2052 = vst.msk [vmem:[%s3404_s19 + $0x4] sm:$0xf] %vm2050_vm0, %v2035_v53  ;;  %v2015_v52 = vmax.f32 %v1995_v41, 0.0 }
 0x155   : > { %v1834_v39 = vpop.f32.mrf.mxu2  ;;  %v1997_v37 = vpop.f32.mrf.mxu3 }
 0x156   : > { %v1835_v11 = vadd.f32 %v3388_v35, %v1834_v39  ;;  %v1998_v39 = vadd.f32 %v3381_v30, %v1997_v37 }
 0x158   : > { %v1859_v25 = vmax.f32 %v1835_v11, 0.0 }
 0x15a   : > { %v2028_v28 = vadd.f32 %v2012_v32, %v1859_v25  ;;  %v2016_v32 = vmax.f32 %v1998_v39, 0.0 }
 0x15c   : > { %v2044_v42 = vpack.c.bf16 %v2028_v28, %v2028_v28 }
 0x15d   : > { %v1836_v13 = vpop.f32.mrf.mxu2  ;;  %v1999_v34 = vpop.f32.mrf.mxu3 }
 0x15e   : > { %2061 = vst.msk [vmem:[%s3404_s19 + $0x28] sm:$0xf] %vm2050_vm0, %v2044_v42  ;;  %v1837_v54 = vadd.f32 %v3388_v35, %v1836_v13  ;;  %v2000_v46 = vadd.f32 %v3381_v30, %v1999_v34 }
 0x160   : > { %v1860_v10 = vmax.f32 %v1837_v54, 0.0  ;;  %v1978_v54 = vadd.f32 %v3381_v30, %v3369_v20 }
 0x162   : > { %v2029_v31 = vadd.f32 %v2013_v51, %v1860_v10  ;;  %v2017_v10 = vmax.f32 %v2000_v46, 0.0 }
 0x164   : > { %v2045_v44 = vpack.c.bf16 %v2029_v31, %v2029_v31 }
 0x166   : > { %2062 = vst.msk [vmem:[%s3404_s19 + $0x2c] sm:$0xf] %vm2050_vm0, %v2045_v44  ;;  %v1814_v14 = vpop.f32.mrf.mxu0 }
 0x167   : > { %v1815_v47 = vadd.f32 %v3388_v35, %v1814_v14  ;;  %v2008_v14 = vmax.f32 %v1978_v54, 0.0 }
 0x169   : > { %v1851_v49 = vmax.f32 %v1815_v47, 0.0 }
 0x16b   : > { %v2020_v55 = vadd.f32 %v2004_v45, %v1851_v49 }
 0x16d   : > { %v2036_v38 = vpack.c.bf16 %v2020_v55, %v2020_v55  ;;  %v1980_v55 = vadd.f32 %v3381_v30, %v3373_v21 }
 0x16e   : > { %v1816_v56 = vpop.f32.mrf.mxu0 }
 0x16f   : > { %2053 = vst.msk [vmem:[%s3404_s19 + $0x8] sm:$0xf] %vm2050_vm0, %v2036_v38  ;;  %v1817_v48 = vadd.f32 %v3388_v35, %v1816_v56 }
 0x171   : > { %v1852_v6 = vmax.f32 %v1817_v48, 0.0 }
 0x173   : > { %v2021_v59 = vadd.f32 %v2005_v57, %v1852_v6  ;;  %v2009_v57 = vmax.f32 %v1980_v55, 0.0 }
 0x175   : > { %v2037_v36 = vpack.c.bf16 %v2021_v59, %v2021_v59 }
 0x177   : > { %2054 = vst.msk [vmem:[%s3404_s19 + $0xc] sm:$0xf] %vm2050_vm0, %v2037_v36 }
 0x184   : > { %v1839_v23 = vpop.f32.mrf.mxu2 }
 0x185   : > { %v1840_v22 = vadd.f32 %v3388_v35, %v1839_v23 }
 0x187   : > { %v1861_v5 = vmax.f32 %v1840_v22, 0.0 }
 0x189   : > { %v2030_v4 = vadd.f32 %v2014_v62, %v1861_v5 }
 0x18b   : > { %v2046_v9 = vpack.c.bf16 %v2030_v4, %v2030_v4 }
 0x18c   : > { %v1841_v3 = vpop.f32.mrf.mxu2 }
 0x18d   : > { %2063 = vst.msk [vmem:[%s3404_s19 + $0x30] sm:$0xf] %vm2050_vm0, %v2046_v9  ;;  %v1842_v7 = vadd.f32 %v3388_v35, %v1841_v3 }
 0x18f   : > { %v1862_v1 = vmax.f32 %v1842_v7, 0.0  ;;  %v1819_v17 = vpop.f32.mrf.mxu0 }
 0x190   : > { %v1820_v18 = vadd.f32 %v3388_v35, %v1819_v17 }
 0x191   : > { %v2031_v19 = vadd.f32 %v2015_v52, %v1862_v1 }
 0x192   : > { %v1853_v24 = vmax.f32 %v1820_v18, 0.0 }
 0x193   : > { %v2047_v2 = vpack.c.bf16 %v2031_v19, %v2031_v19 }
 0x194   : > { %v2022_v27 = vadd.f32 %v2006_v12, %v1853_v24 }
 0x195   : > { %2064 = vst.msk [vmem:[%s3404_s19 + $0x34] sm:$0xf] %vm2050_vm0, %v2047_v2 }
 0x196   : > { %v2038_v61 = vpack.c.bf16 %v2022_v27, %v2022_v27 }
 0x197   : > { %v1821_v15 = vpop.f32.mrf.mxu0 }
 0x198   : > { %2055 = vst.msk [vmem:[%s3404_s19 + $0x10] sm:$0xf] %vm2050_vm0, %v2038_v61  ;;  %v1822_v58 = vadd.f32 %v3388_v35, %v1821_v15 }
 0x19a   : > { %v1854_v0 = vmax.f32 %v1822_v58, 0.0 }
 0x19c   : > { %v2023_v53 = vadd.f32 %v2007_v8, %v1854_v0 }
 0x19e   : > { %v2039_v26 = vpack.c.bf16 %v2023_v53, %v2023_v53 }
 0x1a0   : > { %2056 = vst.msk [vmem:[%s3404_s19 + $0x14] sm:$0xf] %vm2050_vm0, %v2039_v26 }
 0x1b6   : > { %v1844_v33 = vpop.f32.mrf.mxu2 }
 0x1b7   : > { %v1845_v11 = vadd.f32 %v3388_v35, %v1844_v33 }
 0x1b9   : > { %v1863_v25 = vmax.f32 %v1845_v11, 0.0 }
 0x1bb   : > { %v2032_v28 = vadd.f32 %v2016_v32, %v1863_v25 }
 0x1bd   : > { %v2048_v42 = vpack.c.bf16 %v2032_v28, %v2032_v28 }
 0x1be   : > { %v1846_v13 = vpop.f32.mrf.mxu2 }
 0x1bf   : > { %2065 = vst.msk [vmem:[%s3404_s19 + $0x38] sm:$0xf] %vm2050_vm0, %v2048_v42  ;;  %v1847_v51 = vadd.f32 %v3388_v35, %v1846_v13 }
 0x1c0   : > { %v1824_v31 = vpop.f32.mrf.mxu0 }
 0x1c1   : > { %v1864_v43 = vmax.f32 %v1847_v51, 0.0  ;;  %v1825_v44 = vadd.f32 %v3388_v35, %v1824_v31 }
 0x1c3   : > { %v2033_v45 = vadd.f32 %v2017_v10, %v1864_v43  ;;  %v1855_v47 = vmax.f32 %v1825_v44, 0.0 }
 0x1c5   : > { %v2049_v49 = vpack.c.bf16 %v2033_v45, %v2033_v45  ;;  %v2024_v50 = vadd.f32 %v2008_v14, %v1855_v47 }
 0x1c7   : > { %2066 = vst.msk [vmem:[%s3404_s19 + $0x3c] sm:$0xf] %vm2050_vm0, %v2049_v49  ;;  %v2040_v20 = vpack.c.bf16 %v2024_v50, %v2024_v50 }
 0x1c8   : > { %v1826_v38 = vpop.f32.mrf.mxu0 }
 0x1c9   : > { %2057 = vst.msk [vmem:[%s3404_s19 + $0x18] sm:$0xf] %vm2050_vm0, %v2040_v20  ;;  %v1827_v56 = vadd.f32 %v3388_v35, %v1826_v38 }
 0x1cb   : > { %v1856_v48 = vmax.f32 %v1827_v56, 0.0 }
 0x1cd   : > { %v2025_v6 = vadd.f32 %v2009_v57, %v1856_v48 }
 0x1cf   : > { %v2041_v59 = vpack.c.bf16 %v2025_v6, %v2025_v6 }
 0x1d1   : > { %2058 = vst.msk [vmem:[%s3404_s19 + $0x1c] sm:$0xf] %vm2050_vm0, %v2041_v59 }
 0x1d2 PF: > { %s16_s25 = sadd.s32 1, %s2565_s25   ;;  %s3509_s21 = smov %s2557_s23 }
 0x1d3   : > { %p13_p7 = scmp.ge.s32.totalorder %s16_s25, 6   ;;  %s3510_s22 = smov %s2561_s24 }
 0x1d4   : > { %s3511_s23 = smov %s3514_s26  ;;  %s3512_s24 = smov %s3518_s27 }
 0x1d5   :  { %15 = sbr.rel (!%p13_p7) target bundleno = 3 (0x3), region = 79 }

// kernel: _lambda_.3
= control target key start
LH: loop header
LB: loop body
LE: loop exit
PB: predicated region body
PF: predicated region fallthrough
CT: control target
= control target key end

     0   :  { %s4271_s12 = smov 0   ;;  %s6052_s0 = inlined_call_operand.vmem [shape: bf16[2,16,16,8], index: 0, kind: input, shape index: {}]   ;;  %s6053_s1 = inlined_call_operand.vmem [shape: bf16[72,8], index: 1, kind: input, shape index: {}]   ;;  %s6054_s2 = inlined_call_operand.vmem [shape: f32[1,8], index: 2, kind: input, shape index: {}]   ;;  %s6055_s3 = inlined_call_operand.vmem [shape: f32[2,256,8], index: 3, kind: output, shape index: {}]  }
   0x1 LB: > { %s3851_s13 = sadd.s32 4294967295, %s4240_s12   ;;  %p3855_p0 = scmp.ge.s32.totalorder %s4240_s12, 1  ;;  %s4240_s12 = sphi %s4271_s12, %s13_s12  }
   0x2   : > { %p137_p1 = scmp.lt.s32.totalorder %s4240_s12, 3 }
   0x4   : > { %p138_p2 = pnand %p3855_p0, %p137_p1 }
   0x5   : > { %p161_p3 = scmp.lt.s32.totalorder (!%p138_p2), %s3851_s13, 1  ;;  %s4243_s18 = smov (!%p138_p2), 8  }
   0x6   : > { %141 = sbr.rel (%p138_p2) target bundleno = 724 (0x2d4), region = 32  ;;  %s4244_s19 = smov (!%p138_p2), 16  }
   0x7   : > { %s4245_s20 = smov (!%p138_p2), 24   ;;  %s4246_s21 = smov (!%p138_p2), 32  }
   0x8   : > { %s4247_s22 = smov (!%p138_p2), 40   ;;  %s4248_s23 = smov (!%p138_p2), 56  }
   0x9   : > { %s4249_s24 = smov (!%p138_p2), 48   ;;  %s4250_s25 = smov (!%p138_p2), 64  }
   0xb   : > { %vm172_vm0 = vcmask 60416   ;;  %vm175_vm1 = vcmask 57344   ;;  %vm183_vm2 = vsmask.f32 256  ;;  %v4242_v0 = vmov 0   ;;  %s6069_s13 = smov (!%p161_p3, %s3851_s13), 1 }
   0xc   : > { %173 = vst.msk [vmem:[#allocation2] sm:$0xf] %vm172_vm0, %v4242_v0  ;;  %vm4282_vm3 = vmand %vm175_vm1, %vm183_vm2  ;;  %vm233_vm4 = vsmask.f32 7938  ;;  %vm799_vm6 = vsmask.f32 3328 }
   0xd   : > { %174 = vst.msk [vmem:[#allocation2 + $0x4] sm:$0xf] %vm172_vm0, %v4242_v0  ;;  %vm4289_vm5 = vmand %vm175_vm1, %vm233_vm4  ;;  %v194_v3 = vld [vmem:[#allocation2 + $0x30] sm:$0x1]  ;;  %v244_v4 = vld [vmem:[#allocation2 + $0x38] sm:$0x1] }
   0xe   : > { %176 = vst.msk [vmem:[#allocation2 + $0x8] sm:$0x1] %vm175_vm1, %v4242_v0  ;;  %vm800_vm7 = vsmask.f32 7440  ;;  %v195_v5 = vsel %vm4282_vm3, 0, %v194_v3  ;;  %v245_v6 = vsel %vm4289_vm5, 0, %v244_v4  ;;  %vm4317_vm9 = vmand %vm172_vm0, %vm233_vm4 }
   0xf   : > { %178 = vst.msk [vmem:[#allocation2 + $0xcc] sm:$0xf] %vm172_vm0, %v4242_v0  ;;  %v188_v7 = vld [vmem:[#allocation2 + $0x18] sm:$0x1]  ;;  %s4134_s14 = sshll.u32 %s6069_s13, 7  ;;  %vm4323_vm10 = vmor %vm799_vm6, %vm800_vm7  ;;  %vm1250_vm12 = vcmask 1042432  }
  0x10   : > { %179 = vst.msk [vmem:[#allocation2 + $0xd0] sm:$0xf] %vm172_vm0, %v4242_v0  ;;  %v238_v8 = vld [vmem:[#allocation2 + $0x20] sm:$0x1]  ;;  %s4307_s17 = scalar_lea.vmem %s6052_s0, %s4134_s14  ;;  %vm315_vm8 = vsmask.f32 4368 }
  0x11   : > { %180 = vst.msk [vmem:[#allocation2 + $0xd4] sm:$0x1] %vm175_vm1, %v4242_v0  ;;  %v189_v9 = vsel %vm4282_vm3, 0, %v188_v7  ;;  %v239_v10 = vsel %vm4289_vm5, 0, %v238_v8  ;;  %v289_v12 = vld [vmem:[%s4307_s17 + $0x18] sm:$0xf]  ;;  %vm4331_vm11 = vmor %vm183_vm2, %vm315_vm8 }
  0x12   : > { %196 = vst [vmem:[#allocation2 + $0x30] sm:$0x1] %v195_v5  ;;  %v290_v16 = vld [vmem:[%s4307_s17 + $0x1c] sm:$0xf]  ;;  %v369_v20 = vshrl.u32 %v289_v12, 16  ;;  %v372_v21 = vshll.u32 %v289_v12, 16 }
  0x13   : > { %v751_v11 = vld [vmem:[#allocation2] sm:$0xf]  ;;  %246 = vst [vmem:[#allocation2 + $0x38] sm:$0x1] %v245_v6  ;;  %v377_v25 = vshrl.u32 %v290_v16, 16  ;;  %v380_v30 = vshll.u32 %v290_v16, 16 }
  0x14   : > { %v752_v13 = vld [vmem:[#allocation2 + $0x4] sm:$0xf]  ;;  %v803_v14 = vshrl.u32 %v751_v11, 16  ;;  %v806_v15 = vshll.u32 %v751_v11, 16  ;;  %190 = vst [vmem:[#allocation2 + $0x18] sm:$0x1] %v189_v9 }
  0x15   : > { %v783_v17 = vld [vmem:[#allocation2 + $0x8] sm:$0x1]  ;;  %v812_v18 = vshll.u32 %v752_v13, 16  ;;  %v816_v19 = vshrl.u32 %v752_v13, 16  ;;  %v371_v29 = vrot.slane %v369_v20, 7  ;;  %v379_v34 = vrot.slane %v377_v25, 7 }
  0x16   : > { %v805_v22 = vrot.slane %v803_v14, 4  ;;  %v808_v23 = vrot.slane %v806_v15, 5  ;;  %v822_v24 = vshll.u32 %v783_v17, 16  ;;  %240 = vst [vmem:[#allocation2 + $0x20] sm:$0x1] %v239_v10  ;;  %vm1251_vm13 = vcmask 1046532  }
  0x17   : > { %v814_v27 = vrot.slane %v812_v18, 5  ;;  %v818_v28 = vrot.slane %v816_v19, 4  ;;  %v285_v35 = vld [vmem:[%s4307_s17 + $0x8] sm:$0xf]  ;;  %v286_v36 = vld [vmem:[%s4307_s17 + $0xc] sm:$0xf]  ;;  %v374_v39 = vor.u32 %v372_v21, %v371_v29  ;;  %v382_v45 = vor.u32 %v380_v30, %v379_v34  ;;  %vm4653_vm14 = vmor %vm1250_vm12, %vm1251_vm13 }
  0x18   : > { %v809_v32 = vor.u32 %v808_v23, %v805_v22  ;;  %v824_v33 = vrot.slane %v822_v24, 5  ;;  %v375_v40 = vrot.slane %v371_v29, 4  ;;  %v335_v42 = vshrl.u32 %v285_v35, 16  ;;  %v185_v43 = vld [vmem:[#allocation2 + $0xc] sm:$0x1]  ;;  %v4187_v2 = vld [vmem:[%s6053_s1 + $0x18] sm:$0xff] }
  0x19   : > { %v819_v37 = vor.u32 %v818_v28, %v814_v27  ;;  %v660_v41 = vld [vmem:[#allocation2 + $0x30] sm:$0xf]  ;;  %v384_v46 = vrot.slane %v379_v34, 4  ;;  %v338_v48 = vshll.u32 %v285_v35, 16  ;;  %v235_v49 = vld [vmem:[#allocation2 + $0x14] sm:$0x1] }
  0x1a   : > { %v810_v44 = vrot.slane %v809_v32, 4  ;;  %v664_v47 = vld [vmem:[#allocation2 + $0x38] sm:$0x1]  ;;  %v661_v51 = vsel %vm4317_vm9, %v374_v39, %v660_v41  ;;  %v337_v52 = vrot.slane %v335_v42, 7  ;;  %v343_v53 = vshrl.u32 %v286_v36, 16  ;;  %v4185_v1 = vld [vmem:[%s6053_s1 + $0x8] sm:$0xff] }
  0x1b   : > { %v820_v50 = vrot.slane %v819_v37, 4  ;;  %v283_v54 = vld [vmem:[%s4307_s17] sm:$0xf]  ;;  %v383_v56 = vsel %vm4331_vm11, %v375_v40, %v382_v45  ;;  %662 = vst [vmem:[#allocation2 + $0x30] sm:$0xf] %v661_v51  ;;  %v665_v57 = vsel %vm4282_vm3, %v384_v46, %v664_v47  ;;  %v346_v58 = vshll.u32 %v286_v36, 16 }
  0x1c   : > { %v815_v55 = vsel %vm4323_vm10, %v810_v44, %v814_v27  ;;  %v284_v59 = vld [vmem:[%s4307_s17 + $0x4] sm:$0xf]  ;;  %663 = vst.msk [vmem:[#allocation2 + $0x34] sm:$0xf] %vm172_vm0, %v383_v56  ;;  %v340_v62 = vor.u32 %v338_v48, %v337_v52  ;;  %v341_v63 = vrot.slane %v337_v52, 4  ;;  %v345_v4 = vrot.slane %v343_v53, 7 }
  0x1d   : > { %v825_v60 = vsel %vm4323_vm10, %v820_v50, %v824_v33  ;;  %v2646_v61 = vunpack.c.l.b16 %v815_v55  ;;  %v646_v0 = vld [vmem:[#allocation2 + $0x18] sm:$0xf]  ;;  %666 = vst [vmem:[#allocation2 + $0x38] sm:$0x1] %v665_v57  ;;  %v650_v5 = vld [vmem:[#allocation2 + $0x20] sm:$0x1] }
  0x1e   : > { %v2647_v3 = vunpack.c.l.b16 %v825_v60  ;;  %v186_v6 = vsel %vm4282_vm3, 0, %v185_v43  ;;  %v647_v7 = vsel %vm4317_vm9, %v340_v62, %v646_v0  ;;  %v236_v8 = vsel %vm4289_vm5, 0, %v235_v49  ;;  %v197_v15 = vld [vmem:[#allocation2 + $0x3c] sm:$0x1]  ;;  %v247_v22 = vld [vmem:[#allocation2 + $0x44] sm:$0x1] }
  0x1f   : > { %187 = vst [vmem:[#allocation2 + $0xc] sm:$0x1] %v186_v6  ;;  %v318_v9 = vshrl.u32 %v283_v54, 16  ;;  %v321_v10 = vshll.u32 %v283_v54, 16  ;;  %v348_v12 = vor.u32 %v346_v58, %v345_v4  ;;  %v350_v13 = vrot.slane %v345_v4, 4  ;;  %s4135_s9 = sshll.u32 %s6069_s13, 8 }
  0x20   : > { %v2678_v11 = vpack.c.b16 %v2647_v3, %v2646_v61  ;;  %648 = vst [vmem:[#allocation2 + $0x18] sm:$0xf] %v647_v7  ;;  %v326_v14 = vshrl.u32 %v284_v59, 16  ;;  %v329_v17 = vshll.u32 %v284_v59, 16  ;;  %v198_v18 = vsel %vm4282_vm3, 0, %v197_v15  ;;  %s5924_s13 = scalar_lea.vmem %s6055_s3, %s4135_s9 }
  0x21   : > { %237 = vst [vmem:[#allocation2 + $0x14] sm:$0x1] %v236_v8  ;;  %v320_v16 = vrot.slane %v318_v9, 7  ;;  %v349_v19 = vsel %vm4331_vm11, %v341_v63, %v348_v12  ;;  %v651_v20 = vsel %vm4282_vm3, %v350_v13, %v650_v5  ;;  %v248_v36 = vsel %vm4289_vm5, 0, %v247_v22  ;;  %v291_v53 = vld [vmem:[%s4307_s17 + $0x20] sm:$0xf] }
  0x22   : > { %2694 = vrot.lane.b32.xlu0 %v2678_v11, %s4243_s18  ;;  %v328_v21 = vrot.slane %v326_v14, 7  ;;  %199 = vst [vmem:[#allocation2 + $0x3c] sm:$0x1] %v198_v18  ;;  %v759_v23 = vld [vmem:[#allocation2 + $0x30] sm:$0xf]  ;;  %v386_v63 = vshrl.u32 %v291_v53, 16 }
  0x23   : > { %649 = vst.msk [vmem:[#allocation2 + $0x1c] sm:$0xf] %vm172_vm0, %v349_v19  ;;  %v323_v24 = vor.u32 %v321_v10, %v320_v16  ;;  %v324_v25 = vrot.slane %v320_v16, 4  ;;  %v760_v27 = vld [vmem:[#allocation2 + $0x34] sm:$0xf]  ;;  %v899_v28 = vshrl.u32 %v759_v23, 16 }
  0x24   : > { %v902_v29 = vshll.u32 %v759_v23, 16  ;;  %652 = vst [vmem:[#allocation2 + $0x20] sm:$0x1] %v651_v20  ;;  %v331_v30 = vor.u32 %v329_v17, %v328_v21  ;;  %v787_v32 = vld [vmem:[#allocation2 + $0x38] sm:$0x1]  ;;  %v908_v33 = vshll.u32 %v760_v27, 16 }
  0x25   : > { %v912_v34 = vshrl.u32 %v760_v27, 16  ;;  %v333_v35 = vrot.slane %v328_v21, 4  ;;  %v901_v37 = vrot.slane %v899_v28, 4  ;;  %v918_v40 = vshll.u32 %v787_v32, 16  ;;  %249 = vst [vmem:[#allocation2 + $0x44] sm:$0x1] %v248_v36 }
  0x26   : > { %v904_v39 = vrot.slane %v902_v29, 5  ;;  %v332_v41 = vsel %vm4331_vm11, %v324_v25, %v331_v30  ;;  %v639_v42 = vld [vmem:[#allocation2 + $0xc] sm:$0xf]  ;;  %v910_v43 = vrot.slane %v908_v33, 5  ;;  %v292_v5 = vld [vmem:[%s4307_s17 + $0x24] sm:$0xf] }
  0x27   : > { %v914_v44 = vrot.slane %v912_v34, 4  ;;  %v755_v45 = vld [vmem:[#allocation2 + $0x18] sm:$0xf]  ;;  %v640_v46 = vsel %vm4317_vm9, %v323_v24, %v639_v42  ;;  %642 = vst.msk [vmem:[#allocation2 + $0x10] sm:$0xf] %vm172_vm0, %v332_v41  ;;  %v920_v48 = vrot.slane %v918_v40, 5 }
  0x28   : > { %v905_v47 = vor.u32 %v904_v39, %v901_v37  ;;  %v851_v49 = vshrl.u32 %v755_v45, 16  ;;  %v854_v50 = vshll.u32 %v755_v45, 16  ;;  %641 = vst [vmem:[#allocation2 + $0xc] sm:$0xf] %v640_v46  ;;  %v643_v52 = vld [vmem:[#allocation2 + $0x14] sm:$0x1] }
  0x29   : > { %v915_v51 = vor.u32 %v914_v44, %v910_v43  ;;  %v644_v58 = vsel %vm4282_vm3, %v333_v35, %v643_v52  ;;  %v389_v6 = vshll.u32 %v291_v53, 16  ;;  %v388_v15 = vrot.slane %v386_v63, 7  ;;  %v667_v25 = vld [vmem:[#allocation2 + $0x3c] sm:$0xf]  ;;  %v191_v32 = vld [vmem:[#allocation2 + $0x24] sm:$0x1] }
  0x2a   : > { %v906_v54 = vrot.slane %v905_v47, 4  ;;  %v756_v55 = vld [vmem:[#allocation2 + $0x1c] sm:$0xf]  ;;  %v853_v56 = vrot.slane %v851_v49, 4  ;;  %v856_v57 = vrot.slane %v854_v50, 5  ;;  %v394_v20 = vshrl.u32 %v292_v5, 16 }
  0x2b   : > { %v916_v59 = vrot.slane %v915_v51, 4  ;;  %v785_v60 = vld [vmem:[#allocation2 + $0x20] sm:$0x1]  ;;  %v860_v61 = vshll.u32 %v756_v55, 16  ;;  %v864_v62 = vshrl.u32 %v756_v55, 16  ;;  %v391_v35 = vor.u32 %v389_v6, %v388_v15 }
  0x2c   : > { %v911_v0 = vsel %vm4323_vm10, %v906_v54, %v910_v43  ;;  %v857_v3 = vor.u32 %v856_v57, %v853_v56  ;;  %v870_v4 = vshll.u32 %v785_v60, 16  ;;  %645 = vst [vmem:[#allocation2 + $0x14] sm:$0x1] %v644_v58  ;;  %v392_v36 = vrot.slane %v388_v15, 4  ;;  %v671_v37 = vld [vmem:[#allocation2 + $0x44] sm:$0x1] }
  0x2d   : > { %v921_v7 = vsel %vm4323_vm10, %v916_v59, %v920_v48  ;;  %v2654_v8 = vunpack.c.l.b16 %v911_v0  ;;  %v862_v9 = vrot.slane %v860_v61, 5  ;;  %v866_v10 = vrot.slane %v864_v62, 4  ;;  %v241_v39 = vld [vmem:[#allocation2 + $0x2c] sm:$0x1]  ;;  %v287_v45 = vld [vmem:[%s4307_s17 + $0x10] sm:$0xf] }
  0x2e   : > { %v2655_v11 = vunpack.c.l.b16 %v921_v7  ;;  %v858_v12 = vrot.slane %v857_v3, 4  ;;  %v872_v13 = vrot.slane %v870_v4, 5  ;;  %v754_v14 = vld [vmem:[#allocation2 + $0x10] sm:$0xf]  ;;  %v396_v43 = vrot.slane %v394_v20, 7 }
  0x2f   : > { %v867_v16 = vor.u32 %v866_v10, %v862_v9  ;;  %v753_v17 = vld [vmem:[#allocation2 + $0xc] sm:$0xf]  ;;  %v836_v18 = vshll.u32 %v754_v14, 16  ;;  %v840_v19 = vshrl.u32 %v754_v14, 16  ;;  %v397_v44 = vshll.u32 %v292_v5, 16 }
  0x30   : > { %v2682_v21 = vpack.c.b16 %v2655_v11, %v2654_v8  ;;  %v863_v22 = vsel %vm4323_vm10, %v858_v12, %v862_v9  ;;  %v827_v23 = vshrl.u32 %v753_v17, 16  ;;  %v830_v24 = vshll.u32 %v753_v17, 16  ;;  %v288_v50 = vld [vmem:[%s4307_s17 + $0x14] sm:$0xf]  ;;  %v200_v51 = vld [vmem:[#allocation2 + $0x48] sm:$0x1] }
  0x31   : > { %v868_v27 = vrot.slane %v867_v16, 4  ;;  %v2650_v28 = vunpack.c.l.b16 %v863_v22  ;;  %v838_v29 = vrot.slane %v836_v18, 5  ;;  %v842_v30 = vrot.slane %v840_v19, 4  ;;  %v250_v56 = vld [vmem:[#allocation2 + $0x50] sm:$0x1] }
  0x32   : > { %2702 = vrot.lane.b32.xlu2 %v2682_v21, %s4243_s18  ;;  %v829_v33 = vrot.slane %v827_v23, 4  ;;  %v832_v34 = vrot.slane %v830_v24, 5  ;;  %v668_v49 = vsel %vm4317_vm9, %v391_v35, %v667_v25  ;;  %v399_v53 = vor.u32 %v397_v44, %v396_v43  ;;  %v293_v3 = vld [vmem:[%s4307_s17 + $0x28] sm:$0xf]  ;;  %v294_v8 = vld [vmem:[%s4307_s17 + $0x2c] sm:$0xf] }
  0x33   : > { %v873_v40 = vsel %vm4323_vm10, %v868_v27, %v872_v13  ;;  %v784_v41 = vld [vmem:[#allocation2 + $0x14] sm:$0x1]  ;;  %v843_v42 = vor.u32 %v842_v30, %v838_v29  ;;  %v401_v54 = vrot.slane %v396_v43, 4  ;;  %669 = vst [vmem:[#allocation2 + $0x3c] sm:$0xf] %v668_v49  ;;  %v192_v55 = vsel %vm4282_vm3, 0, %v191_v32 }
  0x34   : > { %v2651_v46 = vunpack.c.l.b16 %v873_v40  ;;  %v833_v47 = vor.u32 %v832_v34, %v829_v33  ;;  %v846_v48 = vshll.u32 %v784_v41, 16  ;;  %193 = vst [vmem:[#allocation2 + $0x24] sm:$0x1] %v192_v55  ;;  %v242_v60 = vsel %vm4289_vm5, 0, %v241_v39  ;;  %v206_v13 = vld [vmem:[#allocation2 + $0x60] sm:$0x1] }
  0x35   : > { %v844_v52 = vrot.slane %v843_v42, 4  ;;  %v400_v61 = vsel %vm4331_vm11, %v392_v36, %v399_v53  ;;  %v672_v62 = vsel %vm4282_vm3, %v401_v54, %v671_v37  ;;  %243 = vst [vmem:[#allocation2 + $0x2c] sm:$0x1] %v242_v60  ;;  %v352_v63 = vshrl.u32 %v287_v45, 16  ;;  %v256_v40 = vld [vmem:[#allocation2 + $0x68] sm:$0x1] }
  0x36   : > { %v2680_v57 = vpack.c.b16 %v2651_v46, %v2650_v28  ;;  %v834_v58 = vrot.slane %v833_v47, 4  ;;  %v848_v59 = vrot.slane %v846_v48, 5  ;;  %v355_v0 = vshll.u32 %v287_v45, 16  ;;  %670 = vst.msk [vmem:[#allocation2 + $0x40] sm:$0xf] %vm172_vm0, %v400_v61 }
  0x37   : > { %v360_v6 = vshrl.u32 %v288_v50, 16  ;;  %v363_v7 = vshll.u32 %v288_v50, 16  ;;  %673 = vst [vmem:[#allocation2 + $0x44] sm:$0x1] %v672_v62  ;;  %v354_v11 = vrot.slane %v352_v63, 7  ;;  %v201_v12 = vsel %vm4282_vm3, 0, %v200_v51 }
  0x38   : > { %2698 = vrot.lane.b32.xlu1 %v2680_v57, %s4243_s18  ;;  %v839_v4 = vsel %vm4323_vm10, %v834_v58, %v838_v29  ;;  %v849_v5 = vsel %vm4323_vm10, %v844_v52, %v848_v59  ;;  %202 = vst [vmem:[#allocation2 + $0x48] sm:$0x1] %v201_v12  ;;  %v251_v15 = vsel %vm4289_vm5, 0, %v250_v56  ;;  %v403_v16 = vshrl.u32 %v293_v3, 16  ;;  %v297_v46 = vld [vmem:[%s4307_s17 + $0x38] sm:$0xf] }
  0x39   : > { %v2648_v9 = vunpack.c.l.b16 %v839_v4  ;;  %v2649_v10 = vunpack.c.l.b16 %v849_v5  ;;  %v362_v14 = vrot.slane %v360_v6, 7  ;;  %v406_v17 = vshll.u32 %v293_v3, 16  ;;  %252 = vst [vmem:[#allocation2 + $0x50] sm:$0x1] %v251_v15  ;;  %v203_v12 = vld [vmem:[#allocation2 + $0x54] sm:$0x1] }
  0x3a   : > { %v357_v19 = vor.u32 %v355_v0, %v354_v11  ;;  %v358_v20 = vrot.slane %v354_v11, 4  ;;  %v411_v21 = vshrl.u32 %v294_v8, 16  ;;  %v761_v22 = vld [vmem:[#allocation2 + $0x3c] sm:$0xf]  ;;  %v405_v25 = vrot.slane %v403_v16, 7 }
  0x3b   : > { %v2679_v18 = vpack.c.b16 %v2649_v10, %v2648_v9  ;;  %v365_v23 = vor.u32 %v363_v7, %v362_v14  ;;  %v367_v24 = vrot.slane %v362_v14, 4  ;;  %v414_v27 = vshll.u32 %v294_v8, 16  ;;  %v653_v30 = vld [vmem:[#allocation2 + $0x24] sm:$0xf]  ;;  %v298_v0 = vld [vmem:[%s4307_s17 + $0x3c] sm:$0xf] }
  0x3c   : > { %v923_v28 = vshrl.u32 %v761_v22, 16  ;;  %v926_v29 = vshll.u32 %v761_v22, 16  ;;  %v413_v32 = vrot.slane %v411_v21, 7  ;;  %v207_v33 = vsel %vm4282_vm3, 0, %v206_v13  ;;  %v657_v36 = vld [vmem:[#allocation2 + $0x2c] sm:$0x1] }
  0x3d   : > { %2696 = vrot.lane.b32.xlu0 %v2679_v18, %s4243_s18  ;;  %v366_v34 = vsel %vm4331_vm11, %v358_v20, %v365_v23  ;;  %v654_v35 = vsel %vm4317_vm9, %v357_v19, %v653_v30  ;;  %v408_v37 = vor.u32 %v406_v17, %v405_v25  ;;  %v409_v39 = vrot.slane %v405_v25, 4  ;;  %208 = vst [vmem:[#allocation2 + $0x60] sm:$0x1] %v207_v33  ;;  %v762_v41 = vld [vmem:[#allocation2 + $0x40] sm:$0xf] }
  0x3e   : > { %v925_v42 = vrot.slane %v923_v28, 4  ;;  %v928_v43 = vrot.slane %v926_v29, 5  ;;  %655 = vst [vmem:[#allocation2 + $0x24] sm:$0xf] %v654_v35  ;;  %v658_v44 = vsel %vm4282_vm3, %v367_v24, %v657_v36  ;;  %v416_v45 = vor.u32 %v414_v27, %v413_v32  ;;  %v788_v47 = vld [vmem:[#allocation2 + $0x44] sm:$0x1] }
  0x3f   : > { %v932_v48 = vshll.u32 %v762_v41, 16  ;;  %v936_v49 = vshrl.u32 %v762_v41, 16  ;;  %656 = vst.msk [vmem:[#allocation2 + $0x28] sm:$0xf] %vm172_vm0, %v366_v34  ;;  %v942_v51 = vshll.u32 %v788_v47, 16  ;;  %v418_v53 = vrot.slane %v413_v32, 4 }
  0x40   : > { %v929_v50 = vor.u32 %v928_v43, %v925_v42  ;;  %659 = vst [vmem:[#allocation2 + $0x2c] sm:$0x1] %v658_v44  ;;  %v417_v52 = vsel %vm4331_vm11, %v409_v39, %v416_v45  ;;  %v674_v54 = vld [vmem:[#allocation2 + $0x48] sm:$0xf]  ;;  %v678_v58 = vld [vmem:[#allocation2 + $0x50] sm:$0x1] }
  0x41   : > { %v934_v55 = vrot.slane %v932_v48, 5  ;;  %v938_v56 = vrot.slane %v936_v49, 4  ;;  %v675_v57 = vsel %vm4317_vm9, %v408_v37, %v674_v54  ;;  %677 = vst.msk [vmem:[#allocation2 + $0x4c] sm:$0xf] %vm172_vm0, %v417_v52  ;;  %v944_v60 = vrot.slane %v942_v51, 5 }
  0x42   : > { %v930_v59 = vrot.slane %v929_v50, 4  ;;  %676 = vst [vmem:[#allocation2 + $0x48] sm:$0xf] %v675_v57  ;;  %v679_v61 = vsel %vm4282_vm3, %v418_v53, %v678_v58  ;;  %v257_v62 = vsel %vm4289_vm5, 0, %v256_v40  ;;  %v437_v3 = vshrl.u32 %v297_v46, 16 }
  0x43   : > { %v939_v63 = vor.u32 %v938_v56, %v934_v55  ;;  %680 = vst [vmem:[#allocation2 + $0x50] sm:$0x1] %v679_v61  ;;  %v440_v4 = vshll.u32 %v297_v46, 16  ;;  %v445_v6 = vshrl.u32 %v298_v0, 16  ;;  %v448_v7 = vshll.u32 %v298_v0, 16 }
  0x44   : > { %v935_v5 = vsel %vm4323_vm10, %v930_v59, %v934_v55  ;;  %258 = vst [vmem:[#allocation2 + $0x68] sm:$0x1] %v257_v62  ;;  %v439_v11 = vrot.slane %v437_v3, 7  ;;  %v204_v17 = vsel %vm4282_vm3, 0, %v203_v12  ;;  %v688_v45 = vld [vmem:[#allocation2 + $0x60] sm:$0xf] }
  0x45   : > { %v940_v8 = vrot.slane %v939_v63, 4  ;;  %v2656_v9 = vunpack.c.l.b16 %v935_v5  ;;  %v757_v10 = vld [vmem:[#allocation2 + $0x24] sm:$0xf]  ;;  %v447_v16 = vrot.slane %v445_v6, 7  ;;  %205 = vst [vmem:[#allocation2 + $0x54] sm:$0x1] %v204_v17 }
  0x46   : > { %v4429_v13 = vld [vmem:[#allocation2 + $0x28] sm:$0xf]  ;;  %v875_v14 = vshrl.u32 %v757_v10, 16  ;;  %v878_v15 = vshll.u32 %v757_v10, 16  ;;  %v442_v22 = vor.u32 %v440_v4, %v439_v11  ;;  %v443_v49 = vrot.slane %v439_v11, 4 }
  0x47   : > { %v945_v18 = vsel %vm4323_vm10, %v940_v8, %v944_v60  ;;  %v4435_v19 = vld [vmem:[#allocation2 + $0x2c] sm:$0x1]  ;;  %v884_v20 = vshll.u32 %v4429_v13, 16  ;;  %v888_v21 = vshrl.u32 %v4429_v13, 16  ;;  %v450_v53 = vor.u32 %v448_v7, %v447_v16  ;;  %v253_v55 = vld [vmem:[#allocation2 + $0x5c] sm:$0x1] }
  0x48   : > { %v2657_v23 = vunpack.c.l.b16 %v945_v18  ;;  %v877_v24 = vrot.slane %v875_v14, 4  ;;  %v880_v25 = vrot.slane %v878_v15, 5  ;;  %v894_v27 = vshll.u32 %v4435_v19, 16  ;;  %v764_v28 = vld [vmem:[#allocation2 + $0x4c] sm:$0xf] }
  0x49   : > { %v886_v29 = vrot.slane %v884_v20, 5  ;;  %v890_v30 = vrot.slane %v888_v21, 4  ;;  %v763_v32 = vld [vmem:[#allocation2 + $0x48] sm:$0xf]  ;;  %v956_v33 = vshll.u32 %v764_v28, 16  ;;  %v960_v34 = vshrl.u32 %v764_v28, 16 }
  0x4a   : > { %v2683_v35 = vpack.c.b16 %v2657_v23, %v2656_v9  ;;  %v881_v36 = vor.u32 %v880_v25, %v877_v24  ;;  %v896_v37 = vrot.slane %v894_v27, 5  ;;  %v789_v39 = vld [vmem:[#allocation2 + $0x50] sm:$0x1]  ;;  %v947_v40 = vshrl.u32 %v763_v32, 16  ;;  %v296_v61 = vld [vmem:[%s4307_s17 + $0x34] sm:$0xf] }
  0x4b   : > { %v891_v41 = vor.u32 %v890_v30, %v886_v29  ;;  %v950_v42 = vshll.u32 %v763_v32, 16  ;;  %v958_v43 = vrot.slane %v956_v33, 5  ;;  %v962_v44 = vrot.slane %v960_v34, 4  ;;  %v692_v54 = vld [vmem:[#allocation2 + $0x68] sm:$0x1] }
  0x4c   : > { %2704 = vrot.lane.b32.xlu2 %v2683_v35, %s4243_s18  ;;  %v882_v46 = vrot.slane %v881_v36, 4  ;;  %v949_v47 = vrot.slane %v947_v40, 4  ;;  %v966_v48 = vshll.u32 %v789_v39, 16  ;;  %v452_v58 = vrot.slane %v447_v16, 4  ;;  %v295_v60 = vld [vmem:[%s4307_s17 + $0x30] sm:$0xf] }
  0x4d   : > { %v892_v50 = vrot.slane %v891_v41, 4  ;;  %v952_v51 = vrot.slane %v950_v42, 5  ;;  %v963_v52 = vor.u32 %v962_v44, %v958_v43  ;;  %v689_v59 = vsel %vm4317_vm9, %v442_v22, %v688_v45  ;;  %v209_v4 = vld [vmem:[#allocation2 + $0x6c] sm:$0x1]  ;;  %v259_v9 = vld [vmem:[#allocation2 + $0x74] sm:$0x1] }
  0x4e   : > { %v887_v56 = vsel %vm4323_vm10, %v882_v46, %v886_v29  ;;  %v968_v57 = vrot.slane %v966_v48, 5  ;;  %690 = vst [vmem:[#allocation2 + $0x60] sm:$0xf] %v689_v59  ;;  %v451_v6 = vsel %vm4331_vm11, %v443_v49, %v450_v53  ;;  %v693_v7 = vsel %vm4282_vm3, %v452_v58, %v692_v54  ;;  %v299_v10 = vld [vmem:[%s4307_s17 + $0x40] sm:$0xf] }
  0x4f   : > { %v897_v62 = vsel %vm4323_vm10, %v892_v50, %v896_v37  ;;  %v2652_v63 = vunpack.c.l.b16 %v887_v56  ;;  %v953_v0 = vor.u32 %v952_v51, %v949_v47  ;;  %v964_v3 = vrot.slane %v963_v52, 4  ;;  %691 = vst.msk [vmem:[#allocation2 + $0x64] sm:$0xf] %vm172_vm0, %v451_v6  ;;  %v681_v21 = vld [vmem:[#allocation2 + $0x54] sm:$0xf] }
  0x50   : > { %v2653_v5 = vunpack.c.l.b16 %v897_v62  ;;  %v254_v8 = vsel %vm4289_vm5, 0, %v253_v55  ;;  %v420_v14 = vshrl.u32 %v295_v60, 16  ;;  %v423_v15 = vshll.u32 %v295_v60, 16  ;;  %694 = vst [vmem:[#allocation2 + $0x68] sm:$0x1] %v693_v7 }
  0x51   : > { %v954_v11 = vrot.slane %v953_v0, 4  ;;  %v969_v12 = vsel %vm4323_vm10, %v964_v3, %v968_v57  ;;  %v428_v18 = vshrl.u32 %v296_v61, 16  ;;  %v431_v20 = vshll.u32 %v296_v61, 16  ;;  %v300_v22 = vld [vmem:[%s4307_s17 + $0x44] sm:$0xf] }
  0x52   : > { %v2681_v16 = vpack.c.b16 %v2653_v5, %v2652_v63  ;;  %v2659_v17 = vunpack.c.l.b16 %v969_v12  ;;  %255 = vst [vmem:[#allocation2 + $0x5c] sm:$0x1] %v254_v8  ;;  %v422_v24 = vrot.slane %v420_v14, 7  ;;  %v210_v25 = vsel %vm4282_vm3, 0, %v209_v4  ;;  %v215_v28 = vld [vmem:[#allocation2 + $0x84] sm:$0x1] }
  0x53   : > { %v959_v23 = vsel %vm4323_vm10, %v954_v11, %v958_v43  ;;  %v260_v27 = vsel %vm4289_vm5, 0, %v259_v9  ;;  %v430_v30 = vrot.slane %v428_v18, 7  ;;  %211 = vst [vmem:[#allocation2 + $0x6c] sm:$0x1] %v210_v25  ;;  %v454_v32 = vshrl.u32 %v299_v10, 16 }
  0x54   : > { %2700 = vrot.lane.b32.xlu1 %v2681_v16, %s4243_s18  ;;  %v2658_v29 = vunpack.c.l.b16 %v959_v23  ;;  %v457_v33 = vshll.u32 %v299_v10, 16  ;;  %v425_v34 = vor.u32 %v423_v15, %v422_v24  ;;  %v426_v35 = vrot.slane %v422_v24, 4  ;;  %261 = vst [vmem:[#allocation2 + $0x74] sm:$0x1] %v260_v27  ;;  %v265_v48 = vld [vmem:[#allocation2 + $0x8c] sm:$0x1] }
  0x55   : > { %v462_v36 = vshrl.u32 %v300_v22, 16  ;;  %v465_v37 = vshll.u32 %v300_v22, 16  ;;  %v767_v40 = vld [vmem:[#allocation2 + $0x60] sm:$0xf]  ;;  %v433_v41 = vor.u32 %v431_v20, %v430_v30  ;;  %v435_v42 = vrot.slane %v430_v30, 4 }
  0x56   : > { %v2684_v39 = vpack.c.b16 %v2659_v17, %v2658_v29  ;;  %v456_v43 = vrot.slane %v454_v32, 7  ;;  %v995_v44 = vshrl.u32 %v767_v40, 16  ;;  %v998_v45 = vshll.u32 %v767_v40, 16  ;;  %v4470_v49 = vld [vmem:[#allocation2 + $0x64] sm:$0xf] }
  0x57   : > { %v682_v46 = vsel %vm4317_vm9, %v425_v34, %v681_v21  ;;  %v464_v47 = vrot.slane %v462_v36, 7  ;;  %v434_v50 = vsel %vm4331_vm11, %v426_v35, %v433_v41  ;;  %v216_v53 = vsel %vm4282_vm3, 0, %v215_v28  ;;  %v303_v54 = vld [vmem:[%s4307_s17 + $0x50] sm:$0xf]  ;;  %v4477_v55 = vld [vmem:[#allocation2 + $0x68] sm:$0x1] }
  0x58   : > { %2706 = vrot.lane.b32.xlu0 %v2684_v39, %s4243_s18  ;;  %683 = vst [vmem:[#allocation2 + $0x54] sm:$0xf] %v682_v46  ;;  %v459_v51 = vor.u32 %v457_v33, %v456_v43  ;;  %v460_v52 = vrot.slane %v456_v43, 4  ;;  %v997_v56 = vrot.slane %v995_v44, 4  ;;  %v1000_v57 = vrot.slane %v998_v45, 5  ;;  %v4144_v26 = vld [vmem:[#allocation2 + $0x60] sm:$0xff] }
  0x59   : > { %v1004_v58 = vshll.u32 %v4470_v49, 16  ;;  %v1008_v59 = vshrl.u32 %v4470_v49, 16  ;;  %v304_v60 = vld [vmem:[%s4307_s17 + $0x54] sm:$0xf]  ;;  %v1014_v61 = vshll.u32 %v4477_v55, 16  ;;  %v467_v63 = vor.u32 %v465_v37, %v464_v47 }
  0x5a   : > { %684 = vst.msk [vmem:[#allocation2 + $0x58] sm:$0xf] %vm172_vm0, %v434_v50  ;;  %v685_v62 = vld [vmem:[#allocation2 + $0x5c] sm:$0x1]  ;;  %v469_v0 = vrot.slane %v464_v47, 4  ;;  %v1001_v3 = vor.u32 %v1000_v57, %v997_v56  ;;  %v266_v12 = vsel %vm4289_vm5, 0, %v265_v48 }
  0x5b   : > { %v1006_v4 = vrot.slane %v1004_v58, 5  ;;  %v1010_v5 = vrot.slane %v1008_v59, 4  ;;  %v686_v6 = vsel %vm4282_vm3, %v435_v42, %v685_v62  ;;  %v695_v7 = vld [vmem:[#allocation2 + $0x6c] sm:$0xf]  ;;  %217 = vst [vmem:[#allocation2 + $0x84] sm:$0x1] %v216_v53  ;;  %v468_v9 = vsel %vm4331_vm11, %v460_v52, %v467_v63 }
  0x5c   : > { %v1016_v8 = vrot.slane %v1014_v61, 5  ;;  %687 = vst [vmem:[#allocation2 + $0x5c] sm:$0x1] %v686_v6  ;;  %v696_v10 = vsel %vm4317_vm9, %v459_v51, %v695_v7  ;;  %v699_v11 = vld [vmem:[#allocation2 + $0x74] sm:$0x1]  ;;  %v1002_v14 = vrot.slane %v1001_v3, 4 }
  0x5d   : > { %v1011_v15 = vor.u32 %v1010_v5, %v1006_v4  ;;  %697 = vst [vmem:[#allocation2 + $0x6c] sm:$0xf] %v696_v10  ;;  %v700_v16 = vsel %vm4282_vm3, %v469_v0, %v699_v11  ;;  %v488_v17 = vshrl.u32 %v303_v54, 16  ;;  %v212_v18 = vld [vmem:[#allocation2 + $0x78] sm:$0x1]  ;;  %v491_v20 = vshll.u32 %v303_v54, 16 }
  0x5e   : > { %698 = vst.msk [vmem:[#allocation2 + $0x70] sm:$0xf] %vm172_vm0, %v468_v9  ;;  %v496_v21 = vshrl.u32 %v304_v60, 16  ;;  %v499_v22 = vshll.u32 %v304_v60, 16  ;;  %v213_v23 = vsel %vm4282_vm3, 0, %v212_v18  ;;  %v1007_v24 = vsel %vm4323_vm10, %v1002_v14, %v1006_v4 }
  0x5f   : > { %v1012_v25 = vrot.slane %v1011_v15, 4  ;;  %v765_v27 = vld [vmem:[#allocation2 + $0x54] sm:$0xf]  ;;  %701 = vst [vmem:[#allocation2 + $0x74] sm:$0x1] %v700_v16  ;;  %v490_v28 = vrot.slane %v488_v17, 7  ;;  %v2662_v29 = vunpack.c.l.b16 %v1007_v24 }
  0x60   : > { %v971_v30 = vshrl.u32 %v765_v27, 16  ;;  %v974_v32 = vshll.u32 %v765_v27, 16  ;;  %267 = vst [vmem:[#allocation2 + $0x8c] sm:$0x1] %v266_v12  ;;  %v498_v33 = vrot.slane %v496_v21, 7  ;;  %vm3318_vm15 = vcmask 64512  }
  0x61   : > { %v1017_v34 = vsel %vm4323_vm10, %v1012_v25, %v1016_v8  ;;  %v4501_v35 = vld [vmem:[#allocation2 + $0x58] sm:$0xf]  ;;  %v493_v36 = vor.u32 %v491_v20, %v490_v28  ;;  %v494_v37 = vrot.slane %v490_v28, 4  ;;  %214 = vst [vmem:[#allocation2 + $0x78] sm:$0x1] %v213_v23  ;;  %vm3400_vm1 = vcmask 195584  }
  0x62   : > { %v2663_v39 = vunpack.c.l.b16 %v1017_v34  ;;  %v973_v40 = vrot.slane %v971_v30, 4  ;;  %v976_v41 = vrot.slane %v974_v32, 5  ;;  %v980_v42 = vshll.u32 %v4501_v35, 16  ;;  %v709_v43 = vld [vmem:[#allocation2 + $0x84] sm:$0xf] }
  0x63   : > { %v4504_v44 = vld [vmem:[#allocation2 + $0x5c] sm:$0x1]  ;;  %v984_v45 = vshrl.u32 %v4501_v35, 16  ;;  %v501_v46 = vor.u32 %v499_v22, %v498_v33  ;;  %v503_v47 = vrot.slane %v498_v33, 4  ;;  %v710_v48 = vsel %vm4317_vm9, %v493_v36, %v709_v43  ;;  %v262_v50 = vld [vmem:[#allocation2 + $0x80] sm:$0x1] }
  0x64   : > { %v2686_v51 = vpack.c.b16 %v2663_v39, %v2662_v29  ;;  %v977_v52 = vor.u32 %v976_v41, %v973_v40  ;;  %v982_v53 = vrot.slane %v980_v42, 5  ;;  %v990_v54 = vshll.u32 %v4504_v44, 16  ;;  %v769_v56 = vld [vmem:[#allocation2 + $0x6c] sm:$0xf]  ;;  %711 = vst [vmem:[#allocation2 + $0x84] sm:$0xf] %v710_v48 }
  0x65   : > { %v986_v57 = vrot.slane %v984_v45, 4  ;;  %v4510_v58 = vld [vmem:[#allocation2 + $0x70] sm:$0xf]  ;;  %v1019_v59 = vshrl.u32 %v769_v56, 16  ;;  %v1022_v60 = vshll.u32 %v769_v56, 16  ;;  %v502_v61 = vsel %vm4331_vm11, %v494_v37, %v501_v46 }
  0x66   : > { %2710 = vrot.lane.b32.xlu2 %v2686_v51, %s4243_s18  ;;  %v978_v62 = vrot.slane %v977_v52, 4  ;;  %v992_v63 = vrot.slane %v990_v54, 5  ;;  %v4515_v0 = vld [vmem:[#allocation2 + $0x74] sm:$0x1]  ;;  %v1028_v3 = vshll.u32 %v4510_v58, 16  ;;  %v1032_v4 = vshrl.u32 %v4510_v58, 16 }
  0x67   : > { %v987_v5 = vor.u32 %v986_v57, %v982_v53  ;;  %v1021_v6 = vrot.slane %v1019_v59, 4  ;;  %v1024_v7 = vrot.slane %v1022_v60, 5  ;;  %v1038_v8 = vshll.u32 %v4515_v0, 16  ;;  %712 = vst.msk [vmem:[#allocation2 + $0x88] sm:$0xf] %vm172_vm0, %v502_v61 }
  0x68   : > { %v983_v9 = vsel %vm4323_vm10, %v978_v62, %v982_v53  ;;  %v1030_v10 = vrot.slane %v1028_v3, 5  ;;  %v1034_v11 = vrot.slane %v1032_v4, 4  ;;  %v713_v12 = vld [vmem:[#allocation2 + $0x8c] sm:$0x1]  ;;  %v263_v14 = vsel %vm4289_vm5, 0, %v262_v50 }
  0x69   : > { %v988_v15 = vrot.slane %v987_v5, 4  ;;  %v2660_v16 = vunpack.c.l.b16 %v983_v9  ;;  %v1025_v17 = vor.u32 %v1024_v7, %v1021_v6  ;;  %v1040_v18 = vrot.slane %v1038_v8, 5  ;;  %264 = vst [vmem:[#allocation2 + $0x80] sm:$0x1] %v263_v14  ;;  %v301_v20 = vld [vmem:[%s4307_s17 + $0x48] sm:$0xf] }
  0x6a   : > { %v1035_v21 = vor.u32 %v1034_v11, %v1030_v10  ;;  %v714_v22 = vsel %vm4282_vm3, %v503_v47, %v713_v12  ;;  %v302_v23 = vld [vmem:[%s4307_s17 + $0x4c] sm:$0xf]  ;;  %v471_v24 = vshrl.u32 %v301_v20, 16  ;;  %v474_v25 = vshll.u32 %v301_v20, 16  ;;  %v702_v42 = vld [vmem:[#allocation2 + $0x78] sm:$0xf] }
  0x6b   : > { %v993_v27 = vsel %vm4323_vm10, %v988_v15, %v992_v63  ;;  %v1026_v28 = vrot.slane %v1025_v17, 4  ;;  %715 = vst [vmem:[#allocation2 + $0x8c] sm:$0x1] %v714_v22  ;;  %v773_v29 = vld [vmem:[#allocation2 + $0x84] sm:$0xf]  ;;  %v479_v30 = vshrl.u32 %v302_v23, 16 }
  0x6c   : > { %v2661_v32 = vunpack.c.l.b16 %v993_v27  ;;  %v1036_v33 = vrot.slane %v1035_v21, 4  ;;  %v1067_v34 = vshrl.u32 %v773_v29, 16  ;;  %v1070_v36 = vshll.u32 %v773_v29, 16  ;;  %v218_v43 = vld [vmem:[#allocation2 + $0x90] sm:$0x1] }
  0x6d   : > { %v1031_v37 = vsel %vm4323_vm10, %v1026_v28, %v1030_v10  ;;  %v473_v39 = vrot.slane %v471_v24, 7  ;;  %v481_v40 = vrot.slane %v479_v30, 7  ;;  %v482_v41 = vshll.u32 %v302_v23, 16  ;;  %v268_v51 = vld [vmem:[#allocation2 + $0x98] sm:$0x1] }
  0x6e   : > { %v2685_v45 = vpack.c.b16 %v2661_v32, %v2660_v16  ;;  %v1041_v46 = vsel %vm4323_vm10, %v1036_v33, %v1040_v18  ;;  %v2664_v47 = vunpack.c.l.b16 %v1031_v37  ;;  %v4535_v48 = vld [vmem:[#allocation2 + $0x88] sm:$0xf]  ;;  %v1069_v50 = vrot.slane %v1067_v34, 4  ;;  %v305_v57 = vld [vmem:[%s4307_s17 + $0x58] sm:$0xf] }
  0x6f   : > { %v2665_v52 = vunpack.c.l.b16 %v1041_v46  ;;  %v1072_v53 = vrot.slane %v1070_v36, 5  ;;  %v1076_v54 = vshll.u32 %v4535_v48, 16  ;;  %v1080_v56 = vshrl.u32 %v4535_v48, 16  ;;  %v306_v3 = vld [vmem:[%s4307_s17 + $0x5c] sm:$0xf] }
  0x70   : > { %2708 = vrot.lane.b32.xlu1 %v2685_v45, %s4243_s18  ;;  %v476_v59 = vor.u32 %v474_v25, %v473_v39  ;;  %v477_v60 = vrot.slane %v473_v39, 4  ;;  %v484_v61 = vor.u32 %v482_v41, %v481_v40  ;;  %v486_v62 = vrot.slane %v481_v40, 4  ;;  %v706_v63 = vld [vmem:[#allocation2 + $0x80] sm:$0x1]  ;;  %v224_v8 = vld [vmem:[#allocation2 + $0xa8] sm:$0x1] }
  0x71   : > { %v2687_v4 = vpack.c.b16 %v2665_v52, %v2664_v47  ;;  %v1073_v5 = vor.u32 %v1072_v53, %v1069_v50  ;;  %v1078_v6 = vrot.slane %v1076_v54, 5  ;;  %v1082_v7 = vrot.slane %v1080_v56, 4  ;;  %v274_v9 = vld [vmem:[#allocation2 + $0xb0] sm:$0x1]  ;;  %v309_v16 = vld [vmem:[%s4307_s17 + $0x68] sm:$0xf] }
  0x72   : > { %v4542_v10 = vld [vmem:[#allocation2 + $0x8c] sm:$0x1]  ;;  %v485_v11 = vsel %vm4331_vm11, %v477_v60, %v484_v61  ;;  %v703_v12 = vsel %vm4317_vm9, %v476_v59, %v702_v42  ;;  %v707_v14 = vsel %vm4282_vm3, %v486_v62, %v706_v63  ;;  %v219_v15 = vsel %vm4282_vm3, 0, %v218_v43  ;;  %v221_v47 = vld [vmem:[#allocation2 + $0x9c] sm:$0x1] }
  0x73   : > { %v310_v17 = vld [vmem:[%s4307_s17 + $0x6c] sm:$0xf]  ;;  %2712 = vrot.lane.b32.xlu0 %v2687_v4, %s4243_s18  ;;  %v1074_v18 = vrot.slane %v1073_v5, 4  ;;  %v1083_v20 = vor.u32 %v1082_v7, %v1078_v6  ;;  %v1086_v21 = vshll.u32 %v4542_v10, 16  ;;  %704 = vst [vmem:[#allocation2 + $0x78] sm:$0xf] %v703_v12 }
  0x74   : > { %v269_v22 = vsel %vm4289_vm5, 0, %v268_v51  ;;  %705 = vst.msk [vmem:[#allocation2 + $0x7c] sm:$0xf] %vm172_vm0, %v485_v11  ;;  %v505_v23 = vshrl.u32 %v305_v57, 16  ;;  %v508_v24 = vshll.u32 %v305_v57, 16  ;;  %v513_v25 = vshrl.u32 %v306_v3, 16 }
  0x75   : > { %v516_v27 = vshll.u32 %v306_v3, 16  ;;  %v1079_v28 = vsel %vm4323_vm10, %v1074_v18, %v1078_v6  ;;  %v1084_v29 = vrot.slane %v1083_v20, 4  ;;  %v1088_v30 = vrot.slane %v1086_v21, 5  ;;  %708 = vst [vmem:[#allocation2 + $0x80] sm:$0x1] %v707_v14 }
  0x76   : > { %v225_v32 = vsel %vm4282_vm3, 0, %v224_v8  ;;  %v2668_v33 = vunpack.c.l.b16 %v1079_v28  ;;  %220 = vst [vmem:[#allocation2 + $0x90] sm:$0x1] %v219_v15  ;;  %v507_v34 = vrot.slane %v505_v23, 7  ;;  %v515_v36 = vrot.slane %v513_v25, 7 }
  0x77   : > { %v275_v37 = vsel %vm4289_vm5, 0, %v274_v9  ;;  %v1089_v39 = vsel %vm4323_vm10, %v1084_v29, %v1088_v30  ;;  %270 = vst [vmem:[#allocation2 + $0x98] sm:$0x1] %v269_v22  ;;  %v539_v40 = vshrl.u32 %v309_v16, 16  ;;  %v542_v41 = vshll.u32 %v309_v16, 16 }
  0x78   : > { %v547_v42 = vshrl.u32 %v310_v17, 16  ;;  %v2669_v43 = vunpack.c.l.b16 %v1089_v39  ;;  %v511_v45 = vrot.slane %v507_v34, 4  ;;  %v518_v46 = vor.u32 %v516_v27, %v515_v36  ;;  %226 = vst [vmem:[#allocation2 + $0xa8] sm:$0x1] %v225_v32  ;;  %v271_v61 = vld [vmem:[#allocation2 + $0xa4] sm:$0x1] }
  0x79   : > { %v510_v50 = vor.u32 %v508_v24, %v507_v34  ;;  %276 = vst [vmem:[#allocation2 + $0xb0] sm:$0x1] %v275_v37  ;;  %v541_v51 = vrot.slane %v539_v40, 7  ;;  %v550_v53 = vshll.u32 %v310_v17, 16  ;;  %v520_v59 = vrot.slane %v515_v36, 4 }
  0x7a   : > { %v549_v52 = vrot.slane %v547_v42, 7  ;;  %v2689_v54 = vpack.c.b16 %v2669_v43, %v2668_v33  ;;  %v771_v56 = vld [vmem:[#allocation2 + $0x78] sm:$0xf]  ;;  %v519_v57 = vsel %vm4331_vm11, %v511_v45, %v518_v46  ;;  %v222_v60 = vsel %vm4282_vm3, 0, %v221_v47  ;;  %v307_v33 = vld [vmem:[%s4307_s17 + $0x60] sm:$0xf] }
  0x7b   : > { %v4571_v62 = vld [vmem:[#allocation2 + $0x7c] sm:$0xf]  ;;  %v1043_v63 = vshrl.u32 %v771_v56, 16  ;;  %v1046_v3 = vshll.u32 %v771_v56, 16  ;;  %719 = vst.msk [vmem:[#allocation2 + $0x94] sm:$0xf] %vm172_vm0, %v519_v57  ;;  %v544_v4 = vor.u32 %v542_v41, %v541_v51 }
  0x7c   : > { %v552_v5 = vor.u32 %v550_v53, %v549_v52  ;;  %2716 = vrot.lane.b32.xlu2 %v2689_v54, %s4243_s18  ;;  %v4575_v6 = vld [vmem:[#allocation2 + $0x80] sm:$0x1]  ;;  %v1052_v7 = vshll.u32 %v4571_v62, 16  ;;  %v1056_v8 = vshrl.u32 %v4571_v62, 16  ;;  %v545_v9 = vrot.slane %v541_v51, 4 }
  0x7d   : > { %v554_v11 = vrot.slane %v549_v52, 4  ;;  %v1045_v12 = vrot.slane %v1043_v63, 4  ;;  %v1048_v14 = vrot.slane %v1046_v3, 5  ;;  %v1062_v15 = vshll.u32 %v4575_v6, 16  ;;  %v716_v16 = vld [vmem:[#allocation2 + $0x90] sm:$0xf] }
  0x7e   : > { %v272_v17 = vsel %vm4289_vm5, 0, %v271_v61  ;;  %v1054_v18 = vrot.slane %v1052_v7, 5  ;;  %v1058_v20 = vrot.slane %v1056_v8, 4  ;;  %v717_v21 = vsel %vm4317_vm9, %v510_v50, %v716_v16  ;;  %v720_v22 = vld [vmem:[#allocation2 + $0x98] sm:$0x1] }
  0x7f   : > { %223 = vst [vmem:[#allocation2 + $0x9c] sm:$0x1] %v222_v60  ;;  %v1049_v23 = vor.u32 %v1048_v14, %v1045_v12  ;;  %v1064_v24 = vrot.slane %v1062_v15, 5  ;;  %v721_v25 = vsel %vm4282_vm3, %v520_v59, %v720_v22  ;;  %v553_v27 = vsel %vm4331_vm11, %v545_v9, %v552_v5  ;;  %v730_v28 = vld [vmem:[#allocation2 + $0xa8] sm:$0xf] }
  0x80   : > { %718 = vst [vmem:[#allocation2 + $0x90] sm:$0xf] %v717_v21  ;;  %v1059_v29 = vor.u32 %v1058_v20, %v1054_v18  ;;  %v731_v30 = vsel %vm4317_vm9, %v544_v4, %v730_v28  ;;  %v734_v32 = vld [vmem:[#allocation2 + $0xb0] sm:$0x1]  ;;  %v308_v37 = vld [vmem:[%s4307_s17 + $0x64] sm:$0xf] }
  0x81   : > { %722 = vst [vmem:[#allocation2 + $0x98] sm:$0x1] %v721_v25  ;;  %v1050_v34 = vrot.slane %v1049_v23, 4  ;;  %v735_v36 = vsel %vm4282_vm3, %v554_v11, %v734_v32  ;;  %v522_v39 = vshrl.u32 %v307_v33, 16  ;;  %v525_v42 = vshll.u32 %v307_v33, 16 }
  0x82   : > { %732 = vst [vmem:[#allocation2 + $0xa8] sm:$0xf] %v731_v30  ;;  %v1060_v40 = vrot.slane %v1059_v29, 4  ;;  %v4594_v41 = vld [vmem:[#allocation2 + $0x94] sm:$0xf]  ;;  %v530_v52 = vshrl.u32 %v308_v37, 16 }
  0x83   : > { %733 = vst.msk [vmem:[#allocation2 + $0xac] sm:$0xf] %vm172_vm0, %v553_v27  ;;  %v1055_v43 = vsel %vm4323_vm10, %v1050_v34, %v1054_v18  ;;  %v1100_v45 = vshll.u32 %v4594_v41, 16  ;;  %v1104_v46 = vshrl.u32 %v4594_v41, 16  ;;  %v524_v47 = vrot.slane %v522_v39, 7 }
  0x84   : > { %736 = vst [vmem:[#allocation2 + $0xb0] sm:$0x1] %v735_v36  ;;  %v1065_v50 = vsel %vm4323_vm10, %v1060_v40, %v1064_v24  ;;  %v2666_v51 = vunpack.c.l.b16 %v1055_v43  ;;  %v533_v53 = vshll.u32 %v308_v37, 16  ;;  %v227_v54 = vld [vmem:[#allocation2 + $0xb4] sm:$0x1]  ;;  %v532_v5 = vrot.slane %v530_v52, 7 }
  0x85   : > { %273 = vst [vmem:[#allocation2 + $0xa4] sm:$0x1] %v272_v17  ;;  %v2667_v56 = vunpack.c.l.b16 %v1065_v50  ;;  %v1102_v57 = vrot.slane %v1100_v45, 5  ;;  %v1106_v59 = vrot.slane %v1104_v46, 4  ;;  %v527_v60 = vor.u32 %v525_v42, %v524_v47  ;;  %v277_v63 = vld [vmem:[#allocation2 + $0xbc] sm:$0x1] }
  0x86   : > { %v723_v61 = vld [vmem:[#allocation2 + $0x9c] sm:$0xf]  ;;  %v528_v4 = vrot.slane %v524_v47, 4  ;;  %v228_v7 = vsel %vm4282_vm3, 0, %v227_v54  ;;  %v278_v8 = vsel %vm4289_vm5, 0, %v277_v63  ;;  %v535_v18 = vor.u32 %v533_v53, %v532_v5 }
  0x87   : > { %v775_v3 = vld [vmem:[#allocation2 + $0x90] sm:$0xf]  ;;  %v2688_v9 = vpack.c.b16 %v2667_v56, %v2666_v51  ;;  %v1107_v15 = vor.u32 %v1106_v59, %v1102_v57  ;;  %229 = vst [vmem:[#allocation2 + $0xb4] sm:$0x1] %v228_v7  ;;  %v537_v20 = vrot.slane %v532_v5, 4  ;;  %v724_v21 = vsel %vm4317_vm9, %v527_v60, %v723_v61 }
  0x88   : > { %v4607_v11 = vld [vmem:[#allocation2 + $0x98] sm:$0x1]  ;;  %v1091_v12 = vshrl.u32 %v775_v3, 16  ;;  %v1094_v14 = vshll.u32 %v775_v3, 16  ;;  %279 = vst [vmem:[#allocation2 + $0xbc] sm:$0x1] %v278_v8  ;;  %v536_v39 = vsel %vm4331_vm11, %v528_v4, %v535_v18 }
  0x89   : > { %v1110_v16 = vshll.u32 %v4607_v11, 16  ;;  %v779_v17 = vld [vmem:[#allocation2 + $0xa8] sm:$0xf]  ;;  %2714 = vrot.lane.b32.xlu1 %v2688_v9, %s4243_s18  ;;  %v1108_v24 = vrot.slane %v1107_v15, 4  ;;  %725 = vst [vmem:[#allocation2 + $0x9c] sm:$0xf] %v724_v21 }
  0x8a   : > { %v1093_v22 = vrot.slane %v1091_v12, 4  ;;  %v1096_v23 = vrot.slane %v1094_v14, 5  ;;  %v4613_v25 = vld [vmem:[#allocation2 + $0xac] sm:$0xf]  ;;  %v1139_v27 = vshrl.u32 %v779_v17, 16  ;;  %v1142_v30 = vshll.u32 %v779_v17, 16 }
  0x8b   : > { %v1112_v28 = vrot.slane %v1110_v16, 5  ;;  %v4615_v29 = vld [vmem:[#allocation2 + $0xb0] sm:$0x1]  ;;  %v1148_v32 = vshll.u32 %v4613_v25, 16  ;;  %v1152_v33 = vshrl.u32 %v4613_v25, 16  ;;  %vm3671_vm2 = vcmask 1043456  }
  0x8c   : > { %v1097_v34 = vor.u32 %v1096_v23, %v1093_v22  ;;  %v1141_v36 = vrot.slane %v1139_v27, 4  ;;  %v1158_v37 = vshll.u32 %v4615_v29, 16  ;;  %v727_v40 = vld [vmem:[#allocation2 + $0xa4] sm:$0x1]  ;;  %v1144_v43 = vrot.slane %v1142_v30, 5 }
  0x8d   : > { %v1113_v42 = vsel %vm4323_vm10, %v1108_v24, %v1112_v28  ;;  %v1150_v45 = vrot.slane %v1148_v32, 5  ;;  %v1154_v46 = vrot.slane %v1152_v33, 4  ;;  %726 = vst.msk [vmem:[#allocation2 + $0xa0] sm:$0xf] %vm172_vm0, %v536_v39  ;;  %v728_v52 = vsel %vm4282_vm3, %v537_v20, %v727_v40  ;;  %v311_v53 = vld [vmem:[%s4307_s17 + $0x70] sm:$0xf] }
  0x8e   : > { %v1098_v47 = vrot.slane %v1097_v34, 4  ;;  %v2671_v50 = vunpack.c.l.b16 %v1113_v42  ;;  %v1160_v51 = vrot.slane %v1158_v37, 5  ;;  %v312_v54 = vld [vmem:[%s4307_s17 + $0x74] sm:$0xf]  ;;  %v1145_v56 = vor.u32 %v1144_v43, %v1141_v36  ;;  %729 = vst [vmem:[#allocation2 + $0xa4] sm:$0x1] %v728_v52 }
  0x8f   : > { %v1155_v59 = vor.u32 %v1154_v46, %v1150_v45  ;;  %v556_v60 = vshrl.u32 %v311_v53, 16  ;;  %v559_v61 = vshll.u32 %v311_v53, 16  ;;  %v564_v3 = vshrl.u32 %v312_v54, 16  ;;  %v1186_v5 = vld [vmem:[#allocation2] sm:$0xe] }
  0x90   : > { %v1103_v63 = vsel %vm4323_vm10, %v1098_v47, %v1102_v57  ;;  %v567_v4 = vshll.u32 %v312_v54, 16  ;;  %v1146_v8 = vrot.slane %v1145_v56, 4  ;;  %v3860_v15 = vrot.slane %v1186_v5, 9  ;;  %v777_v20 = vld [vmem:[#allocation2 + $0x9c] sm:$0xf] }
  0x91   : > { %v2670_v7 = vunpack.c.l.b16 %v1103_v63  ;;  %v1156_v9 = vrot.slane %v1155_v59, 4  ;;  %v558_v12 = vrot.slane %v556_v60, 7  ;;  %v566_v14 = vrot.slane %v564_v3, 7  ;;  %v737_v21 = vld [vmem:[#allocation2 + $0xb4] sm:$0xf] }
  0x92   : > { %v1151_v17 = vsel %vm4323_vm10, %v1146_v8, %v1150_v45  ;;  %v1115_v27 = vshrl.u32 %v777_v20, 16  ;;  %v1118_v28 = vshll.u32 %v777_v20, 16  ;;  %v741_v30 = vld [vmem:[#allocation2 + $0xbc] sm:$0x1]  ;;  %v1187_v37 = vld [vmem:[#allocation2 + $0xc] sm:$0xe] }
  0x93   : > { %v2690_v16 = vpack.c.b16 %v2671_v50, %v2670_v7  ;;  %v1161_v18 = vsel %vm4323_vm10, %v1156_v9, %v1160_v51  ;;  %v561_v57 = vor.u32 %v559_v61, %v558_v12  ;;  %v2674_v22 = vunpack.c.l.b16 %v1151_v17  ;;  %v4221_v59 = vld [vmem:[#allocation2 + $0x4] sm:$0xf]  ;;  %v4222_v3 = vld [vmem:[#allocation2 + $0x8] sm:$0x1]  ;;  %v4223_v9 = vld [vmem:[#allocation2 + $0x10] sm:$0xf] }
  0x94   : > { %v2675_v23 = vunpack.c.l.b16 %v1161_v18  ;;  %v4635_v24 = vld [vmem:[#allocation2 + $0xa0] sm:$0xf]  ;;  %v562_v34 = vrot.slane %v558_v12, 4  ;;  %v569_v36 = vor.u32 %v567_v4, %v566_v14  ;;  %v1117_v42 = vrot.slane %v1115_v27, 4  ;;  %v4224_v17 = vld [vmem:[#allocation2 + $0x14] sm:$0x1] }
  0x95   : > { %2718 = vrot.lane.b32.xlu0 %v2690_v16, %s4243_s18  ;;  %v1124_v32 = vshll.u32 %v4635_v24, 16  ;;  %v1128_v33 = vshrl.u32 %v4635_v24, 16  ;;  %v4640_v40 = vld [vmem:[#allocation2 + $0xa4] sm:$0x1]  ;;  %v1120_v43 = vrot.slane %v1118_v28, 5  ;;  %v571_v45 = vrot.slane %v566_v14, 4 }
  0x96   : > { %v2692_v39 = vpack.c.b16 %v2675_v23, %v2674_v22  ;;  %v1134_v50 = vshll.u32 %v4640_v40, 16  ;;  %v570_v51 = vsel %vm4331_vm11, %v562_v34, %v569_v36  ;;  %v738_v53 = vsel %vm4317_vm9, %v561_v57, %v737_v21  ;;  %v1188_v23 = vld [vmem:[#allocation2 + $0x18] sm:$0xe]  ;;  %v4225_v34 = vld [vmem:[#allocation2 + $0x1c] sm:$0xf] }
  0x97   : > { %v1126_v46 = vrot.slane %v1124_v32, 5  ;;  %v1130_v47 = vrot.slane %v1128_v33, 4  ;;  %v1121_v52 = vor.u32 %v1120_v43, %v1117_v42  ;;  %740 = vst.msk [vmem:[#allocation2 + $0xb8] sm:$0xf] %vm172_vm0, %v570_v51  ;;  %v742_v54 = vsel %vm4282_vm3, %v571_v45, %v741_v30  ;;  %v4226_v45 = vld [vmem:[#allocation2 + $0x20] sm:$0x1] }
  0x98   : > { %2722 = vrot.lane.b32.xlu2 %v2692_v39, %s4243_s18  ;;  %v1255_v60 = vrot.slane %v4221_v59, 5  ;;  %v1136_v63 = vrot.slane %v1134_v50, 5  ;;  %739 = vst [vmem:[#allocation2 + $0xb4] sm:$0xf] %v738_v53  ;;  %v1258_v4 = vrot.slane %v4222_v3, 5  ;;  %v3861_v5 = vrot.slane %v1187_v37, 9 }
  0x99   : > { %v1131_v61 = vor.u32 %v1130_v47, %v1126_v46  ;;  %v1122_v7 = vrot.slane %v1121_v52, 4  ;;  %743 = vst [vmem:[#allocation2 + $0xbc] sm:$0x1] %v742_v54  ;;  %v1262_v12 = vrot.slane %v4223_v9, 5  ;;  %v1265_v18 = vrot.slane %v4224_v17, 5 }
  0x9a   : > { %v1257_v8 = vrot.slane %v1255_v60, 4  ;;  %v1256_v16 = vsel %vm4653_vm14, %v3860_v15, %v1255_v60  ;;  %v1269_v36 = vrot.slane %v4225_v34, 5  ;;  %v3862_v43 = vrot.slane %v1188_v23, 9  ;;  %v1189_v47 = vld [vmem:[#allocation2 + $0x24] sm:$0xe] }
  0x9b   : > { %v1132_v14 = vrot.slane %v1131_v61, 4  ;;  %v1127_v20 = vsel %vm4323_vm10, %v1122_v7, %v1126_v46  ;;  %v1263_v21 = vsel %vm4653_vm14, %v3861_v5, %v1262_v12  ;;  %v1264_v22 = vrot.slane %v1262_v12, 4  ;;  %v1190_v9 = vld [vmem:[#allocation2 + $0x30] sm:$0xe] }
  0x9c   : > { %v1259_v57 = vsel %vm4653_vm14, %v1257_v8, %v1258_v4  ;;  %v2672_v28 = vunpack.c.l.b16 %v1127_v20  ;;  %v2728_v30 = vunpack.c.l.b16 %v1263_v21  ;;  %v2726_v15 = vunpack.c.l.b16 %v1256_v16 }
  0x9d   : > { %v1137_v27 = vsel %vm4323_vm10, %v1132_v14, %v1136_v63  ;;  %v1266_v33 = vsel %vm4653_vm14, %v1264_v22, %v1265_v18  ;;  %v2727_v39 = vunpack.c.l.b16 %v1259_v57  ;;  %v1272_v46 = vrot.slane %v4226_v45, 5 }
  0x9e   : > { %v2673_v32 = vunpack.c.l.b16 %v1137_v27  ;;  %v4669_v37 = vld [vmem:[#allocation2 + $0xb8] sm:$0xf]  ;;  %v2729_v42 = vunpack.c.l.b16 %v1266_v33  ;;  %v1276_v54 = vrot.slane %v4429_v13, 5  ;;  %v1271_v3 = vrot.slane %v1269_v36, 4 }
  0x9f   : > { %v781_v51 = vld [vmem:[#allocation2 + $0xb4] sm:$0xf]  ;;  %v1172_v52 = vshll.u32 %v4669_v37, 16  ;;  %v1176_v53 = vshrl.u32 %v4669_v37, 16  ;;  %v3863_v8 = vrot.slane %v1189_v47, 9  ;;  %v2758_v16 = vpack.c.b16 %v2727_v39, %v2726_v15 }
  0xa0   : > { %v2691_v50 = vpack.c.b16 %v2673_v32, %v2672_v28  ;;  %v4674_v59 = vld [vmem:[#allocation2 + $0xbc] sm:$0x1]  ;;  %v1163_v60 = vshrl.u32 %v781_v51, 16  ;;  %v1166_v61 = vshll.u32 %v781_v51, 16  ;;  %v2759_v63 = vpack.c.b16 %v2729_v42, %v2728_v30  ;;  %v4227_v30 = vld [vmem:[#allocation2 + $0x34] sm:$0xf] }
  0xa1   : > { %v1174_v4 = vrot.slane %v1172_v52, 5  ;;  %v1178_v5 = vrot.slane %v1176_v53, 4  ;;  %v1182_v7 = vshll.u32 %v4674_v59, 16  ;;  %v1270_v18 = vsel %vm4653_vm14, %v3862_v43, %v1269_v36  ;;  %v4228_v15 = vld [vmem:[#allocation2 + $0x38] sm:$0x1] }
  0xa2   : > { %2720 = vrot.lane.b32.xlu1 %v2691_v50, %s4243_s18  ;;  %v1165_v12 = vrot.slane %v1163_v60, 4  ;;  %v1168_v14 = vrot.slane %v1166_v61, 5  ;;  %2776 = vrot.lane.b32.xlu2 %v2759_v63, %s4244_s19  ;;  %v1278_v20 = vrot.slane %v1276_v54, 4  ;;  %v1273_v21 = vsel %vm4653_vm14, %v1271_v3, %v1272_v46  ;;  %v1191_v42 = vld [vmem:[#allocation2 + $0x3c] sm:$0xe] }
  0xa3   : > { %v1179_v13 = vor.u32 %v1178_v5, %v1174_v4  ;;  %v1184_v17 = vrot.slane %v1182_v7, 5  ;;  %v1279_v22 = vrot.slane %v4435_v19, 5  ;;  %v3864_v23 = vrot.slane %v1190_v9, 9  ;;  %v4229_v43 = vld [vmem:[#allocation2 + $0x40] sm:$0xf] }
  0xa4   : > { %v1169_v57 = vor.u32 %v1168_v14, %v1165_v12  ;;  %v1277_v28 = vsel %vm4653_vm14, %v3863_v8, %v1276_v54  ;;  %v1283_v32 = vrot.slane %v4227_v30, 5  ;;  %v1286_v33 = vrot.slane %v4228_v15, 5  ;;  %v1192_v51 = vld [vmem:[#allocation2 + $0x48] sm:$0xe]  ;;  %v1193_v61 = vld [vmem:[#allocation2 + $0x54] sm:$0xe] }
  0xa5   : > { %v1180_v27 = vrot.slane %v1179_v13, 4  ;;  %v2730_v39 = vunpack.c.l.b16 %v1270_v18  ;;  %v1280_v36 = vsel %vm4653_vm14, %v1278_v20, %v1279_v22  ;;  %v1290_v45 = vrot.slane %v4229_v43, 5  ;;  %v4230_v12 = vld [vmem:[#allocation2 + $0x44] sm:$0x1]  ;;  %v4231_v18 = vld [vmem:[#allocation2 + $0x4c] sm:$0xf] }
  0xa6   : > { %v1170_v34 = vrot.slane %v1169_v57, 4  ;;  %v2731_v46 = vunpack.c.l.b16 %v1273_v21  ;;  %v1284_v47 = vsel %vm4653_vm14, %v3864_v23, %v1283_v32  ;;  %v1285_v50 = vrot.slane %v1283_v32, 4  ;;  %v4232_v20 = vld [vmem:[#allocation2 + $0x50] sm:$0x1]  ;;  %v1194_v32 = vld [vmem:[#allocation2 + $0x60] sm:$0xe] }
  0xa7   : > { %v1185_v19 = vsel %vm4323_vm10, %v1180_v27, %v1184_v17  ;;  %v2732_v54 = vunpack.c.l.b16 %v1277_v28  ;;  %v2734_v60 = vunpack.c.l.b16 %v1284_v47  ;;  %v2733_v3 = vunpack.c.l.b16 %v1280_v36 }
  0xa8   : > { %v1175_v52 = vsel %vm4323_vm10, %v1170_v34, %v1174_v4  ;;  %v2677_v53 = vunpack.c.l.b16 %v1185_v19  ;;  %v1287_v5 = vsel %vm4653_vm14, %v1285_v50, %v1286_v33  ;;  %v3865_v7 = vrot.slane %v1191_v42, 9  ;;  %v1195_v19 = vld [vmem:[#allocation2 + $0x6c] sm:$0xe] }
  0xa9   : > { %v2676_v63 = vunpack.c.l.b16 %v1175_v52  ;;  %v2735_v8 = vunpack.c.l.b16 %v1287_v5  ;;  %v1292_v9 = vrot.slane %v1290_v45, 4  ;;  %v1293_v14 = vrot.slane %v4230_v12, 5 }
  0xaa   : > { %2774 = vrot.lane.b32.xlu1 %v2758_v16, %s4244_s19  ;;  %v3866_v13 = vrot.slane %v1192_v51, 9  ;;  %v1297_v4 = vrot.slane %v4231_v18, 5  ;;  %v1300_v57 = vrot.slane %v4232_v20, 5  ;;  %v3867_v21 = vrot.slane %v1193_v61, 9  ;;  %v1199_v20 = vld [vmem:[#allocation2 + $0x9c] sm:$0xe] }
  0xab   : > { %v2693_v17 = vpack.c.b16 %v2677_v53, %v2676_v63  ;;  %v2762_v22 = vpack.c.b16 %v2735_v8, %v2734_v60  ;;  %v1304_v23 = vrot.slane %v4501_v35, 5  ;;  %v1307_v16 = vrot.slane %v4504_v44, 5 }
  0xac   : > { %v2761_v27 = vpack.c.b16 %v2733_v3, %v2732_v54  ;;  %v1298_v28 = vsel %vm4653_vm14, %v3866_v13, %v1297_v4  ;;  %v1299_v30 = vrot.slane %v1297_v4, 4  ;;  %v2760_v15 = vpack.c.b16 %v2731_v46, %v2730_v39  ;;  %v1196_v39 = vld [vmem:[#allocation2 + $0x78] sm:$0xe]  ;;  %v1198_v13 = vld [vmem:[#allocation2 + $0x90] sm:$0xe] }
  0xad   : > { %2724 = vrot.lane.b32.xlu0 %v2693_v17, %s4243_s18  ;;  %2782 = vrot.lane.b32.xlu2 %v2762_v22, %s4244_s19  ;;  %v1305_v33 = vsel %vm4653_vm14, %v3867_v21, %v1304_v23  ;;  %v1306_v34 = vrot.slane %v1304_v23, 4  ;;  %v1311_v36 = vrot.slane %v4470_v49, 5  ;;  %v1291_v35 = vsel %vm4653_vm14, %v3865_v7, %v1290_v45  ;;  %v1197_v23 = vld [vmem:[#allocation2 + $0x84] sm:$0xe] }
  0xae   : > { %v1294_v44 = vsel %vm4653_vm14, %v1292_v9, %v1293_v14  ;;  %v1301_v42 = vsel %vm4653_vm14, %v1299_v30, %v1300_v57  ;;  %v2740_v43 = vunpack.c.l.b16 %v1305_v33  ;;  %v2738_v46 = vunpack.c.l.b16 %v1298_v28 }
  0xaf   : > { %v1308_v47 = vsel %vm4653_vm14, %v1306_v34, %v1307_v16  ;;  %v3868_v50 = vrot.slane %v1194_v32, 9  ;;  %v1314_v51 = vrot.slane %v4477_v55, 5  ;;  %v2739_v49 = vunpack.c.l.b16 %v1301_v42 }
  0xb0   : > { %v2741_v45 = vunpack.c.l.b16 %v1308_v47  ;;  %v1313_v52 = vrot.slane %v1311_v36, 4  ;;  %v1318_v53 = vrot.slane %v4510_v58, 5  ;;  %v3869_v54 = vrot.slane %v1195_v19, 9 }
  0xb1   : > { %v1321_v60 = vrot.slane %v4515_v0, 5  ;;  %v3870_v61 = vrot.slane %v1196_v39, 9  ;;  %v2736_v63 = vunpack.c.l.b16 %v1291_v35  ;;  %v2737_v3 = vunpack.c.l.b16 %v1294_v44 }
  0xb2   : > { %2780 = vrot.lane.b32.xlu1 %v2761_v27, %s4244_s19  ;;  %v2765_v5 = vpack.c.b16 %v2741_v45, %v2740_v43  ;;  %v1320_v7 = vrot.slane %v1318_v53, 4  ;;  %v1325_v8 = vrot.slane %v4571_v62, 5  ;;  %v1328_v9 = vrot.slane %v4575_v6, 5  ;;  %v1200_v27 = vld [vmem:[#allocation2 + $0xa8] sm:$0xe] }
  0xb3   : > { %v2764_v55 = vpack.c.b16 %v2739_v49, %v2738_v46  ;;  %v1312_v12 = vsel %vm4653_vm14, %v3868_v50, %v1311_v36  ;;  %v1315_v58 = vsel %vm4653_vm14, %v1313_v52, %v1314_v51  ;;  %v1319_v0 = vsel %vm4653_vm14, %v3869_v54, %v1318_v53  ;;  %v1201_v49 = vld [vmem:[#allocation2 + $0xb4] sm:$0xe] }
  0xb4   : > { %v1322_v14 = vsel %vm4653_vm14, %v1320_v7, %v1321_v60  ;;  %v1326_v62 = vsel %vm4653_vm14, %v3870_v61, %v1325_v8  ;;  %v1327_v6 = vrot.slane %v1325_v8, 4  ;;  %v2763_v17 = vpack.c.b16 %v2737_v3, %v2736_v63 }
  0xb5   : > { %2778 = vrot.lane.b32.xlu0 %v2760_v15, %s4244_s19  ;;  %2788 = vrot.lane.b32.xlu2 %v2765_v5, %s4244_s19  ;;  %v2746_v18 = vunpack.c.l.b16 %v1326_v62  ;;  %v1339_v4 = vrot.slane %v4594_v41, 5  ;;  %v2742_v57 = vunpack.c.l.b16 %v1312_v12  ;;  %v2743_v21 = vunpack.c.l.b16 %v1315_v58  ;;  %v4765_v62 = vpop.permute.xlu2 %2702 }
  0xb6   : > { %v1329_v22 = vsel %vm4653_vm14, %v1327_v6, %v1328_v9  ;;  %v1332_v16 = vrot.slane %v4535_v48, 5  ;;  %v2744_v28 = vunpack.c.l.b16 %v1319_v0  ;;  %v2745_v30 = vunpack.c.l.b16 %v1322_v14 }
  0xb7   : > { %v2747_v32 = vunpack.c.l.b16 %v1329_v22  ;;  %v3872_v15 = vrot.slane %v1198_v13, 9  ;;  %v1341_v33 = vrot.slane %v1339_v4, 4  ;;  %v1342_v34 = vrot.slane %v4607_v11, 5  ;;  %v4155_v22 = vld [vmem:[#allocation2 + $0x30] sm:$0xff] }
  0xb8   : > { %v3873_v41 = vrot.slane %v1199_v20, 9  ;;  %v1346_v36 = vrot.slane %v4635_v24, 5  ;;  %v3871_v44 = vrot.slane %v1197_v23, 9  ;;  %v1349_v42 = vrot.slane %v4640_v40, 5 }
  0xb9   : > { %v2768_v35 = vpack.c.b16 %v2747_v32, %v2746_v18  ;;  %v3874_v43 = vrot.slane %v1200_v27, 9  ;;  %v1334_v19 = vrot.slane %v1332_v16, 4  ;;  %v1335_v48 = vrot.slane %v4542_v10, 5  ;;  %v314_v27 = vld [vmem:[%s4307_s17 + $0x7c] sm:$0xf] }
  0xba   : > { %2786 = vrot.lane.b32.xlu1 %v2764_v55, %s4244_s19  ;;  %v1347_v39 = vsel %vm4653_vm14, %v3873_v41, %v1346_v36  ;;  %v1348_v46 = vrot.slane %v1346_v36, 4  ;;  %v2767_v47 = vpack.c.b16 %v2745_v30, %v2744_v28  ;;  %v1340_v11 = vsel %vm4653_vm14, %v3872_v15, %v1339_v4  ;;  %v4152_v4 = vld [vmem:[#allocation2 + $0xc] sm:$0xff]  ;;  %v4154_v28 = vld [vmem:[#allocation2 + $0x24] sm:$0xff]  ;;  %v2695_v30 = vpop.permute.xlu0 %2694 }
  0xbb   : > { %v1353_v24 = vrot.slane %v4613_v25, 5  ;;  %v1356_v50 = vrot.slane %v4615_v29, 5  ;;  %v1343_v40 = vsel %vm4653_vm14, %v1341_v33, %v1342_v34  ;;  %v2752_v51 = vunpack.c.l.b16 %v1347_v39  ;;  %v1365_v41 = vld [vmem:[#allocation2 + $0xc] sm:$0xf]  ;;  %v4782_v36 = vld [vmem:[#allocation2 + $0x10] sm:$0xf] }
  0xbc   : > { %v1350_v10 = vsel %vm4653_vm14, %v1348_v46, %v1349_v42  ;;  %v1360_v45 = vrot.slane %v4669_v37, 5  ;;  %v2766_v25 = vpack.c.b16 %v2743_v21, %v2742_v57  ;;  %v1333_v29 = vsel %vm4653_vm14, %v3871_v44, %v1332_v16  ;;  %v230_v21 = vld [vmem:[#allocation2 + $0xc0] sm:$0x1]  ;;  %v313_v16 = vld [vmem:[%s4307_s17 + $0x78] sm:$0xf] }
  0xbd   : > { %2784 = vrot.lane.b32.xlu0 %v2763_v17, %s4244_s19  ;;  %2794 = vrot.lane.b32.xlu2 %v2768_v35, %s4244_s19  ;;  %v2753_v52 = vunpack.c.l.b16 %v1350_v10  ;;  %v1354_v53 = vsel %vm4653_vm14, %v3874_v43, %v1353_v24  ;;  %v1355_v54 = vrot.slane %v1353_v24, 4  ;;  %v1336_v60 = vsel %vm4653_vm14, %v1334_v19, %v1335_v48  ;;  %v2705_v57 = vpop.permute.xlu2 %2704  ;;  %v4153_v48 = vld [vmem:[#allocation2 + $0x18] sm:$0xff] }
  0xbe   : > { %v2754_v61 = vunpack.c.l.b16 %v1354_v53  ;;  %v2750_v63 = vunpack.c.l.b16 %v1340_v11  ;;  %v2751_v3 = vunpack.c.l.b16 %v1343_v40  ;;  %v3875_v5 = vrot.slane %v1201_v49, 9  ;;  %v4158_v24 = vld [vmem:[#allocation2 + $0x54] sm:$0xff] }
  0xbf   : > { %v1357_v37 = vsel %vm4653_vm14, %v1355_v54, %v1356_v50  ;;  %v2771_v7 = vpack.c.b16 %v2753_v52, %v2752_v51  ;;  %v1362_v9 = vrot.slane %v1360_v45, 4  ;;  %v1363_v55 = vrot.slane %v4674_v59, 5  ;;  %v4140_v49 = vld [vmem:[#allocation2 + $0x30] sm:$0xff] }
  0xc0   : > { %v2755_v8 = vunpack.c.l.b16 %v1357_v37  ;;  %v2748_v58 = vunpack.c.l.b16 %v1333_v29  ;;  %v2749_v0 = vunpack.c.l.b16 %v1336_v60  ;;  %v2770_v14 = vpack.c.b16 %v2751_v3, %v2750_v63  ;;  %v4794_v53 = vld [vmem:[#allocation2 + $0x14] sm:$0x1]  ;;  %v4136_v29 = vld [vmem:[#allocation2] sm:$0xff]  ;;  %v2699_v63 = vpop.permute.xlu1 %2698 }
  0xc1   : > { %v1361_v6 = vsel %vm4653_vm14, %v3875_v5, %v1360_v45  ;;  %v1364_v13 = vsel %vm4653_vm14, %v1362_v9, %v1363_v55  ;;  %v231_v23 = vsel %vm4282_vm3, 0, %v230_v21  ;;  %v573_v32 = vshrl.u32 %v313_v16, 16  ;;  %v4141_v45 = vld [vmem:[#allocation2 + $0x3c] sm:$0xff]  ;;  %v4147_v9 = vld [vmem:[#allocation2 + $0x84] sm:$0xff]  ;;  %v4817_v21 = vld [vmem:[#allocation2 + $0x70] sm:$0xf] }
  0xc2   : > { %2792 = vrot.lane.b32.xlu1 %v2767_v47, %s4244_s19  ;;  %v2772_v12 = vpack.c.b16 %v2755_v8, %v2754_v61  ;;  %v2769_v17 = vpack.c.b16 %v2749_v0, %v2748_v58  ;;  %v2756_v59 = vunpack.c.l.b16 %v1361_v6  ;;  %v2757_v18 = vunpack.c.l.b16 %v1364_v13  ;;  %232 = vst [vmem:[#allocation2 + $0xc0] sm:$0x1] %v231_v23  ;;  %v4157_v61 = vld [vmem:[#allocation2 + $0x48] sm:$0xff]  ;;  %v2697_v37 = vpop.permute.xlu0 %2696  ;;  %v1368_v58 = vld [vmem:[#allocation2 + $0x1c] sm:$0xf] }
  0xc3   : > { %v581_v15 = vshrl.u32 %v314_v27, 16  ;;  %v575_v33 = vrot.slane %v573_v32, 7  ;;  %v576_v34 = vshll.u32 %v313_v16, 16  ;;  %v584_v42 = vshll.u32 %v314_v27, 16  ;;  %v4161_v0 = vld [vmem:[#allocation2 + $0x78] sm:$0xff] }
  0xc4   : > { %v2773_v20 = vpack.c.b16 %v2757_v18, %v2756_v59  ;;  %v1414_v43 = vshrl.u32 %v1365_v41, 16  ;;  %v1417_v19 = vshll.u32 %v1365_v41, 16  ;;  %v1423_v47 = vshll.u32 %v4782_v36, 16  ;;  %v1381_v59 = vld [vmem:[#allocation2 + $0x6c] sm:$0xf] }
  0xc5   : > { %2790 = vrot.lane.b32.xlu0 %v2766_v25, %s4244_s19  ;;  %2800 = vrot.lane.b32.xlu2 %v2771_v7, %s4244_s19  ;;  %v4784_v35 = vpop.permute.xlu2 %2710  ;;  %v4786_v44 = vrot.slane %v581_v15, 7  ;;  %v578_v39 = vor.u32 %v576_v34, %v575_v33  ;;  %v579_v46 = vrot.slane %v575_v33, 4  ;;  %v1427_v11 = vshrl.u32 %v4782_v36, 16  ;;  %v4156_v7 = vld [vmem:[#allocation2 + $0x3c] sm:$0xff]  ;;  %v4137_v18 = vld [vmem:[#allocation2 + $0xc] sm:$0xff] }
  0xc6   : > { %v1416_v10 = vrot.slane %v1414_v43, 4  ;;  %v1419_v51 = vrot.slane %v1417_v19, 5  ;;  %v4796_v54 = vrot.slane %v1423_v47, 5  ;;  %v1433_v5 = vshll.u32 %v4794_v53, 16  ;;  %v1389_v32 = vld [vmem:[#allocation2 + $0x9c] sm:$0xf] }
  0xc7   : > { %v586_v50 = vor.u32 %v584_v42, %v4786_v44  ;;  %v1429_v25 = vrot.slane %v1427_v11, 4  ;;  %v4806_v38 = vsel %vm3318_vm15, %v4140_v49, %v4765_v62  ;;  %v4809_v8 = vsel %vm3318_vm15, %v4141_v45, %v2705_v57  ;;  %v4138_v62 = vld [vmem:[#allocation2 + $0x18] sm:$0xff]  ;;  %v4826_v41 = vld [vmem:[#allocation2 + $0x20] sm:$0x1]  ;;  %v4828_v43 = vld [vmem:[#allocation2 + $0x74] sm:$0x1] }
  0xc8   : > { %v1420_v3 = vor.u32 %v1419_v51, %v1416_v10  ;;  %v1451_v57 = vshrl.u32 %v1368_v58, 16  ;;  %v1435_v16 = vrot.slane %v1433_v5, 5  ;;  %v4821_v15 = vsel %vm3318_vm15, %v4144_v26, %v4784_v35  ;;  %v4160_v47 = vld [vmem:[#allocation2 + $0x6c] sm:$0xff]  ;;  %v4832_v11 = vpop.permute.xlu1 %2700 }
  0xc9   : > { %v744_v40 = vld [vmem:[#allocation2 + $0xc0] sm:$0xf]  ;;  %v587_v60 = vsel %vm4331_vm11, %v579_v46, %v586_v50  ;;  %v1430_v55 = vor.u32 %v1429_v25, %v4796_v54  ;;  %v1609_v46 = vshll.u32 %v1381_v59, 16  ;;  %v1619_v50 = vshrl.u32 %v4817_v21, 16 }
  0xca   : > { %2798 = vrot.lane.b32.xlu1 %v2770_v14, %s4244_s19  ;;  %v745_v52 = vsel %vm4317_vm9, %v578_v39, %v744_v40  ;;  %747 = vst.msk [vmem:[#allocation2 + $0xc4] sm:$0xf] %vm172_vm0, %v587_v60  ;;  %v4813_v14 = vsel %vm3318_vm15, %v4136_v29, %v2695_v30  ;;  %v1453_v42 = vrot.slane %v1451_v57, 4  ;;  %v1625_v40 = vshll.u32 %v4828_v43, 16  ;;  %v2707_v29 = vpop.permute.xlu0 %2706 }
  0xcb   : > { %746 = vst [vmem:[#allocation2 + $0xc0] sm:$0xf] %v745_v52  ;;  %v1431_v34 = vrot.slane %v1430_v55, 4  ;;  %v1611_v49 = vrot.slane %v1609_v46, 5  ;;  %v1702_v45 = vshrl.u32 %v1389_v32, 16  ;;  %v4839_v52 = vsel %vm3318_vm15, %v4138_v62, %v2699_v63  ;;  %v4159_v55 = vld [vmem:[#allocation2 + $0x60] sm:$0xff] }
  0xcc   : > { %v4842_v25 = vsel %vm3318_vm15, %v4137_v18, %v2697_v37  ;;  %v1627_v37 = vrot.slane %v1625_v40, 5  ;;  %v1919_v40 = vrot.slane %v4817_v21, 5  ;;  %vm3367_vm0 = vcmask 130048  }
  0xcd   : > { %2796 = vrot.lane.b32.xlu0 %v2769_v17, %s4244_s19  ;;  %2870 = vrot.lane.b32.xlu2 %v4152_v4, %s4245_s20  ;;  %v1447_v17 = vshll.u32 %v1368_v58, 16  ;;  %v588_v4 = vrot.slane %v4786_v44, 4  ;;  %v1436_v5 = vsel %vm4323_vm10, %v1431_v34, %v1435_v16  ;;  %v1704_v58 = vrot.slane %v1702_v45, 4 }
  0xce   : > { %v4861_v18 = vunpack.c.l.b16 %v1436_v5  ;;  %vm3433_vm4 = vcmask 261120   ;;  %vm3532_vm6 = vcmask 457728   ;;  %vm3565_vm7 = vcmask 523264  }
  0xcf   : > { %v1449_v30 = vrot.slane %v1447_v17, 5  ;;  %vm3638_vm8 = vcmask 588800  }
  0xd1   : > { %v1454_v35 = vor.u32 %v1453_v42, %v1449_v30 }
  0xd2   : > { %2804 = vrot.lane.b32.xlu1 %v2773_v20, %s4244_s19  ;;  %v1421_v20 = vrot.slane %v1420_v3, 4  ;;  %v4844_v3 = vld [vmem:[#allocation2 + $0xa0] sm:$0xf] }
  0xd3   : > { %v1455_v60 = vrot.slane %v1454_v35, 4  ;;  %v1715_v57 = vshrl.u32 %v4844_v3, 16  ;;  %v4143_v35 = vld [vmem:[#allocation2 + $0x54] sm:$0xff] }
  0xd4   : > { %v1426_v26 = vsel %vm4323_vm10, %v1421_v20, %v4796_v54 }
  0xd5   : > { %2802 = vrot.lane.b32.xlu0 %v2772_v12, %s4244_s19  ;;  %2876 = vrot.lane.b32.xlu2 %v4155_v22, %s4245_s20  ;;  %v1367_v12 = vld [vmem:[#allocation2 + $0x18] sm:$0xf]  ;;  %v1606_v22 = vshrl.u32 %v1381_v59, 16  ;;  %v1711_v59 = vshll.u32 %v4844_v3, 16  ;;  %v4859_v62 = vunpack.c.l.b16 %v1426_v26 }
  0xd6   : > { %v1438_v6 = vshrl.u32 %v1367_v12, 16  ;;  %v1441_v13 = vshll.u32 %v1367_v12, 16  ;;  %v2717_v23 = vpop.permute.xlu2 %2716  ;;  %v4854_v12 = vld [vmem:[#allocation2 + $0xa4] sm:$0x1] }
  0xd7   : > { %v4824_v33 = vsel %vm3318_vm15, %v4147_v9, %v2717_v23  ;;  %v1608_v39 = vrot.slane %v1606_v22, 4  ;;  %v1621_v9 = vrot.slane %v1619_v50, 4  ;;  %v4163_v22 = vld [vmem:[#allocation2 + $0x90] sm:$0xff] }
  0xd8   : > { %v1440_v27 = vrot.slane %v1438_v6, 4  ;;  %v4164_v6 = vld [vmem:[#allocation2 + $0x9c] sm:$0xff] }
  0xda   : > { %2874 = vrot.lane.b32.xlu1 %v4154_v28, %s4245_s20  ;;  %v1443_v28 = vrot.slane %v1441_v13, 5 }
  0xdc   : > { %v1444_v19 = vor.u32 %v1443_v28, %v1440_v27  ;;  %v1713_v27 = vrot.slane %v1711_v59, 5  ;;  %v1721_v28 = vshll.u32 %v4854_v12, 16 }
  0xdd   : > { %2872 = vrot.lane.b32.xlu0 %v4153_v48, %s4245_s20  ;;  %2882 = vrot.lane.b32.xlu2 %v4158_v24, %s4245_s20  ;;  %v1457_v48 = vshll.u32 %v4826_v41, 16  ;;  %v1615_v24 = vshll.u32 %v4817_v21, 16  ;;  %v4150_v21 = vld [vmem:[#allocation2 + $0xa8] sm:$0xff] }
  0xde   : > { %v1445_v10 = vrot.slane %v1444_v19, 4  ;;  %v1723_v26 = vrot.slane %v1721_v28, 5 }
  0xdf   : > { %v1459_v51 = vrot.slane %v1457_v48, 5  ;;  %v1717_v48 = vrot.slane %v1715_v57, 4 }
  0xe0   : > { %v1450_v63 = vsel %vm4323_vm10, %v1445_v10, %v1449_v30  ;;  %v4139_v30 = vld [vmem:[#allocation2 + $0x24] sm:$0xff]  ;;  %v2934_v10 = vpack.c.b16 %v4861_v18, %v4859_v62 }
  0xe1   : > { %v1460_v54 = vsel %vm4323_vm10, %v1455_v60, %v1459_v51  ;;  %v4868_v34 = vunpack.c.l.b16 %v1450_v63  ;;  %v1718_v45 = vor.u32 %v1717_v48, %v1713_v27  ;;  %v4890_v63 = vsel %vm3318_vm15, %v4139_v30, %v4832_v11  ;;  %v4915_v30 = vld [vmem:[#allocation2 + $0x80] sm:$0x1]  ;;  %v4166_v48 = vld [vmem:[#allocation2 + $0xb4] sm:$0xff] }
  0xe2   : > { %2880 = vrot.lane.b32.xlu1 %v4157_v61, %s4245_s20  ;;  %v1617_v61 = vrot.slane %v1615_v24, 5  ;;  %v4870_v42 = vunpack.c.l.b16 %v1460_v54  ;;  %v4145_v24 = vld [vmem:[#allocation2 + $0x6c] sm:$0xff]  ;;  %v2709_v60 = vpop.permute.xlu1 %2708  ;;  %v1990_v54 = vld [vmem:[#allocation2 + $0x78] sm:$0xf] }
  0xe4   : > { %v1622_v17 = vor.u32 %v1621_v9, %v1617_v61  ;;  %v1922_v9 = vrot.slane %v4828_v43, 5  ;;  %v4167_v43 = vld [vmem:[#allocation2 + $0xc0] sm:$0xff] }
  0xe5   : > { %2878 = vrot.lane.b32.xlu0 %v4156_v7, %s4245_s20  ;;  %2888 = vrot.lane.b32.xlu2 %v4161_v0, %s4245_s20  ;;  %v1612_v7 = vor.u32 %v1611_v49, %v1608_v39  ;;  %v1705_v0 = vshll.u32 %v1389_v32, 16  ;;  %v4142_v32 = vld [vmem:[#allocation2 + $0x48] sm:$0xff] }
  0xe6   : > { %v1623_v16 = vrot.slane %v1622_v17, 4  ;;  %v1805_v39 = vld [vmem:[#allocation2 + $0x6c] sm:$0xe] }
  0xe7   : > { %v1613_v13 = vrot.slane %v1612_v7, 4  ;;  %v1707_v20 = vrot.slane %v1705_v0, 5  ;;  %v3884_v50 = vrot.slane %v1805_v39, 9  ;;  %v1921_v7 = vrot.slane %v1919_v40, 4 }
  0xe8   : > { %v1628_v46 = vsel %vm4323_vm10, %v1623_v16, %v1627_v37  ;;  %v4893_v37 = vsel %vm3318_vm15, %v4142_v32, %v2707_v29  ;;  %v1719_v0 = vrot.slane %v1718_v45, 4  ;;  %v1947_v16 = vrot.slane %v4844_v3, 5 }
  0xe9   : > { %v1618_v23 = vsel %vm4323_vm10, %v1613_v13, %v1617_v61  ;;  %v1708_v19 = vor.u32 %v1707_v20, %v1704_v58  ;;  %v4880_v51 = vunpack.c.l.b16 %v1628_v46  ;;  %v4162_v61 = vld [vmem:[#allocation2 + $0x84] sm:$0xff]  ;;  %v4884_v5 = vsel %vm4653_vm14, %v3884_v50, %v1919_v40  ;;  %v4897_v13 = vld [vmem:[#allocation2 + $0x7c] sm:$0xf] }
  0xea   : > { %2886 = vrot.lane.b32.xlu1 %v4160_v47, %s4245_s20  ;;  %v4875_v47 = vunpack.c.l.b16 %v1618_v23  ;;  %v2935_v58 = vpack.c.b16 %v4870_v42, %v4868_v34  ;;  %v4904_v20 = vsel %vm3318_vm15, %v4143_v35, %v2709_v60  ;;  %v1923_v57 = vsel %vm4653_vm14, %v1921_v7, %v1922_v9  ;;  %v1998_v35 = vld [vmem:[#allocation2 + $0xa8] sm:$0xf]  ;;  %v4934_v7 = vld [vmem:[#allocation2 + $0xb0] sm:$0x1]  ;;  %v4982_v42 = vld [vmem:[#allocation2 + $0x44] sm:$0x1] }
  0xeb   : > { %v1709_v49 = vrot.slane %v1708_v19, 4  ;;  %v1724_v28 = vsel %vm4323_vm10, %v1719_v0, %v1723_v26  ;;  %v2218_v32 = vshll.u32 %v1990_v54, 16  ;;  %v2224_v19 = vshll.u32 %v4897_v13, 16 }
  0xec   : > { %v2942_v59 = vpack.c.b16 %v4880_v51, %v4875_v47  ;;  %v1949_v46 = vrot.slane %v1947_v16, 4  ;;  %v1950_v47 = vrot.slane %v4854_v12, 5  ;;  %v2228_v3 = vshrl.u32 %v4897_v13, 16 }
  0xed   : > { %2884 = vrot.lane.b32.xlu0 %v4159_v55, %s4245_s20  ;;  %2894 = vrot.lane.b32.xlu2 %v4164_v6, %s4245_s20  ;;  %v1809_v55 = vld [vmem:[#allocation2 + $0x9c] sm:$0xe]  ;;  %v2713_v6 = vpop.permute.xlu0 %2712  ;;  %v1714_v11 = vsel %vm4323_vm10, %v1709_v49, %v1713_v27  ;;  %v2215_v27 = vshrl.u32 %v1990_v54, 16  ;;  %v2999_v50 = vunpack.c.l.b16 %v1923_v57  ;;  %v2220_v51 = vrot.slane %v2218_v32, 5  ;;  %v4927_v49 = vld [vmem:[#allocation2 + $0xac] sm:$0xf] }
  0xee   : > { %v4907_v29 = vsel %vm3318_vm15, %v4145_v24, %v2713_v6  ;;  %v3888_v23 = vrot.slane %v1809_v55, 9  ;;  %v4925_v24 = vunpack.c.l.b16 %v1714_v11  ;;  %v4929_v45 = vunpack.c.l.b16 %v1724_v28 }
  0xef   : > { %v2217_v40 = vrot.slane %v2215_v27, 4  ;;  %v2226_v60 = vrot.slane %v2224_v19, 5  ;;  %v2234_v26 = vshll.u32 %v4915_v30, 16  ;;  %v2311_v9 = vshrl.u32 %v1998_v35, 16 }
  0xf0   : > { %v1948_v12 = vsel %vm4653_vm14, %v3888_v23, %v1947_v16  ;;  %v2314_v55 = vshll.u32 %v1998_v35, 16  ;;  %v1951_v0 = vsel %vm4653_vm14, %v1949_v46, %v1950_v47  ;;  %v2320_v54 = vshll.u32 %v4927_v49, 16 }
  0xf1   : > { %v2236_v11 = vrot.slane %v2234_v26, 5  ;;  %v2313_v57 = vrot.slane %v2311_v9, 4  ;;  %v2330_v32 = vshll.u32 %v4934_v7, 16  ;;  %v2946_v19 = vpack.c.b16 %v4929_v45, %v4925_v24 }
  0xf2   : > { %2892 = vrot.lane.b32.xlu1 %v4163_v22, %s4245_s20  ;;  %v2723_v17 = vpop.permute.xlu2 %2722  ;;  %v2998_v22 = vunpack.c.l.b16 %v4884_v5  ;;  %v2221_v5 = vor.u32 %v2220_v51, %v2217_v40  ;;  %v2316_v23 = vrot.slane %v2314_v55, 5  ;;  %v2322_v28 = vrot.slane %v2320_v54, 5 }
  0xf3   : > { %v4920_v39 = vsel %vm3318_vm15, %v4150_v21, %v2723_v17  ;;  %v4165_v21 = vld [vmem:[#allocation2 + $0xa8] sm:$0xff]  ;;  %v2528_v47 = vrot.slane %v4897_v13, 5  ;;  %v3006_v40 = vunpack.c.l.b16 %v1948_v12  ;;  %v3007_v51 = vunpack.c.l.b16 %v1951_v0 }
  0xf4   : > { %v2222_v17 = vrot.slane %v2221_v5, 4  ;;  %v2317_v46 = vor.u32 %v2316_v23, %v2313_v57  ;;  %v2414_v5 = vld [vmem:[#allocation2 + $0x78] sm:$0xe]  ;;  %v2332_v13 = vrot.slane %v2330_v32, 5  ;;  %v2531_v0 = vrot.slane %v4915_v30, 5 }
  0xf5   : > { %2890 = vrot.lane.b32.xlu0 %v4162_v61, %s4245_s20  ;;  %2900 = vrot.lane.b32.xlu2 %v4167_v43, %s4245_s20  ;;  %v2230_v61 = vrot.slane %v2228_v3, 4  ;;  %v2324_v43 = vshrl.u32 %v4927_v49, 16  ;;  %v4944_v3 = vpack.c.b16 %v2999_v50, %v2998_v22  ;;  %v3900_v55 = vrot.slane %v2414_v5, 9 }
  0xf6   : > { %v2227_v22 = vsel %vm4323_vm10, %v2222_v17, %v2226_v60  ;;  %v2318_v50 = vrot.slane %v2317_v46, 4  ;;  %v2530_v12 = vrot.slane %v2528_v47, 4  ;;  %v1373_v17 = vld [vmem:[#allocation2 + $0x3c] sm:$0xf]  ;;  %v2559_v32 = vrot.slane %v4934_v7, 5 }
  0xf7   : > { %v2231_v6 = vor.u32 %v2230_v61, %v2226_v60  ;;  %v2326_v27 = vrot.slane %v2324_v43, 4  ;;  %v4146_v61 = vld [vmem:[#allocation2 + $0x78] sm:$0xff]  ;;  %v2556_v60 = vrot.slane %v4927_v49, 5  ;;  %v4970_v30 = vunpack.c.l.b16 %v2227_v22  ;;  %v1797_v22 = vld [vmem:[#allocation2 + $0xc] sm:$0xe] }
  0xf8   : > { %v2323_v54 = vsel %vm4323_vm10, %v2318_v50, %v2322_v28  ;;  %v1513_v46 = vshll.u32 %v1373_v17, 16 }
  0xf9   : > { %v2232_v16 = vrot.slane %v2231_v6, 4  ;;  %v2327_v26 = vor.u32 %v2326_v27, %v2322_v28  ;;  %v4978_v49 = vunpack.c.l.b16 %v2323_v54  ;;  %v2532_v27 = vsel %vm4653_vm14, %v2530_v12, %v2531_v0 }
  0xfa   : > { %2898 = vrot.lane.b32.xlu1 %v4166_v48, %s4245_s20  ;;  %v2558_v34 = vrot.slane %v2556_v60, 4  ;;  %v1515_v5 = vrot.slane %v1513_v46, 5  ;;  %v3255_v50 = vunpack.c.l.b16 %v2532_v27 }
  0xfb   : > { %v2715_v9 = vpop.permute.xlu1 %2714  ;;  %v2328_v6 = vrot.slane %v2327_v26, 4 }
  0xfc   : > { %v2777_v48 = vpop.permute.xlu2 %2776  ;;  %v4968_v57 = vsel %vm3318_vm15, %v4146_v61, %v2715_v9  ;;  %v2560_v26 = vsel %vm4653_vm14, %v2558_v34, %v2559_v32  ;;  %v1529_v9 = vshll.u32 %v4982_v42, 16 }
  0xfd   : > { %2896 = vrot.lane.b32.xlu0 %v4165_v21, %s4245_s20  ;;  %v4950_v35 = vsel %vm3367_vm0, %v4842_v25, %v2777_v48  ;;  %2966 = vrot.lane.b32.xlu2 %v2942_v59, %s4246_s21  ;;  %v2418_v21 = vld [vmem:[#allocation2 + $0xa8] sm:$0xe]  ;;  %v2237_v25 = vsel %vm4323_vm10, %v2232_v16, %v2236_v11  ;;  %v2529_v59 = vsel %vm4653_vm14, %v3900_v55, %v2528_v47  ;;  %v4974_v16 = vld [vmem:[#allocation2 + $0x40] sm:$0xf]  ;;  %v1510_v48 = vshrl.u32 %v1373_v17, 16 }
  0xfe   : > { %v3904_v43 = vrot.slane %v2418_v21, 9  ;;  %v3026_v11 = vpack.c.b16 %v3007_v51, %v3006_v40  ;;  %v2333_v23 = vsel %vm4323_vm10, %v2328_v6, %v2332_v13  ;;  %v4976_v28 = vunpack.c.l.b16 %v2237_v25  ;;  %v4148_v25 = vld [vmem:[#allocation2 + $0x90] sm:$0xff]  ;;  %v1974_v17 = vld [vmem:[#allocation2 + $0x18] sm:$0xf] }
  0xff   : > { %v4985_v47 = vunpack.c.l.b16 %v2333_v23  ;;  %v1519_v51 = vshll.u32 %v4974_v16, 16  ;;  %v1523_v61 = vshrl.u32 %v4974_v16, 16  ;;  %v1512_v7 = vrot.slane %v1510_v48, 4 }
 0x100   : > { %v2557_v40 = vsel %vm4653_vm14, %v3904_v43, %v2556_v60  ;;  %v3876_v21 = vrot.slane %v1797_v22, 9  ;;  %v3198_v62 = vpack.c.b16 %v4976_v28, %v4970_v30  ;;  %v1863_v6 = vrot.slane %v4782_v36, 5  ;;  %v1801_v60 = vld [vmem:[#allocation2 + $0x3c] sm:$0xe] }
 0x101   : > { %v1521_v13 = vrot.slane %v1519_v51, 5  ;;  %v1525_v55 = vrot.slane %v1523_v61, 4  ;;  %v3262_v18 = vunpack.c.l.b16 %v2557_v40  ;;  %v3263_v0 = vunpack.c.l.b16 %v2560_v26 }
 0x102   : > { %2952 = vrot.lane.b32.xlu1 %v2935_v58, %s4246_s21  ;;  %v3254_v58 = vunpack.c.l.b16 %v2529_v59  ;;  %v1531_v59 = vrot.slane %v1529_v9, 5  ;;  %v1866_v43 = vrot.slane %v4794_v53, 5  ;;  %v1864_v23 = vsel %vm4653_vm14, %v3876_v21, %v1863_v6 }
 0x103   : > { %v1526_v54 = vor.u32 %v1525_v55, %v1521_v13  ;;  %v1865_v36 = vrot.slane %v1863_v6, 4  ;;  %v3202_v28 = vpack.c.b16 %v4985_v47, %v4978_v49  ;;  %v1891_v34 = vrot.slane %v4974_v16, 5  ;;  %v1982_v16 = vld [vmem:[#allocation2 + $0x48] sm:$0xf] }
 0x104   : > { %v5013_v27 = vpack.c.b16 %v3255_v50, %v3254_v58  ;;  %v3880_v48 = vrot.slane %v1801_v60, 9  ;;  %v2023_v46 = vshrl.u32 %v1974_v17, 16  ;;  %v2026_v40 = vshll.u32 %v1974_v17, 16 }
 0x105   : > { %2950 = vrot.lane.b32.xlu0 %v2934_v10, %s4246_s21  ;;  %3054 = vrot.lane.b32.xlu2 %v3026_v11, %s4247_s22  ;;  %v1516_v10 = vor.u32 %v1515_v5, %v1512_v7  ;;  %v1527_v53 = vrot.slane %v1526_v54, 4  ;;  %v3282_v61 = vpack.c.b16 %v3263_v0, %v3262_v18  ;;  %v1867_v58 = vsel %vm4653_vm14, %v1865_v36, %v1866_v43  ;;  %v5025_v7 = vld [vmem:[#allocation2 + $0x20] sm:$0x1]  ;;  %v4180_v5 = vld [vmem:[#allocation2 + $0xa8] sm:$0xff]  ;;  %v4176_v43 = vld [vmem:[#allocation2 + $0x78] sm:$0xff] }
 0x106   : > { %v2982_v26 = vunpack.c.l.b16 %v1864_v23  ;;  %v1893_v22 = vrot.slane %v1891_v34, 4  ;;  %v1894_v50 = vrot.slane %v4982_v42, 5  ;;  %v2028_v21 = vrot.slane %v2026_v40, 5 }
 0x107   : > { %v2783_v12 = vpop.permute.xlu2 %2782  ;;  %v1517_v30 = vrot.slane %v1516_v10, 4  ;;  %v2719_v32 = vpop.permute.xlu0 %2718  ;;  %v1532_v9 = vsel %vm4323_vm10, %v1527_v53, %v1531_v59  ;;  %v2983_v24 = vunpack.c.l.b16 %v1867_v58  ;;  %v1892_v45 = vsel %vm4653_vm14, %v3880_v48, %v1891_v34  ;;  %v5042_v10 = vld [vmem:[#allocation2 + $0x4c] sm:$0xf]  ;;  %v5046_v59 = vld [vmem:[#allocation2 + $0x50] sm:$0x1] }
 0x108   : > { %v5007_v11 = vsel %vm3367_vm0, %v4806_v38, %v2783_v12  ;;  %v5018_v38 = vld [vmem:[#allocation2 + $0x1c] sm:$0xf]  ;;  %v5021_v51 = vsel %vm3318_vm15, %v4148_v25, %v2719_v32  ;;  %v2119_v42 = vshrl.u32 %v1982_v16, 16  ;;  %v5044_v12 = vunpack.c.l.b16 %v1532_v9 }
 0x109   : > { %v2032_v25 = vshll.u32 %v5018_v38, 16  ;;  %v2036_v18 = vshrl.u32 %v5018_v38, 16  ;;  %v1895_v17 = vsel %vm4653_vm14, %v1893_v22, %v1894_v50  ;;  %v2122_v23 = vshll.u32 %v1982_v16, 16  ;;  %v1383_v16 = vld [vmem:[#allocation2 + $0x78] sm:$0xf] }
 0x10a   : > { %3046 = vrot.lane.b32.xlu1 %v4944_v3, %s4247_s22  ;;  %v1522_v3 = vsel %vm4323_vm10, %v1517_v30, %v1521_v13  ;;  %v2025_v13 = vrot.slane %v2023_v46, 4  ;;  %v2121_v30 = vrot.slane %v2119_v42, 4  ;;  %v2128_v32 = vshll.u32 %v5042_v10, 16 }
 0x10b   : > { %v5035_v55 = vunpack.c.l.b16 %v1522_v3  ;;  %v2034_v0 = vrot.slane %v2032_v25, 5  ;;  %v2038_v54 = vrot.slane %v2036_v18, 4  ;;  %v2990_v48 = vunpack.c.l.b16 %v1892_v45  ;;  %v2406_v18 = vld [vmem:[#allocation2 + $0x18] sm:$0xe]  ;;  %v2410_v45 = vld [vmem:[#allocation2 + $0x48] sm:$0xe] }
 0x10c   : > { %v2124_v46 = vrot.slane %v2122_v23, 5  ;;  %v2132_v40 = vshrl.u32 %v5042_v10, 16  ;;  %v2138_v58 = vshll.u32 %v5046_v59, 16  ;;  %v2130_v22 = vrot.slane %v2128_v32, 5 }
 0x10d   : > { %2974 = vrot.lane.b32.xlu0 %v2946_v19, %s4246_s21  ;;  %3222 = vrot.lane.b32.xlu2 %v3198_v62, %s4248_s23  ;;  %v2042_v19 = vshll.u32 %v5025_v7, 16  ;;  %v2029_v62 = vor.u32 %v2028_v21, %v2025_v13  ;;  %v2039_v53 = vor.u32 %v2038_v54, %v2034_v0  ;;  %v2991_v50 = vunpack.c.l.b16 %v1895_v17 }
 0x10e   : > { %v2125_v21 = vor.u32 %v2124_v46, %v2121_v30  ;;  %v2134_v25 = vrot.slane %v2132_v40, 4  ;;  %v3892_v42 = vrot.slane %v2406_v18, 9  ;;  %v3896_v23 = vrot.slane %v2410_v45, 9  ;;  %v5090_v40 = vld [vmem:[#allocation2 + $0x7c] sm:$0xf] }
 0x10f   : > { %v2789_v6 = vpop.permute.xlu2 %2788  ;;  %v2030_v36 = vrot.slane %v2029_v62, 4  ;;  %v2044_v34 = vrot.slane %v2042_v19, 5  ;;  %v2040_v9 = vrot.slane %v2039_v53, 4  ;;  %v4149_v19 = vld [vmem:[#allocation2 + $0x9c] sm:$0xff]  ;;  %v1630_v53 = vshrl.u32 %v1383_v16, 16 }
 0x110   : > { %v5051_v60 = vsel %vm3367_vm0, %v4904_v20, %v2789_v6  ;;  %v2472_v6 = vrot.slane %v5018_v38, 5  ;;  %v2135_v54 = vor.u32 %v2134_v25, %v2130_v22  ;;  %v3018_v46 = vpack.c.b16 %v2991_v50, %v2990_v48 }
 0x111   : > { %v2035_v20 = vsel %vm4323_vm10, %v2030_v36, %v2034_v0  ;;  %v2126_v0 = vrot.slane %v2125_v21, 4  ;;  %v2500_v36 = vrot.slane %v5042_v10, 5  ;;  %v2938_v10 = vpack.c.b16 %v5044_v12, %v5035_v55 }
 0x112   : > { %3150 = vrot.lane.b32.xlu1 %v4180_v5, %s4249_s24  ;;  %v5058_v5 = vpack.c.b16 %v2983_v24, %v2982_v26  ;;  %v5063_v13 = vunpack.c.l.b16 %v2035_v20  ;;  %v2045_v26 = vsel %vm4323_vm10, %v2040_v9, %v2044_v34  ;;  %v2140_v24 = vrot.slane %v2138_v58, 5 }
 0x113   : > { %v5069_v62 = vunpack.c.l.b16 %v2045_v26  ;;  %v2474_v30 = vrot.slane %v2472_v6, 4  ;;  %v2131_v38 = vsel %vm4323_vm10, %v2126_v0, %v2130_v22  ;;  %v2136_v34 = vrot.slane %v2135_v54, 4 }
 0x114   : > { %v2721_v3 = vpop.permute.xlu1 %2720  ;;  %v2502_v9 = vrot.slane %v2500_v36, 4  ;;  %v2503_v22 = vrot.slane %v5046_v59, 5  ;;  %v5103_v12 = vunpack.c.l.b16 %v2131_v38  ;;  %v2501_v50 = vsel %vm4653_vm14, %v3896_v23, %v2500_v36 }
 0x115   : > { %3142 = vrot.lane.b32.xlu0 %v4176_v43, %s4249_s24  ;;  %3310 = vrot.lane.b32.xlu2 %v3282_v61, %s4250_s25  ;;  %v2475_v43 = vrot.slane %v5025_v7, 5  ;;  %v5083_v7 = vsel %vm4653_vm14, %v3892_v42, %v2472_v6  ;;  %v3360_v32 = vsel %vm3318_vm15, %v4149_v19, %v2721_v3  ;;  %v2141_v58 = vsel %vm4323_vm10, %v2136_v34, %v2140_v24  ;;  %v5097_v3 = vld [vmem:[#allocation2 + $0x80] sm:$0x1]  ;;  %v5120_v24 = vld [vmem:[#allocation2 + $0xac] sm:$0xf] }
 0x116   : > { %v3238_v48 = vunpack.c.l.b16 %v5083_v7  ;;  %v2504_v59 = vsel %vm4653_vm14, %v2502_v9, %v2503_v22  ;;  %v1632_v21 = vrot.slane %v1630_v53, 4  ;;  %v1633_v25 = vshll.u32 %v1383_v16, 16  ;;  %v5124_v42 = vld [vmem:[#allocation2 + $0xb0] sm:$0x1] }
 0x117   : > { %v2795_v17 = vpop.permute.xlu2 %2794  ;;  %v2476_v20 = vsel %vm4653_vm14, %v2474_v30, %v2475_v43  ;;  %v5116_v18 = vunpack.c.l.b16 %v2141_v58  ;;  %v1643_v19 = vshrl.u32 %v5090_v40, 16  ;;  %v1649_v26 = vshll.u32 %v5097_v3, 16  ;;  %v1806_v30 = vld [vmem:[#allocation2 + $0x78] sm:$0xe] }
 0x118   : > { %v5077_v61 = vsel %vm3367_vm0, %v4968_v57, %v2795_v17  ;;  %v3239_v45 = vunpack.c.l.b16 %v2476_v20  ;;  %v1635_v47 = vrot.slane %v1633_v25, 5  ;;  %v3246_v0 = vunpack.c.l.b16 %v2501_v50 }
 0x119   : > { %v3247_v54 = vunpack.c.l.b16 %v2504_v59  ;;  %v1645_v43 = vrot.slane %v1643_v19, 4  ;;  %v1651_v17 = vrot.slane %v1649_v26, 5  ;;  %v1735_v7 = vshll.u32 %v5120_v24, 16 }
 0x11a   : > { %3302 = vrot.lane.b32.xlu1 %v5013_v27, %s4250_s25  ;;  %v3190_v27 = vpack.c.b16 %v5069_v62, %v5063_v13  ;;  %v1391_v13 = vld [vmem:[#allocation2 + $0xa8] sm:$0xf]  ;;  %v1636_v36 = vor.u32 %v1635_v47, %v1632_v21  ;;  %v3885_v22 = vrot.slane %v1806_v30, 9  ;;  %v1926_v50 = vrot.slane %v5090_v40, 5 }
 0x11b   : > { %v1726_v16 = vshrl.u32 %v1391_v13, 16  ;;  %v1729_v6 = vshll.u32 %v1391_v13, 16  ;;  %v1737_v13 = vrot.slane %v1735_v7, 5  ;;  %v4172_v21 = vld [vmem:[#allocation2 + $0x48] sm:$0xff]  ;;  %v3194_v25 = vpack.c.b16 %v5116_v18, %v5103_v12 }
 0x11c   : > { %v2775_v57 = vpop.permute.xlu1 %2774  ;;  %v1637_v20 = vrot.slane %v1636_v36, 4 }
 0x11d   : > { %v5101_v55 = vsel %vm3367_vm0, %v4813_v14, %v2775_v57  ;;  %3230 = vrot.lane.b32.xlu0 %v3202_v28, %s4248_s23  ;;  %v1639_v14 = vshll.u32 %v5090_v40, 16  ;;  %3038 = vrot.lane.b32.xlu2 %v3018_v46, %s4247_s22  ;;  %v1728_v53 = vrot.slane %v1726_v16, 4  ;;  %v1731_v38 = vrot.slane %v1729_v6, 5  ;;  %v1810_v40 = vld [vmem:[#allocation2 + $0xa8] sm:$0xe] }
 0x11e   : > { %v1739_v46 = vshrl.u32 %v5120_v24, 16  ;;  %v1745_v57 = vshll.u32 %v5124_v42, 16  ;;  %v1927_v16 = vsel %vm4653_vm14, %v3885_v22, %v1926_v50  ;;  %v1928_v6 = vrot.slane %v1926_v50, 4  ;;  %v5182_v50 = vld [vmem:[#allocation2 + $0x8c] sm:$0x1] }
 0x11f   : > { %v5122_v49 = vpop.permute.xlu0 %2724  ;;  %v1641_v28 = vrot.slane %v1639_v14, 5  ;;  %v2801_v62 = vpop.permute.xlu2 %2800  ;;  %v1732_v9 = vor.u32 %v1731_v38, %v1728_v53  ;;  %v5142_v14 = vpack.c.b16 %v3239_v45, %v3238_v48  ;;  %v1929_v45 = vrot.slane %v5097_v3, 5 }
 0x120   : > { %v5129_v23 = vsel %vm3367_vm0, %v3360_v32, %v2801_v62  ;;  %v1741_v59 = vrot.slane %v1739_v46, 4  ;;  %v1747_v47 = vrot.slane %v1745_v57, 5  ;;  %v3274_v62 = vpack.c.b16 %v3247_v54, %v3246_v0  ;;  %v5172_v57 = vld [vmem:[#allocation2 + $0x88] sm:$0xf] }
 0x121   : > { %v1646_v34 = vor.u32 %v1645_v43, %v1641_v28  ;;  %v1642_v19 = vsel %vm4323_vm10, %v1637_v20, %v1641_v28  ;;  %v1733_v26 = vrot.slane %v1732_v9, 4  ;;  %v1992_v28 = vld [vmem:[#allocation2 + $0x84] sm:$0xf]  ;;  %v3889_v38 = vrot.slane %v1810_v40, 9 }
 0x122   : > { %3030 = vrot.lane.b32.xlu1 %v5058_v5, %s4247_s22  ;;  %v5158_v36 = vunpack.c.l.b16 %v1642_v19  ;;  %v1930_v3 = vsel %vm4653_vm14, %v1928_v6, %v1929_v45  ;;  %v3000_v54 = vunpack.c.l.b16 %v1927_v16  ;;  %v2248_v16 = vshll.u32 %v5172_v57, 16 }
 0x123   : > { %v1647_v32 = vrot.slane %v1646_v34, 4  ;;  %v1738_v48 = vsel %vm4323_vm10, %v1733_v26, %v1737_v13  ;;  %v4168_v34 = vld [vmem:[#allocation2 + $0x18] sm:$0xff]  ;;  %v3001_v46 = vunpack.c.l.b16 %v1930_v3  ;;  %v2252_v6 = vshrl.u32 %v5172_v57, 16 }
 0x124   : > { %v2781_v58 = vpop.permute.xlu1 %2780  ;;  %v5170_v7 = vunpack.c.l.b16 %v1738_v48  ;;  %v5189_v26 = vld [vmem:[#allocation2 + $0xb8] sm:$0xf]  ;;  %v2250_v45 = vrot.slane %v2248_v16, 5 }
 0x125   : > { %v5137_v5 = vsel %vm3367_vm0, %v4890_v63, %v2781_v58  ;;  %2958 = vrot.lane.b32.xlu0 %v2938_v10, %s4246_s21  ;;  %3206 = vrot.lane.b32.xlu2 %v3190_v27, %s4248_s23  ;;  %v1742_v63 = vor.u32 %v1741_v59, %v1737_v13  ;;  %v1652_v43 = vsel %vm4323_vm10, %v1647_v32, %v1651_v17  ;;  %v1954_v17 = vrot.slane %v5120_v24, 5  ;;  %v2000_v32 = vld [vmem:[#allocation2 + $0xb4] sm:$0xf] }
 0x126   : > { %v2239_v58 = vshrl.u32 %v1992_v28, 16  ;;  %v5174_v9 = vunpack.c.l.b16 %v1652_v43  ;;  %v2242_v24 = vshll.u32 %v1992_v28, 16  ;;  %v3023_v40 = vpack.c.b16 %v3001_v46, %v3000_v54  ;;  %v5199_v28 = vld [vmem:[#allocation2 + $0xbc] sm:$0x1] }
 0x127   : > { %v2779_v10 = vpop.permute.xlu0 %2778  ;;  %v2871_v30 = vpop.permute.xlu2 %2870  ;;  %v1743_v53 = vrot.slane %v1742_v63, 4  ;;  %v5180_v22 = vsel %vm4653_vm14, %v3889_v38, %v1954_v17  ;;  %v1956_v59 = vrot.slane %v1954_v17, 4  ;;  %v2254_v3 = vrot.slane %v2252_v6, 4  ;;  %v2415_v17 = vld [vmem:[#allocation2 + $0x84] sm:$0xe] }
 0x128   : > { %v5156_v27 = vsel %vm3367_vm0, %v4839_v52, %v2779_v10  ;;  %v5163_v0 = vsel %vm3400_vm1, %v5101_v55, %v2871_v30  ;;  %v2241_v19 = vrot.slane %v2239_v58, 4  ;;  %v3008_v63 = vunpack.c.l.b16 %v5180_v22 }
 0x129   : > { %v1748_v52 = vsel %vm4323_vm10, %v1743_v53, %v1747_v47  ;;  %v2244_v47 = vrot.slane %v2242_v24, 5  ;;  %v2335_v10 = vshrl.u32 %v2000_v32, 16  ;;  %v2338_v30 = vshll.u32 %v2000_v32, 16  ;;  %v4151_v32 = vld [vmem:[#allocation2 + $0xb4] sm:$0xff] }
 0x12a   : > { %3134 = vrot.lane.b32.xlu1 %v4172_v21, %s4249_s24  ;;  %v5176_v55 = vunpack.c.l.b16 %v1748_v52  ;;  %v1957_v21 = vrot.slane %v5124_v42, 5  ;;  %v2258_v42 = vshll.u32 %v5182_v50, 16  ;;  %v2344_v53 = vshll.u32 %v5189_v26, 16 }
 0x12b   : > { %v2245_v48 = vor.u32 %v2244_v47, %v2241_v19  ;;  %v2337_v46 = vrot.slane %v2335_v10, 4  ;;  %v2340_v58 = vrot.slane %v2338_v30, 5  ;;  %v2354_v24 = vshll.u32 %v5199_v28, 16 }
 0x12c   : > { %v2787_v20 = vpop.permute.xlu1 %2786  ;;  %v2260_v54 = vrot.slane %v2258_v42, 5  ;;  %v2535_v47 = vrot.slane %v5172_v57, 5  ;;  %v5237_v12 = vsel %vm3318_vm15, %v4151_v32, %v5122_v49 }
 0x12d   : > { %v5186_v13 = vsel %vm3367_vm0, %v4893_v37, %v2787_v20  ;;  %3126 = vrot.lane.b32.xlu0 %v4168_v34, %s4249_s24  ;;  %3294 = vrot.lane.b32.xlu2 %v3274_v62, %s4250_s25  ;;  %v2947_v37 = vpack.c.b16 %v5176_v55, %v5170_v7  ;;  %v1958_v34 = vsel %vm4653_vm14, %v1956_v59, %v1957_v21  ;;  %v2246_v7 = vrot.slane %v2245_v48, 4 }
 0x12e   : > { %v2255_v20 = vor.u32 %v2254_v3, %v2250_v45  ;;  %v2348_v55 = vshrl.u32 %v5189_v26, 16  ;;  %v2341_v19 = vor.u32 %v2340_v58, %v2337_v46  ;;  %v3009_v16 = vunpack.c.l.b16 %v1958_v34 }
 0x12f   : > { %v2785_v43 = vpop.permute.xlu0 %2784  ;;  %v2877_v62 = vpop.permute.xlu2 %2876  ;;  %v2251_v21 = vsel %vm4323_vm10, %v2246_v7, %v2250_v45  ;;  %v2356_v48 = vrot.slane %v2354_v24, 5  ;;  %v2537_v45 = vrot.slane %v2535_v47, 4  ;;  %v2563_v34 = vrot.slane %v5189_v26, 5  ;;  %v1375_v7 = vld [vmem:[#allocation2 + $0x48] sm:$0xf] }
 0x130   : > { %v5204_v38 = vsel %vm3367_vm0, %v4809_v8, %v2785_v43  ;;  %v5212_v52 = vsel %vm3400_vm1, %v5137_v5, %v2877_v62  ;;  %v2346_v8 = vrot.slane %v2344_v53, 5  ;;  %v2256_v6 = vrot.slane %v2255_v20, 4  ;;  %v2419_v62 = vld [vmem:[#allocation2 + $0xb4] sm:$0xe]  ;;  %v5267_v24 = vld [vmem:[#allocation2 + $0x50] sm:$0x1] }
 0x131   : > { %v2350_v42 = vrot.slane %v2348_v55, 4  ;;  %v5227_v10 = vunpack.c.l.b16 %v2251_v21  ;;  %v2342_v43 = vrot.slane %v2341_v19, 4  ;;  %v2538_v53 = vrot.slane %v5182_v50, 5 }
 0x132   : > { %3286 = vrot.lane.b32.xlu1 %v5142_v14, %s4250_s25  ;;  %v3901_v14 = vrot.slane %v2415_v17, 9  ;;  %v2261_v57 = vsel %vm4323_vm10, %v2256_v6, %v2260_v54  ;;  %v2943_v50 = vpack.c.b16 %v5174_v9, %v5158_v36  ;;  %v3905_v20 = vrot.slane %v2419_v62, 9  ;;  %v4181_v9 = vld [vmem:[#allocation2 + $0xb4] sm:$0xff]  ;;  %v4177_v6 = vld [vmem:[#allocation2 + $0x84] sm:$0xff] }
 0x133   : > { %v2539_v49 = vsel %vm4653_vm14, %v2537_v45, %v2538_v53  ;;  %v3027_v36 = vpack.c.b16 %v3009_v16, %v3008_v63  ;;  %v2565_v32 = vrot.slane %v2563_v34, 4  ;;  %v1534_v21 = vshrl.u32 %v1375_v7, 16 }
 0x134   : > { %v2793_v59 = vpop.permute.xlu1 %2792  ;;  %v2536_v30 = vsel %vm4653_vm14, %v3901_v14, %v2535_v47  ;;  %v3257_v58 = vunpack.c.l.b16 %v2539_v49  ;;  %v1537_v19 = vshll.u32 %v1375_v7, 16  ;;  %v1798_v14 = vld [vmem:[#allocation2 + $0x18] sm:$0xe] }
 0x135   : > { %v5221_v5 = vsel %vm3367_vm0, %v4907_v29, %v2793_v59  ;;  %3214 = vrot.lane.b32.xlu0 %v3194_v25, %s4248_s23  ;;  %3048 = vrot.lane.b32.xlu2 %v3023_v40, %s4247_s22  ;;  %v2351_v29 = vor.u32 %v2350_v42, %v2346_v8  ;;  %v5239_v25 = vunpack.c.l.b16 %v2261_v57  ;;  %v2347_v40 = vsel %vm4323_vm10, %v2342_v43, %v2346_v8 }
 0x136   : > { %v3256_v26 = vunpack.c.l.b16 %v2536_v30  ;;  %v2566_v59 = vrot.slane %v5199_v28, 5  ;;  %v5281_v28 = vsel %vm4653_vm14, %v3905_v20, %v2563_v34  ;;  %v1536_v43 = vrot.slane %v1534_v21, 4 }
 0x137   : > { %v2791_v18 = vpop.permute.xlu0 %2790  ;;  %v2883_v54 = vpop.permute.xlu2 %2882  ;;  %v2352_v17 = vrot.slane %v2351_v29, 4  ;;  %v3199_v8 = vpack.c.b16 %v5239_v25, %v5227_v10  ;;  %v1553_v57 = vshll.u32 %v5267_v24, 16  ;;  %v3877_v29 = vrot.slane %v1798_v14, 9 }
 0x138   : > { %v5246_v3 = vsel %vm3367_vm0, %v4821_v15, %v2791_v18  ;;  %v5255_v46 = vsel %vm3400_vm1, %v5186_v13, %v2883_v54  ;;  %v5257_v15 = vld [vmem:[#allocation2 + $0x4c] sm:$0xf]  ;;  %v3279_v42 = vpack.c.b16 %v3257_v58, %v3256_v26  ;;  %v5287_v53 = vsel %vm4653_vm14, %v2565_v32, %v2566_v59  ;;  %v4233_v18 = vld [vmem:[#allocation2 + $0x1c] sm:$0xf]  ;;  %v1976_v58 = vld [vmem:[#allocation2 + $0x24] sm:$0xf] }
 0x139   : > { %v2357_v55 = vsel %vm4323_vm10, %v2352_v17, %v2356_v48  ;;  %v1543_v47 = vshll.u32 %v5257_v15, 16  ;;  %v1547_v16 = vshrl.u32 %v5257_v15, 16  ;;  %v1539_v48 = vrot.slane %v1537_v19, 5 }
 0x13a   : > { %2976 = vrot.lane.b32.xlu1 %v2947_v37, %s4246_s21  ;;  %v5265_v37 = vunpack.c.l.b16 %v2347_v40  ;;  %v5274_v63 = vunpack.c.l.b16 %v2357_v55  ;;  %v1870_v40 = vrot.slane %v4233_v18, 5  ;;  %v1873_v34 = vrot.slane %v4826_v41, 5 }
 0x13b   : > { %v1549_v45 = vrot.slane %v1547_v16, 4  ;;  %v1540_v62 = vor.u32 %v1539_v48, %v1536_v43  ;;  %v1555_v26 = vrot.slane %v1553_v57, 5  ;;  %v1898_v32 = vrot.slane %v5257_v15, 5 }
 0x13c   : > { %v2799_v13 = vpop.permute.xlu1 %2798  ;;  %v3203_v49 = vpack.c.b16 %v5274_v63, %v5265_v37  ;;  %v1871_v41 = vsel %vm4653_vm14, %v3877_v29, %v1870_v40  ;;  %v1872_v55 = vrot.slane %v1870_v40, 4  ;;  %v1901_v37 = vrot.slane %v5267_v24, 5 }
 0x13d   : > { %v5272_v22 = vsel %vm3367_vm0, %v5021_v51, %v2799_v13  ;;  %2968 = vrot.lane.b32.xlu0 %v2943_v50, %s4246_s21  ;;  %3152 = vrot.lane.b32.xlu2 %v4181_v9, %s4249_s24  ;;  %v1545_v51 = vrot.slane %v1543_v47, 5  ;;  %v1802_v50 = vld [vmem:[#allocation2 + $0x48] sm:$0xe]  ;;  %v1541_v9 = vrot.slane %v1540_v62, 4  ;;  %v2047_v14 = vshrl.u32 %v1976_v58, 16 }
 0x13e   : > { %v3881_v13 = vrot.slane %v1802_v50, 9  ;;  %v1874_v19 = vsel %vm4653_vm14, %v1872_v55, %v1873_v34  ;;  %v2050_v63 = vshll.u32 %v1976_v58, 16  ;;  %v2984_v16 = vunpack.c.l.b16 %v1871_v41  ;;  %v5340_v58 = vld [vmem:[#allocation2 + $0x58] sm:$0xf] }
 0x13f   : > { %v2797_v30 = vpop.permute.xlu0 %2796  ;;  %v2889_v17 = vpop.permute.xlu2 %2888  ;;  %v1550_v7 = vor.u32 %v1549_v45, %v1545_v51  ;;  %v1546_v21 = vsel %vm4323_vm10, %v1541_v9, %v1545_v51  ;;  %v2985_v24 = vunpack.c.l.b16 %v1874_v19  ;;  %v1900_v51 = vrot.slane %v1898_v32, 4  ;;  %v5342_v9 = vld [vmem:[#allocation2 + $0x5c] sm:$0x1] }
 0x140   : > { %v5292_v54 = vsel %vm3367_vm0, %v4824_v33, %v2797_v30  ;;  %v5299_v20 = vsel %vm3400_vm1, %v5221_v5, %v2889_v17  ;;  %v5309_v5 = vld [vmem:[#allocation2 + $0x28] sm:$0xf]  ;;  %v5320_v43 = vunpack.c.l.b16 %v1546_v21  ;;  %v2049_v45 = vrot.slane %v2047_v14, 4 }
 0x141   : > { %v1551_v33 = vrot.slane %v1550_v7, 4  ;;  %v5328_v57 = vsel %vm4653_vm14, %v3881_v13, %v1898_v32  ;;  %v2052_v29 = vrot.slane %v2050_v63, 5  ;;  %v2056_v30 = vshll.u32 %v5309_v5, 16 }
 0x142   : > { %3144 = vrot.lane.b32.xlu1 %v4177_v6, %s4249_s24  ;;  %v5317_v6 = vld [vmem:[#allocation2 + $0x2c] sm:$0x1]  ;;  %v1902_v18 = vsel %vm4653_vm14, %v1900_v51, %v1901_v37  ;;  %v2060_v40 = vshrl.u32 %v5309_v5, 16  ;;  %v3015_v17 = vpack.c.b16 %v2985_v24, %v2984_v16  ;;  %v2992_v41 = vunpack.c.l.b16 %v5328_v57 }
 0x143   : > { %v1556_v15 = vsel %vm4323_vm10, %v1551_v33, %v1555_v26  ;;  %v2066_v34 = vshll.u32 %v5317_v6, 16  ;;  %v2053_v7 = vor.u32 %v2052_v29, %v2049_v45  ;;  %v2058_v26 = vrot.slane %v2056_v30, 5 }
 0x144   : > { %v2805_v59 = vpop.permute.xlu1 %2804  ;;  %v5322_v48 = vunpack.c.l.b16 %v1556_v15  ;;  %v2993_v55 = vunpack.c.l.b16 %v1902_v18  ;;  %v2062_v33 = vrot.slane %v2060_v40, 4  ;;  %v2152_v19 = vshll.u32 %v5340_v58, 16 }
 0x145   : > { %v5313_v47 = vsel %vm3367_vm0, %v5237_v12, %v2805_v59  ;;  %3056 = vrot.lane.b32.xlu0 %v3027_v36, %s4247_s22  ;;  %3304 = vrot.lane.b32.xlu2 %v3279_v42, %s4250_s25  ;;  %v3264_v12 = vunpack.c.l.b16 %v5281_v28  ;;  %v3265_v36 = vunpack.c.l.b16 %v5287_v53  ;;  %v1984_v42 = vld [vmem:[#allocation2 + $0x54] sm:$0xf]  ;;  %v2054_v13 = vrot.slane %v2053_v7, 4 }
 0x146   : > { %v2939_v53 = vpack.c.b16 %v5322_v48, %v5320_v43  ;;  %v2143_v32 = vshrl.u32 %v1984_v42, 16  ;;  %v2146_v37 = vshll.u32 %v1984_v42, 16  ;;  %v2063_v21 = vor.u32 %v2062_v33, %v2058_v26  ;;  %v2411_v48 = vld [vmem:[#allocation2 + $0x54] sm:$0xe] }
 0x147   : > { %v2803_v62 = vpop.permute.xlu0 %2802  ;;  %v2895_v50 = vpop.permute.xlu2 %2894  ;;  %v2156_v14 = vshrl.u32 %v5340_v58, 16  ;;  %v2162_v63 = vshll.u32 %v5342_v9, 16  ;;  %v2059_v16 = vsel %vm4323_vm10, %v2054_v13, %v2058_v26  ;;  %v2154_v57 = vrot.slane %v2152_v19, 5 }
 0x148   : > { %v5338_v28 = vsel %vm3367_vm0, %v4920_v39, %v2803_v62  ;;  %v2068_v39 = vrot.slane %v2066_v34, 5  ;;  %v2145_v24 = vrot.slane %v2143_v32, 4  ;;  %v2148_v43 = vrot.slane %v2146_v37, 5 }
 0x149   : > { %v2064_v51 = vrot.slane %v2063_v21, 4  ;;  %v5361_v45 = vunpack.c.l.b16 %v2059_v16  ;;  %v2158_v29 = vrot.slane %v2156_v14, 4  ;;  %v2164_v30 = vrot.slane %v2162_v63, 5  ;;  %v4169_v16 = vld [vmem:[#allocation2 + $0x24] sm:$0xff] }
 0x14a   : > { %3232 = vrot.lane.b32.xlu1 %v3203_v49, %s4248_s23  ;;  %v2407_v49 = vld [vmem:[#allocation2 + $0x24] sm:$0xe]  ;;  %v2479_v18 = vrot.slane %v5309_v5, 5  ;;  %v2482_v10 = vrot.slane %v5317_v6, 5  ;;  %v3897_v25 = vrot.slane %v2411_v48, 9  ;;  %v3283_v13 = vpack.c.b16 %v3265_v36, %v3264_v12 }
 0x14b   : > { %v3893_v62 = vrot.slane %v2407_v49, 9  ;;  %v2069_v34 = vsel %vm4323_vm10, %v2064_v51, %v2068_v39  ;;  %v2159_v42 = vor.u32 %v2158_v29, %v2154_v57  ;;  %v1385_v5 = vld [vmem:[#allocation2 + $0x84] sm:$0xf]  ;;  %v3019_v37 = vpack.c.b16 %v2993_v55, %v2992_v41  ;;  %v5404_v55 = vld [vmem:[#allocation2 + $0x8c] sm:$0x1] }
 0x14c   : > { %v2875_v59 = vpop.permute.xlu1 %2874  ;;  %v5372_v26 = vunpack.c.l.b16 %v2069_v34  ;;  %v2481_v32 = vrot.slane %v2479_v18, 4  ;;  %v2507_v19 = vrot.slane %v5340_v58, 5  ;;  %v1654_v63 = vshrl.u32 %v1385_v5, 16  ;;  %v1393_v49 = vld [vmem:[#allocation2 + $0xb4] sm:$0xf] }
 0x14d   : > { %v5353_v15 = vsel %vm3400_vm1, %v5156_v27, %v2875_v59  ;;  %3224 = vrot.lane.b32.xlu0 %v3199_v8, %s4248_s23  ;;  %3032 = vrot.lane.b32.xlu2 %v3015_v17, %s4247_s22  ;;  %v2149_v27 = vor.u32 %v2148_v43, %v2145_v24  ;;  %v2480_v33 = vsel %vm4653_vm14, %v3893_v62, %v2479_v18  ;;  %v2160_v6 = vrot.slane %v2159_v42, 4  ;;  %v4173_v59 = vld [vmem:[#allocation2 + $0x54] sm:$0xff] }
 0x14e   : > { %v3240_v21 = vunpack.c.l.b16 %v2480_v33  ;;  %v5402_v41 = vsel %vm4653_vm14, %v3897_v25, %v2507_v19  ;;  %v2509_v24 = vrot.slane %v2507_v19, 4  ;;  %v2510_v43 = vrot.slane %v5342_v9, 5  ;;  %v5413_v34 = vld [vmem:[#allocation2 + $0xb8] sm:$0xf]  ;;  %v5421_v33 = vld [vmem:[#allocation2 + $0xbc] sm:$0x1] }
 0x14f   : > { %v2873_v40 = vpop.permute.xlu0 %2872  ;;  %v2901_v7 = vpop.permute.xlu2 %2900  ;;  %v2150_v17 = vrot.slane %v2149_v27, 4  ;;  %v2165_v36 = vsel %vm4323_vm10, %v2160_v6, %v2164_v30  ;;  %v1656_v48 = vrot.slane %v1654_v63, 4  ;;  %v3248_v62 = vunpack.c.l.b16 %v5402_v41 }
 0x150   : > { %v5370_v8 = vsel %vm3400_vm1, %v4950_v35, %v2873_v40  ;;  %v5379_v39 = vsel %vm3400_vm1, %v5313_v47, %v2901_v7  ;;  %v5383_v35 = vsel %vm3400_vm1, %v5272_v22, %v2895_v50  ;;  %v2483_v47 = vsel %vm4653_vm14, %v2481_v32, %v2482_v10 }
 0x151   : > { %v2155_v12 = vsel %vm4323_vm10, %v2150_v17, %v2154_v57  ;;  %v3191_v50 = vpack.c.b16 %v5372_v26, %v5361_v45  ;;  %v3241_v58 = vunpack.c.l.b16 %v2483_v47  ;;  %v3169_v57 = vunpack.c.l.b16 %v2165_v36 }
 0x152   : > { %2960 = vrot.lane.b32.xlu1 %v2939_v53, %s4246_s21  ;;  %v5392_v53 = vld [vmem:[#allocation2 + $0x88] sm:$0xf]  ;;  %v3168_v51 = vunpack.c.l.b16 %v2155_v12  ;;  %v1673_v40 = vshll.u32 %v5404_v55, 16  ;;  %v1750_v42 = vshrl.u32 %v1393_v49, 16  ;;  %v1753_v32 = vshll.u32 %v1393_v49, 16 }
 0x153   : > { %v1663_v29 = vshll.u32 %v5392_v53, 16  ;;  %v1667_v27 = vshrl.u32 %v5392_v53, 16  ;;  %v3271_v25 = vpack.c.b16 %v3241_v58, %v3240_v21  ;;  %v1763_v12 = vshrl.u32 %v5413_v34, 16 }
 0x154   : > { %v2881_v14 = vpop.permute.xlu1 %2880  ;;  %v1752_v6 = vrot.slane %v1750_v42, 4  ;;  %v3195_v36 = vpack.c.b16 %v3169_v57, %v3168_v51  ;;  %v1755_v63 = vrot.slane %v1753_v32, 5  ;;  %v1769_v58 = vshll.u32 %v5421_v33, 16 }
 0x155   : > { %v5396_v22 = vsel %vm3400_vm1, %v5204_v38, %v2881_v14  ;;  %3312 = vrot.lane.b32.xlu0 %v3283_v13, %s4250_s25  ;;  %v1657_v38 = vshll.u32 %v1385_v5, 16  ;;  %3136 = vrot.lane.b32.xlu2 %v4173_v59, %s4249_s24  ;;  %v1665_v7 = vrot.slane %v1663_v29, 5  ;;  %v1669_v17 = vrot.slane %v1667_v27, 4  ;;  %v1807_v59 = vld [vmem:[#allocation2 + $0x84] sm:$0xe] }
 0x156   : > { %v2511_v5 = vsel %vm4653_vm14, %v2509_v24, %v2510_v43  ;;  %v1675_v14 = vrot.slane %v1673_v40, 5  ;;  %v1765_v24 = vrot.slane %v1763_v12, 4  ;;  %v3886_v43 = vrot.slane %v1807_v59, 9 }
 0x157   : > { %v2879_v30 = vpop.permute.xlu0 %2878  ;;  %v1659_v18 = vrot.slane %v1657_v38, 5  ;;  %v5419_v10 = vpop.permute.xlu2 %2966  ;;  %v1670_v19 = vor.u32 %v1669_v17, %v1665_v7  ;;  %v3249_v49 = vunpack.c.l.b16 %v2511_v5  ;;  %v1756_v29 = vor.u32 %v1755_v63, %v1752_v6 }
 0x158   : > { %v5417_v9 = vsel %vm3400_vm1, %v5007_v11, %v2879_v30  ;;  %v1759_v11 = vshll.u32 %v5413_v34, 16  ;;  %v1771_v27 = vrot.slane %v1769_v58, 5 }
 0x159   : > { %v1660_v13 = vor.u32 %v1659_v18, %v1656_v48  ;;  %v1671_v41 = vrot.slane %v1670_v19, 4  ;;  %v1811_v48 = vld [vmem:[#allocation2 + $0xb4] sm:$0xe]  ;;  %v1933_v18 = vrot.slane %v5392_v53, 5  ;;  %v1757_v17 = vrot.slane %v1756_v29, 4 }
 0x15a   : > { %3128 = vrot.lane.b32.xlu1 %v4169_v16, %s4249_s24  ;;  %v1761_v16 = vrot.slane %v1759_v11, 5  ;;  %v3890_v5 = vrot.slane %v1811_v48, 9  ;;  %v5450_v53 = vpack.c.b16 %v3249_v49, %v3248_v62  ;;  %v1961_v19 = vrot.slane %v5413_v34, 5 }
 0x15b   : > { %v1661_v47 = vrot.slane %v1660_v13, 4  ;;  %v1676_v51 = vsel %vm4323_vm10, %v1671_v41, %v1675_v14  ;;  %v5447_v6 = vsel %vm4653_vm14, %v3886_v43, %v1933_v18  ;;  %v1935_v32 = vrot.slane %v1933_v18, 4 }
 0x15c   : > { %v5428_v21 = vpop.permute.xlu1 %2886  ;;  %v1766_v30 = vor.u32 %v1765_v24, %v1761_v16  ;;  %v2923_v42 = vunpack.c.l.b16 %v1676_v51  ;;  %v1964_v62 = vrot.slane %v5421_v33, 5  ;;  %v3002_v58 = vunpack.c.l.b16 %v5447_v6  ;;  %v280_v33 = vld [vmem:[#allocation2 + $0xc8] sm:$0x1] }
 0x15d   : > { %3040 = vrot.lane.b32.xlu0 %v3019_v37, %s4247_s22  ;;  %v1666_v38 = vsel %vm4323_vm10, %v1661_v47, %v1665_v7  ;;  %3288 = vrot.lane.b32.xlu2 %v3271_v25, %s4250_s25  ;;  %v1936_v37 = vrot.slane %v5404_v55, 5  ;;  %v1762_v55 = vsel %vm4323_vm10, %v1757_v17, %v1761_v16  ;;  %v1962_v34 = vsel %vm4653_vm14, %v3890_v5, %v1961_v19  ;;  %v1995_v16 = vld [vmem:[#allocation2 + $0x94] sm:$0xf] }
 0x15e   : > { %v2922_v57 = vunpack.c.l.b16 %v1666_v38  ;;  %v1767_v25 = vrot.slane %v1766_v30, 4  ;;  %v2930_v11 = vunpack.c.l.b16 %v1762_v55  ;;  %v1963_v41 = vrot.slane %v1961_v19, 4  ;;  %v5473_v38 = vld [vmem:[#allocation2 + $0x98] sm:$0x1] }
 0x15f   : > { %v2885_v40 = vpop.permute.xlu0 %2884  ;;  %v5443_v13 = vpop.permute.xlu2 %3054  ;;  %v5462_v12 = vsel %vm4653_vm14, %v1935_v32, %v1936_v37  ;;  %v3010_v48 = vunpack.c.l.b16 %v1962_v34  ;;  %v2272_v18 = vshll.u32 %v1995_v16, 16  ;;  %v2276_v37 = vshrl.u32 %v1995_v16, 16 }
 0x160   : > { %v5441_v7 = vsel %vm3400_vm1, %v5051_v60, %v2885_v40  ;;  %v2944_v59 = vpack.c.b16 %v2923_v42, %v2922_v57  ;;  %v3606_v60 = vld [vmem:[%s6053_s1 + $0x20] sm:$0xf]  ;;  %v1772_v14 = vsel %vm4323_vm10, %v1767_v25, %v1771_v27  ;;  %v3003_v43 = vunpack.c.l.b16 %v5462_v12 }
 0x161   : > { %v2931_v63 = vunpack.c.l.b16 %v1772_v14  ;;  %v3628_v49 = vunpack.c.l.b16 %v3606_v60  ;;  %v1965_v27 = vsel %vm4653_vm14, %v1963_v41, %v1964_v62  ;;  %v2002_v40 = vld [vmem:[#allocation2 + $0xc0] sm:$0xf]  ;;  %v2282_v45 = vshll.u32 %v5473_v38, 16  ;;  %v2416_v60 = vld [vmem:[#allocation2 + $0x90] sm:$0xe] }
 0x162   : > { %3216 = vrot.lane.b32.xlu1 %v3195_v36, %s4248_s23  ;;  %v1994_v36 = vld [vmem:[#allocation2 + $0x90] sm:$0xf]  ;;  %v281_v26 = vsel %vm4289_vm5, 0, %v280_v33  ;;  %v2274_v14 = vrot.slane %v2272_v18, 5  ;;  %v3902_v33 = vrot.slane %v2416_v60, 9  ;;  %vm3499_vm5 = vcmask 392192  }
 0x163   : > { %v2948_v29 = vpack.c.b16 %v2931_v63, %v2930_v11  ;;  %v2263_v51 = vshrl.u32 %v1994_v36, 16  ;;  %v3633_v57 = vpack.c.b16 %v3628_v49, %v3628_v49  ;;  %v2266_v30 = vshll.u32 %v1994_v36, 16  ;;  %282 = vst [vmem:[#allocation2 + $0xc8] sm:$0x1] %v281_v26 }
 0x164   : > { %v2893_v47 = vpop.permute.xlu1 %2892  ;;  %v2278_v11 = vrot.slane %v2276_v37, 4  ;;  %v2284_v62 = vrot.slane %v2282_v45, 5  ;;  %v2420_v45 = vld [vmem:[#allocation2 + $0xc0] sm:$0xe] }
 0x165   : > { %v5470_v24 = vsel %vm3400_vm1, %v5292_v54, %v2893_v47  ;;  %3208 = vrot.lane.b32.xlu0 %v3191_v50, %s4248_s23  ;;  %v3011_v54 = vunpack.c.l.b16 %v1965_v27  ;;  %2978 = vrot.lane.b32.xlu2 %v2948_v29, %s4246_s21  ;;  %v2265_v17 = vrot.slane %v2263_v51, 4  ;;  %v5485_v50 = vld [vmem:[#allocation2 + $0xc4] sm:$0xf]  ;;  %v3673_v55 = vsel %vm3671_vm2, %v3633_v57, 0 }
 0x166   : > { %v2268_v19 = vrot.slane %v2266_v30, 5  ;;  %4190 = vmatpush.bf16.msra.mxu3 %v3673_v55  ;;  %v2362_v47 = vshll.u32 %v2002_v40, 16  ;;  %v2368_v63 = vshll.u32 %v5485_v50, 16  ;;  %v2372_v34 = vshrl.u32 %v5485_v50, 16  ;;  %4189 = vmatpush.bf16.msra.mxu2 %v3673_v55 }
 0x167   : > { %v2891_v42 = vpop.permute.xlu0 %2890  ;;  %v5491_v25 = vpop.permute.xlu2 %3222  ;;  %v3028_v32 = vpack.c.b16 %v3011_v54, %v3010_v48  ;;  %4188 = vmatpush.bf16.msra.mxu1 %v3673_v55  ;;  %v4178_v48 = vld [vmem:[#allocation2 + $0x90] sm:$0xff]  ;;  %v2542_v29 = vrot.slane %v1995_v16, 5  ;;  %3678 = vmatpush.bf16.msra.mxu0 %v3673_v55  ;;  %v3906_v44 = vrot.slane %v2420_v45, 9 }
 0x168   : > { %v5489_v5 = vsel %vm3400_vm1, %v5077_v61, %v2891_v42  ;;  %v2359_v61 = vshrl.u32 %v2002_v40, 16  ;;  %v2269_v36 = vor.u32 %v2268_v19, %v2265_v17  ;;  %v2364_v54 = vrot.slane %v2362_v47, 5  ;;  %v4186_v16 = vld [vmem:[%s6053_s1 + $0x10] sm:$0xff]  ;;  %v5532_v47 = vld [vmem:[#allocation2 + $0x28] sm:$0xf] }
 0x169   : > { %v2370_v57 = vrot.slane %v2368_v63, 5  ;;  %v2374_v18 = vrot.slane %v2372_v34, 4  ;;  %v2543_v40 = vsel %vm4653_vm14, %v3902_v33, %v2542_v29  ;;  %v2544_v42 = vrot.slane %v2542_v29, 4  ;;  %v5553_v34 = vld [vmem:[#allocation2 + $0x2c] sm:$0x1] }
 0x16a   : > { %2970 = vrot.lane.b32.xlu1 %v2944_v59, %s4246_s21  ;;  %v2279_v59 = vor.u32 %v2278_v11, %v2274_v14  ;;  %v2361_v49 = vrot.slane %v2359_v61, 4  ;;  %v2270_v51 = vrot.slane %v2269_v36, 4  ;;  %4193 = vmatpush.bf16.msra.mxu3 %v4187_v2  ;;  %v748_v60 = vld [vmem:[#allocation2 + $0xc8] sm:$0x1]  ;;  %v2570_v63 = vrot.slane %v5485_v50, 5 }
 0x16b   : > { %4192 = vmatpush.bf16.msra.mxu2 %v4187_v2  ;;  %4191 = vmatpush.bf16.msra.mxu1 %v4187_v2  ;;  %v2375_v11 = vor.u32 %v2374_v18, %v2370_v57  ;;  %v749_v61 = vsel %vm4282_vm3, %v588_v4, %v748_v60  ;;  %vm3466_vm3 = vcmask 326656   ;;  %v4184_v18 = vld [vmem:[%s6053_s1] sm:$0xff] }
 0x16c   : > { %v2899_v41 = vpop.permute.xlu1 %2898  ;;  %v2280_v30 = vrot.slane %v2279_v59, 4  ;;  %v2275_v17 = vsel %vm4323_vm10, %v2270_v51, %v2274_v14  ;;  %v2365_v37 = vor.u32 %v2364_v54, %v2361_v49  ;;  %3679 = vmatpush.bf16.msra.mxu0 %v4187_v2  ;;  %v3024_v2 = vpack.c.b16 %v3003_v43, %v3002_v58  ;;  %750 = vst [vmem:[#allocation2 + $0xc8] sm:$0x1] %v749_v61  ;;  %v1377_v43 = vld [vmem:[#allocation2 + $0x54] sm:$0xf]  ;;  %v4182_v61 = vld [vmem:[#allocation2 + $0xc0] sm:$0xff] }
 0x16d   : > { %v5502_v27 = vsel %vm3400_vm1, %v5338_v28, %v2899_v41  ;;  %3296 = vrot.lane.b32.xlu0 %v5450_v53, %s4250_s25  ;;  %v3418_v28 = vsel %vm3400_vm1, %v5246_v3, %v5428_v21  ;;  %v2545_v53 = vrot.slane %v5473_v38, 5  ;;  %3146 = vrot.lane.b32.xlu2 %v4178_v48, %s4249_s24  ;;  %v5520_v19 = vunpack.c.l.b16 %v2275_v17  ;;  %v5565_v51 = vld [vmem:[#allocation2 + $0x58] sm:$0xf] }
 0x16e   : > { %v2285_v55 = vsel %vm4323_vm10, %v2280_v30, %v2284_v62  ;;  %v3258_v3 = vunpack.c.l.b16 %v2543_v40  ;;  %v2366_v36 = vrot.slane %v2365_v37, 4  ;;  %v1369_v62 = vld [vmem:[#allocation2 + $0x24] sm:$0xf]  ;;  %4196 = vmatpush.bf16.msra.mxu3 %v4186_v16  ;;  %v5546_v4 = vsel %vm3433_vm4, %v3418_v28, %v5419_v10 }
 0x16f   : > { %v2897_v26 = vpop.permute.xlu0 %2896  ;;  %v5526_v38 = vpop.permute.xlu2 %3310  ;;  %v3179_v14 = vunpack.c.l.b16 %v2285_v55  ;;  %v5550_v12 = vrot.slane %v2375_v11, 4  ;;  %4195 = vmatpush.bf16.msra.mxu2 %v4186_v16  ;;  %4194 = vmatpush.bf16.msra.mxu1 %v4186_v16  ;;  %v1462_v41 = vshrl.u32 %v1369_v62, 16  ;;  %v1465_v48 = vshll.u32 %v1369_v62, 16 }
 0x170   : > { %v5524_v21 = vsel %vm3400_vm1, %v5129_v23, %v2897_v26  ;;  %v2546_v23 = vsel %vm4653_vm14, %v2544_v42, %v2545_v53  ;;  %v2371_v6 = vsel %vm4323_vm10, %v2366_v36, %v2370_v57  ;;  %v1471_v59 = vshll.u32 %v5532_v47, 16  ;;  %3680 = vmatpush.bf16.msra.mxu0 %v4186_v16 }
 0x171   : > { %v3259_v58 = vunpack.c.l.b16 %v2546_v23  ;;  %v3200_v49 = vpack.c.b16 %v3179_v14, %v5520_v19  ;;  %v5561_v33 = vunpack.c.l.b16 %v2371_v6  ;;  %v2571_v50 = vsel %vm4653_vm14, %v3906_v44, %v2570_v63 }
 0x172   : > { %3058 = vrot.lane.b32.xlu1 %v3028_v32, %s4247_s22  ;;  %4199 = vmatpush.bf16.msra.mxu3 %v4185_v1  ;;  %v1464_v54 = vrot.slane %v1462_v41, 4  ;;  %v1467_v57 = vrot.slane %v1465_v48, 5  ;;  %v1473_v30 = vrot.slane %v1471_v59, 5  ;;  %v1475_v40 = vshrl.u32 %v5532_v47, 16 }
 0x173   : > { %v5563_v29 = vpack.c.b16 %v3259_v58, %v3258_v3  ;;  %v1481_v42 = vshll.u32 %v5553_v34, 16  ;;  %v1558_v16 = vshrl.u32 %v1377_v43, 16  ;;  %v1561_v28 = vshll.u32 %v1377_v43, 16  ;;  %4198 = vmatpush.bf16.msra.mxu2 %v4185_v1  ;;  %4197 = vmatpush.bf16.msra.mxu1 %v4185_v1  ;;  %v2020_v55 = vld [vmem:[#allocation2 + $0xc8] sm:$0x1] }
 0x174   : > { %v2953_v32 = vpop.permute.xlu1 %2952  ;;  %v2572_v37 = vrot.slane %v2570_v63, 4  ;;  %v1468_v53 = vor.u32 %v1467_v57, %v1464_v54  ;;  %v1567_v45 = vshll.u32 %v5565_v51, 16  ;;  %v1571_v26 = vshrl.u32 %v5565_v51, 16  ;;  %3681 = vmatpush.bf16.msra.mxu0 %v4185_v1 }
 0x175   : > { %v5558_v10 = vsel %vm3433_vm4, %v5370_v8, %v2953_v32  ;;  %3050 = vrot.lane.b32.xlu0 %v3024_v2, %s4247_s22  ;;  %v5570_v8 = vld [vmem:[#allocation2 + $0x5c] sm:$0x1]  ;;  %v3266_v60 = vunpack.c.l.b16 %v2571_v50  ;;  %v1477_v11 = vrot.slane %v1475_v40, 4  ;;  %v1560_v3 = vrot.slane %v1558_v16, 4 }
 0x176   : > { %v1577_v14 = vshll.u32 %v5570_v8, 16  ;;  %v2378_v36 = vshll.u32 %v2020_v55, 16  ;;  %v2573_v62 = vrot.slane %v2020_v55, 5  ;;  %v1469_v2 = vrot.slane %v1468_v53, 4  ;;  %4202 = vmatpush.bf16.msra.mxu3 %v4184_v18 }
 0x177   : > { %v2951_v17 = vpop.permute.xlu0 %2950  ;;  %v5579_v19 = vpop.permute.xlu2 %3038  ;;  %v1563_v23 = vrot.slane %v1561_v28, 5  ;;  %v1478_v44 = vor.u32 %v1477_v11, %v1473_v30  ;;  %v1483_v6 = vrot.slane %v1481_v42, 5  ;;  %v1569_v58 = vrot.slane %v1567_v45, 5  ;;  %4201 = vmatpush.bf16.msra.mxu2 %v4184_v18  ;;  %4200 = vmatpush.bf16.msra.mxu1 %v4184_v18 }
 0x178   : > { %v1573_v1 = vrot.slane %v1571_v26, 4  ;;  %v2380_v43 = vrot.slane %v2378_v36, 5  ;;  %v2574_v63 = vsel %vm4653_vm14, %v2572_v37, %v2573_v62  ;;  %v1474_v41 = vsel %vm4323_vm10, %v1469_v2, %v1473_v30  ;;  %3682 = vmatpush.bf16.msra.mxu0 %v4184_v18  ;;  %v1799_v30 = vld [vmem:[#allocation2 + $0x24] sm:$0xe] }
 0x179   : > { %v1564_v48 = vor.u32 %v1563_v23, %v1560_v3  ;;  %v5589_v59 = vsel %vm3433_vm4, %v5163_v0, %v2951_v17  ;;  %v1479_v50 = vrot.slane %v1478_v44, 4  ;;  %v1579_v54 = vrot.slane %v1577_v14, 5  ;;  %v1978_v14 = vld [vmem:[#allocation2 + $0x30] sm:$0xf] }
 0x17a   : > { %3226 = vrot.lane.b32.xlu1 %v3200_v49, %s4248_s23  ;;  %v3267_v49 = vunpack.c.l.b16 %v2574_v63  ;;  %v2381_v57 = vsel %vm4323_vm10, %v5550_v12, %v2380_v43  ;;  %v5595_v40 = vunpack.c.l.b16 %v1474_v41  ;;  %v1574_v16 = vor.u32 %v1573_v1, %v1569_v58  ;;  %v1803_v12 = vld [vmem:[#allocation2 + $0x54] sm:$0xe]  ;;  %v5631_v41 = vld [vmem:[#allocation2 + $0x38] sm:$0x1] }
 0x17b   : > { %v1565_v42 = vrot.slane %v1564_v48, 4  ;;  %v3187_v28 = vunpack.c.l.b16 %v2381_v57  ;;  %v1484_v17 = vsel %vm4323_vm10, %v1479_v50, %v1483_v6  ;;  %v1880_v2 = vrot.slane %v5553_v34, 5  ;;  %v1986_v48 = vld [vmem:[#allocation2 + $0x60] sm:$0xf] }
 0x17c   : > { %v3047_v32 = vpop.permute.xlu1 %3046  ;;  %v3284_v0 = vpack.c.b16 %v3267_v49, %v3266_v60  ;;  %v2907_v53 = vunpack.c.l.b16 %v1484_v17  ;;  %v1575_v26 = vrot.slane %v1574_v16, 4  ;;  %v3878_v60 = vrot.slane %v1799_v30, 9 }
 0x17d   : > { %3154 = vrot.lane.b32.xlu0 %v4182_v61, %s4249_s24  ;;  %v3484_v18 = vsel %vm3466_vm3, %v5546_v4, %v3047_v32  ;;  %v1570_v45 = vsel %vm4323_vm10, %v1565_v42, %v1569_v58  ;;  %v3204_v11 = vpack.c.b16 %v3187_v28, %v5561_v33  ;;  %v3882_v23 = vrot.slane %v1803_v12, 9  ;;  %v5623_v32 = vld [vmem:[#allocation2 + $0x34] sm:$0xf] }
 0x17e   : > { %v5606_v3 = vunpack.c.l.b16 %v1570_v45  ;;  %v2936_v61 = vpack.c.b16 %v2907_v53, %v5595_v40  ;;  %v1580_v36 = vsel %vm4323_vm10, %v1575_v26, %v1579_v54  ;;  %v1905_v44 = vrot.slane %v5565_v51, 5 }
 0x17f   : > { %v2975_v37 = vpop.permute.xlu0 %2974  ;;  %v5608_v4 = vpop.permute.xlu2 %3206  ;;  %3234 = vrot.lane.b32.xlu2 %v3204_v11, %s4248_s23  ;;  %v2915_v33 = vunpack.c.l.b16 %v1580_v36  ;;  %v1908_v43 = vrot.slane %v5570_v8, 5  ;;  %v2074_v40 = vshll.u32 %v1978_v14, 16  ;;  %v2080_v42 = vshll.u32 %v5623_v32, 16  ;;  %v5647_v11 = vld [vmem:[#allocation2 + $0x68] sm:$0x1] }
 0x180   : > { %v3459_v55 = vsel %vm3433_vm4, %v5383_v35, %v2975_v37  ;;  %v1877_v35 = vrot.slane %v5532_v47, 5  ;;  %v1906_v51 = vsel %vm4653_vm14, %v3882_v23, %v1905_v44  ;;  %v1907_v49 = vrot.slane %v1905_v44, 4 }
 0x181   : > { %v3492_v62 = vsel %vm3466_vm3, %v3459_v55, %v5443_v13  ;;  %v2071_v13 = vshrl.u32 %v1978_v14, 16  ;;  %v2940_v47 = vpack.c.b16 %v2915_v33, %v5606_v3  ;;  %v2994_v50 = vunpack.c.l.b16 %v1906_v51  ;;  %v5645_v55 = vld [vmem:[#allocation2 + $0x64] sm:$0xf] }
 0x182   : > { %3314 = vrot.lane.b32.xlu1 %v3284_v0, %s4250_s25  ;;  %v1878_v58 = vsel %vm4653_vm14, %v3878_v60, %v1877_v35  ;;  %v1879_v1 = vrot.slane %v1877_v35, 4  ;;  %v2084_v16 = vshrl.u32 %v5623_v32, 16  ;;  %v1909_v28 = vsel %vm4653_vm14, %v1907_v49, %v1908_v43 }
 0x183   : > { %v2986_v34 = vunpack.c.l.b16 %v1878_v58  ;;  %v2073_v54 = vrot.slane %v2071_v13, 4  ;;  %v2090_v0 = vshll.u32 %v5631_v41, 16  ;;  %v2167_v17 = vshrl.u32 %v1986_v48, 16 }
 0x184   : > { %v3151_v6 = vpop.permute.xlu1 %3150  ;;  %v1881_v8 = vsel %vm4653_vm14, %v1879_v1, %v1880_v2  ;;  %v2995_v45 = vunpack.c.l.b16 %v1909_v28  ;;  %v2076_v12 = vrot.slane %v2074_v40, 5  ;;  %v2082_v60 = vrot.slane %v2080_v42, 5 }
 0x185   : > { %v5627_v63 = vsel %vm3499_vm5, %v3492_v62, %v3151_v6  ;;  %3306 = vrot.lane.b32.xlu0 %v5563_v29, %s4250_s25  ;;  %v2987_v57 = vunpack.c.l.b16 %v1881_v8  ;;  %v2170_v29 = vshll.u32 %v1986_v48, 16  ;;  %v2086_v14 = vrot.slane %v2084_v16, 4  ;;  %v2408_v62 = vld [vmem:[#allocation2 + $0x30] sm:$0xe]  ;;  %v4174_v16 = vld [vmem:[#allocation2 + $0x60] sm:$0xff] }
 0x186   : > { %v2092_v36 = vrot.slane %v2090_v0, 5  ;;  %v2077_v35 = vor.u32 %v2076_v12, %v2073_v54  ;;  %v2169_v33 = vrot.slane %v2167_v17, 4  ;;  %v2176_v6 = vshll.u32 %v5645_v55, 16 }
 0x187   : > { %v3143_v30 = vpop.permute.xlu0 %3142  ;;  %v3016_v53 = vpack.c.b16 %v2987_v57, %v2986_v34  ;;  %v5643_v26 = vpop.permute.xlu2 %3294  ;;  %2954 = vrot.lane.b32.xlu2 %v2936_v61, %s4246_s21  ;;  %v2172_v2 = vrot.slane %v2170_v29, 5  ;;  %v2087_v44 = vor.u32 %v2086_v14, %v2082_v60  ;;  %v2180_v58 = vshrl.u32 %v5645_v55, 16  ;;  %v2412_v61 = vld [vmem:[#allocation2 + $0x60] sm:$0xe] }
 0x188   : > { %v3517_v37 = vsel %vm3499_vm5, %v3484_v18, %v3143_v30  ;;  %v3020_v18 = vpack.c.b16 %v2995_v45, %v2994_v50  ;;  %v2078_v43 = vrot.slane %v2077_v35, 4  ;;  %v3894_v34 = vrot.slane %v2408_v62, 9  ;;  %v4170_v45 = vld [vmem:[#allocation2 + $0x30] sm:$0xff] }
 0x189   : > { %v3550_v3 = vsel %vm3532_vm6, %v3517_v37, %v5491_v25  ;;  %v2186_v25 = vshll.u32 %v5647_v11, 16  ;;  %v2173_v13 = vor.u32 %v2172_v2, %v2169_v33  ;;  %v2088_v51 = vrot.slane %v2087_v44, 4 }
 0x18a   : > { %3034 = vrot.lane.b32.xlu1 %v3016_v53, %s4247_s22  ;;  %v2178_v48 = vrot.slane %v2176_v6, 5  ;;  %v2182_v8 = vrot.slane %v2180_v58, 4  ;;  %v2083_v50 = vsel %vm4323_vm10, %v2078_v43, %v2082_v60  ;;  %v2486_v57 = vrot.slane %v5623_v32, 5  ;;  %v1387_v53 = vld [vmem:[#allocation2 + $0x90] sm:$0xf] }
 0x18b   : > { %v2188_v49 = vrot.slane %v2186_v25, 5  ;;  %v2174_v54 = vrot.slane %v2173_v13, 4  ;;  %v2489_v40 = vrot.slane %v5631_v41, 5  ;;  %v2093_v30 = vsel %vm4323_vm10, %v2088_v51, %v2092_v36  ;;  %v5692_v25 = vld [vmem:[#allocation2 + $0x98] sm:$0x1] }
 0x18c   : > { %v3303_v23 = vpop.permute.xlu1 %3302  ;;  %v2183_v28 = vor.u32 %v2182_v8, %v2178_v48  ;;  %v3898_v0 = vrot.slane %v2412_v61, 9  ;;  %v3163_v29 = vunpack.c.l.b16 %v2093_v30  ;;  %v2487_v32 = vsel %vm4653_vm14, %v3894_v34, %v2486_v57 }
 0x18d   : > { %v3583_v1 = vsel %vm3565_vm7, %v3550_v3, %v3303_v23  ;;  %2962 = vrot.lane.b32.xlu0 %v2940_v47, %s4246_s21  ;;  %v3162_v47 = vunpack.c.l.b16 %v2083_v50  ;;  %v2179_v37 = vsel %vm4323_vm10, %v2174_v54, %v2178_v48  ;;  %v2488_v60 = vrot.slane %v2486_v57, 4  ;;  %v5686_v23 = vld [vmem:[#allocation2 + $0x94] sm:$0xf] }
 0x18e   : > { %4124 = vmatmul.msk.bf16.vlgmr.msra.gmra.mxu2 %vm3638_vm8, %v3583_v1  ;;  %v2184_v12 = vrot.slane %v2183_v28, 4  ;;  %v5673_v3 = vunpack.c.l.b16 %v2179_v37  ;;  %v3242_v36 = vunpack.c.l.b16 %v2487_v32  ;;  %v2514_v62 = vrot.slane %v5645_v55, 5  ;;  %v1395_v1 = vld [vmem:[#allocation2 + $0xc0] sm:$0xf] }
 0x18f   : > { %v3231_v42 = vpop.permute.xlu0 %3230  ;;  %3042 = vrot.lane.b32.xlu2 %v3020_v18, %s4247_s22  ;;  %v5677_v14 = vpop.permute.xlu2 %3048  ;;  %v2517_v35 = vrot.slane %v5647_v11, 5  ;;  %v2490_v2 = vsel %vm4653_vm14, %v2488_v60, %v2489_v40  ;;  %v1678_v18 = vshrl.u32 %v1387_v53, 16  ;;  %v1681_v44 = vshll.u32 %v1387_v53, 16  ;;  %v1396_v40 = vld [vmem:[#allocation2 + $0xc4] sm:$0xf] }
 0x190   : > { %v3558_v17 = vsel %vm3532_vm6, %v5627_v63, %v3231_v42  ;;  %v3192_v63 = vpack.c.b16 %v3163_v29, %v3162_v47  ;;  %v3243_v55 = vunpack.c.l.b16 %v2490_v2  ;;  %v2515_v11 = vsel %vm4653_vm14, %v3898_v0, %v2514_v62  ;;  %v5703_v0 = vld [vmem:[#allocation2 + $0xc8] sm:$0x1] }
 0x191   : > { %v3591_v41 = vsel %vm3565_vm7, %v3558_v17, %v5526_v38  ;;  %v2189_v38 = vsel %vm4323_vm10, %v2184_v12, %v2188_v49  ;;  %v2516_v43 = vrot.slane %v2514_v62, 4  ;;  %v3250_v13 = vunpack.c.l.b16 %v2515_v11  ;;  %v1808_v17 = vld [vmem:[#allocation2 + $0x90] sm:$0xe] }
 0x192   : > { %4128 = vmatmul.msk.bf16.vlgmr.msra.gmra.mxu3 %vm3638_vm8, %v3591_v41  ;;  %3138 = vrot.lane.b32.xlu1 %v4174_v16, %s4249_s24  ;;  %v3171_v6 = vunpack.c.l.b16 %v2189_v38  ;;  %v1680_v34 = vrot.slane %v1678_v18, 4  ;;  %v1683_v61 = vrot.slane %v1681_v44, 5  ;;  %v3272_v48 = vpack.c.b16 %v3243_v55, %v3242_v36  ;;  %v1812_v38 = vld [vmem:[#allocation2 + $0xc0] sm:$0xe] }
 0x193   : > { %v1687_v8 = vshll.u32 %v5686_v23, 16  ;;  %v2518_v50 = vsel %vm4653_vm14, %v2516_v43, %v2517_v35  ;;  %v1697_v57 = vshll.u32 %v5692_v25, 16  ;;  %v1774_v42 = vshrl.u32 %v1395_v1, 16 }
 0x194   : > { %v3031_v33 = vpop.permute.xlu1 %3030  ;;  %v3196_v51 = vpack.c.b16 %v3171_v6, %v5673_v3  ;;  %v1684_v54 = vor.u32 %v1683_v61, %v1680_v34  ;;  %v3251_v30 = vunpack.c.l.b16 %v2518_v50  ;;  %v1777_v12 = vshll.u32 %v1395_v1, 16 }
 0x195   : > { %v3468_v58 = vsel %vm3466_vm3, %v5589_v59, %v3031_v33  ;;  %3130 = vrot.lane.b32.xlu0 %v4170_v45, %s4249_s24  ;;  %v1691_v59 = vshrl.u32 %v5686_v23, 16  ;;  %v1689_v47 = vrot.slane %v1687_v8, 5  ;;  %v1699_v37 = vrot.slane %v1697_v57, 5 }
 0x196   : > { %v1685_v29 = vrot.slane %v1684_v54, 4  ;;  %v1776_v53 = vrot.slane %v1774_v42, 4  ;;  %v3276_v41 = vpack.c.b16 %v3251_v30, %v3250_v13  ;;  %v1783_v3 = vshll.u32 %v1396_v40, 16 }
 0x197   : > { %v2959_v49 = vpop.permute.xlu0 %2958  ;;  %v1693_v28 = vrot.slane %v1691_v59, 4  ;;  %3210 = vrot.lane.b32.xlu2 %v3192_v63, %s4248_s23  ;;  %v1787_v36 = vshrl.u32 %v1396_v40, 16  ;;  %v1793_v62 = vshll.u32 %v5703_v0, 16  ;;  %v3887_v35 = vrot.slane %v1808_v17, 9  ;;  %v5713_v63 = vpop.permute.xlu2 %3152  ;;  %v1996_v17 = vld [vmem:[#allocation2 + $0x9c] sm:$0xf] }
 0x198   : > { %v3443_v16 = vsel %vm3433_vm4, %v5417_v9, %v2959_v49  ;;  %v1690_v9 = vsel %vm4323_vm10, %v1685_v29, %v1689_v47  ;;  %v1779_v18 = vrot.slane %v1777_v12, 5  ;;  %v1785_v44 = vrot.slane %v1783_v3, 5  ;;  %v5731_v29 = vld [vmem:[#allocation2 + $0xa0] sm:$0xf] }
 0x199   : > { %v3476_v32 = vsel %vm3466_vm3, %v3443_v16, %v5579_v19  ;;  %v1694_v45 = vor.u32 %v1693_v28, %v1689_v47  ;;  %v2924_v19 = vunpack.c.l.b16 %v1690_v9  ;;  %v1789_v6 = vrot.slane %v1787_v36, 4 }
 0x19a   : > { %3290 = vrot.lane.b32.xlu1 %v3272_v48, %s4250_s25  ;;  %v1795_v55 = vrot.slane %v1793_v62, 5  ;;  %v1940_v11 = vrot.slane %v5686_v23, 5  ;;  %v1780_v43 = vor.u32 %v1779_v18, %v1776_v53  ;;  %v1943_v13 = vrot.slane %v5692_v25, 5 }
 0x19b   : > { %v1695_v33 = vrot.slane %v1694_v45, 4  ;;  %v3891_v34 = vrot.slane %v1812_v38, 9  ;;  %v1790_v8 = vor.u32 %v1789_v6, %v1785_v44  ;;  %v1968_v57 = vrot.slane %v1396_v40, 5  ;;  %v2004_v45 = vld [vmem:[#allocation2 + $0xcc] sm:$0xf] }
 0x19c   : > { %v3135_v60 = vpop.permute.xlu1 %3134  ;;  %v1941_v59 = vsel %vm4653_vm14, %v3887_v35, %v1940_v11  ;;  %v1942_v49 = vrot.slane %v1940_v11, 4  ;;  %v1781_v50 = vrot.slane %v1780_v43, 4  ;;  %v1971_v25 = vrot.slane %v5703_v0, 5 }
 0x19d   : > { %v3509_v2 = vsel %vm3499_vm5, %v3476_v32, %v3135_v60  ;;  %3218 = vrot.lane.b32.xlu0 %v3196_v51, %s4248_s23  ;;  %v1700_v1 = vsel %vm4323_vm10, %v1695_v33, %v1699_v37  ;;  %v3004_v54 = vunpack.c.l.b16 %v1941_v59  ;;  %v1791_v42 = vrot.slane %v1790_v8, 4  ;;  %v2417_v59 = vld [vmem:[#allocation2 + $0x9c] sm:$0xe] }
 0x19e   : > { %v2925_v48 = vunpack.c.l.b16 %v1700_v1  ;;  %v1944_v16 = vsel %vm4653_vm14, %v1942_v49, %v1943_v13  ;;  %v1786_v30 = vsel %vm4323_vm10, %v1781_v50, %v1785_v44  ;;  %v1969_v28 = vsel %vm4653_vm14, %v3891_v34, %v1968_v57  ;;  %v5749_v44 = vld [vmem:[#allocation2 + $0xd0] sm:$0xf]  ;;  %v5751_v13 = vld [vmem:[#allocation2 + $0xd4] sm:$0x1] }
 0x19f   : > { %v3127_v61 = vpop.permute.xlu0 %3126  ;;  %3298 = vrot.lane.b32.xlu2 %v3276_v41, %s4250_s25  ;;  %v3005_v47 = vunpack.c.l.b16 %v1944_v16  ;;  %v1796_v40 = vsel %vm4323_vm10, %v1791_v42, %v1795_v55  ;;  %v2932_v37 = vunpack.c.l.b16 %v1786_v30  ;;  %v3012_v32 = vunpack.c.l.b16 %v1969_v28  ;;  %v5737_v41 = vld [vmem:[#allocation2 + $0xa4] sm:$0x1]  ;;  %v5745_v33 = vpop.permute.xlu2 %3304  ;;  %v4179_v28 = vld [vmem:[#allocation2 + $0x9c] sm:$0xff] }
 0x1a0   : > { %v3501_v51 = vsel %vm3499_vm5, %v3468_v58, %v3127_v61  ;;  %v2945_v23 = vpack.c.b16 %v2925_v48, %v2924_v19  ;;  %v1970_v58 = vrot.slane %v1968_v57, 4  ;;  %v2933_v12 = vunpack.c.l.b16 %v1796_v40 }
 0x1a1   : > { %v3534_v0 = vsel %vm3532_vm6, %v3501_v51, %v5608_v4  ;;  %v3025_v3 = vpack.c.b16 %v3005_v47, %v3004_v54  ;;  %v2287_v62 = vshrl.u32 %v1996_v17, 16  ;;  %v2290_v35 = vshll.u32 %v1996_v17, 16 }
 0x1a2   : > { %v1972_v9 = vsel %vm4653_vm14, %v1970_v58, %v1971_v25  ;;  %v2296_v38 = vshll.u32 %v5731_v29, 16  ;;  %v2949_v4 = vpack.c.b16 %v2933_v12, %v2932_v37  ;;  %v2300_v19 = vshrl.u32 %v5731_v29, 16  ;;  %v4183_v12 = vld [vmem:[#allocation2 + $0xcc] sm:$0xff] }
 0x1a3   : > { %v3013_v36 = vunpack.c.l.b16 %v1972_v9  ;;  %v2306_v18 = vshll.u32 %v5737_v41, 16  ;;  %v2383_v6 = vshrl.u32 %v2004_v45, 16  ;;  %v2289_v11 = vrot.slane %v2287_v62, 4 }
 0x1a4   : > { %v3287_v53 = vpop.permute.xlu1 %3286  ;;  %v2292_v1 = vrot.slane %v2290_v35, 5  ;;  %v2298_v43 = vrot.slane %v2296_v38, 5  ;;  %2980 = vrot.lane.b32.xlu1 %v2949_v4, %s4246_s21  ;;  %v2302_v48 = vrot.slane %v2300_v19, 4  ;;  %v2386_v54 = vshll.u32 %v2004_v45, 16  ;;  %v2421_v45 = vld [vmem:[#allocation2 + $0xcc] sm:$0xe] }
 0x1a5   : > { %v3567_v60 = vsel %vm3565_vm7, %v3534_v0, %v3287_v53  ;;  %2972 = vrot.lane.b32.xlu0 %v2945_v23, %s4246_s21  ;;  %v3029_v61 = vpack.c.b16 %v3013_v36, %v3012_v32  ;;  %v2308_v8 = vrot.slane %v2306_v18, 5  ;;  %v2385_v50 = vrot.slane %v2383_v6, 4 }
 0x1a6   : > { %4116 = vmatmul.msk.bf16.vlgmr.msra.gmra.mxu0 %vm3638_vm8, %v3567_v60  ;;  %v2293_v51 = vor.u32 %v2292_v1, %v2289_v11  ;;  %v2303_v57 = vor.u32 %v2302_v48, %v2298_v43  ;;  %v2392_v23 = vshll.u32 %v5749_v44, 16  ;;  %v2402_v42 = vshll.u32 %v5751_v13, 16 }
 0x1a7   : > { %v3215_v55 = vpop.permute.xlu0 %3214  ;;  %3052 = vrot.lane.b32.xlu2 %v3025_v3, %s4247_s22  ;;  %v2388_v30 = vrot.slane %v2386_v54, 5  ;;  %v3903_v47 = vrot.slane %v2417_v59, 9  ;;  %v2552_v38 = vrot.slane %v5737_v41, 5  ;;  %v5772_v4 = vpop.permute.xlu2 %3032  ;;  %v3907_v6 = vrot.slane %v2421_v45, 9  ;;  %v1372_v59 = vld [vmem:[#allocation2 + $0x34] sm:$0xf] }
 0x1a8   : > { %v3542_v34 = vsel %vm3532_vm6, %v3509_v2, %v3215_v55  ;;  %v2396_v2 = vshrl.u32 %v5749_v44, 16  ;;  %v2294_v16 = vrot.slane %v2293_v51, 4  ;;  %v2304_v58 = vrot.slane %v2303_v57, 4  ;;  %v5789_v57 = vld [vmem:[#allocation2 + $0x38] sm:$0x1] }
 0x1a9   : > { %v3575_v49 = vsel %vm3565_vm7, %v3542_v34, %v5643_v26  ;;  %v2549_v26 = vrot.slane %v5731_v29, 5  ;;  %v2394_v17 = vrot.slane %v2392_v23, 5  ;;  %v2389_v32 = vor.u32 %v2388_v30, %v2385_v50  ;;  %v1379_v30 = vld [vmem:[#allocation2 + $0x60] sm:$0xf] }
 0x1aa   : > { %4120 = vmatmul.msk.bf16.vlgmr.msra.gmra.mxu1 %vm3638_vm8, %v3575_v49  ;;  %v2398_v40 = vrot.slane %v2396_v2, 4  ;;  %v2299_v37 = vsel %vm4323_vm10, %v2294_v16, %v2298_v43  ;;  %v2404_v53 = vrot.slane %v2402_v42, 5  ;;  %v2309_v3 = vsel %vm4323_vm10, %v2304_v58, %v2308_v8  ;;  %v5794_v58 = vld [vmem:[#allocation2 + $0x64] sm:$0xf] }
 0x1ab   : > { %v2550_v0 = vsel %vm4653_vm14, %v3903_v47, %v2549_v26  ;;  %v3180_v29 = vunpack.c.l.b16 %v2299_v37  ;;  %v2551_v60 = vrot.slane %v2549_v26, 4  ;;  %v3181_v62 = vunpack.c.l.b16 %v2309_v3  ;;  %v5797_v37 = vld [vmem:[#allocation2 + $0x68] sm:$0x1]  ;;  %v1800_v3 = vld [vmem:[#allocation2 + $0x30] sm:$0xe] }
 0x1ac   : > { %v2977_v25 = vpop.permute.xlu1 %2976  ;;  %v2399_v9 = vor.u32 %v2398_v40, %v2394_v17  ;;  %v2390_v35 = vrot.slane %v2389_v32, 4  ;;  %3148 = vrot.lane.b32.xlu1 %v4179_v28, %s4249_s24  ;;  %v3260_v18 = vunpack.c.l.b16 %v2550_v0  ;;  %v2577_v55 = vrot.slane %v5749_v44, 5 }
 0x1ad   : > { %3060 = vrot.lane.b32.xlu0 %v3029_v61, %s4247_s22  ;;  %v3201_v11 = vpack.c.b16 %v3181_v62, %v3180_v29  ;;  %v2553_v43 = vsel %vm4653_vm14, %v2551_v60, %v2552_v38  ;;  %v2580_v34 = vrot.slane %v5751_v13, 5  ;;  %v1371_v61 = vld [vmem:[#allocation2 + $0x30] sm:$0xf]  ;;  %v3461_v51 = vsel %vm3433_vm4, %v5524_v21, %v2977_v25 }
 0x1ae   : > { %v2400_v19 = vrot.slane %v2399_v9, 4  ;;  %v2395_v1 = vsel %vm4323_vm10, %v2390_v35, %v2394_v17  ;;  %v3261_v8 = vunpack.c.l.b16 %v2553_v43  ;;  %v2578_v44 = vsel %vm4653_vm14, %v3907_v6, %v2577_v55 }
 0x1af   : > { %v2969_v36 = vpop.permute.xlu0 %2968  ;;  %3156 = vrot.lane.b32.xlu2 %v4183_v12, %s4249_s24  ;;  %v3188_v48 = vunpack.c.l.b16 %v2395_v1  ;;  %v2579_v13 = vrot.slane %v2577_v55, 4  ;;  %v3268_v2 = vunpack.c.l.b16 %v2578_v44  ;;  %v1486_v42 = vshrl.u32 %v1371_v61, 16 }
 0x1b0   : > { %v2405_v41 = vsel %vm4323_vm10, %v2400_v19, %v2404_v53  ;;  %v3453_v49 = vsel %vm3433_vm4, %v5299_v20, %v2969_v36  ;;  %v3281_v23 = vpack.c.b16 %v3261_v8, %v3260_v18  ;;  %v1489_v16 = vshll.u32 %v1371_v61, 16  ;;  %v5804_v18 = vpop.permute.xlu2 %3136 }
 0x1b1   : > { %v3189_v50 = vunpack.c.l.b16 %v2405_v41  ;;  %v2581_v26 = vsel %vm4653_vm14, %v2579_v13, %v2580_v34  ;;  %v1495_v20 = vshll.u32 %v1372_v59, 16  ;;  %v1499_v28 = vshrl.u32 %v1372_v59, 16 }
 0x1b2   : > { %v3269_v21 = vunpack.c.l.b16 %v2581_v26  ;;  %v1488_v25 = vrot.slane %v1486_v42, 4  ;;  %v1491_v17 = vrot.slane %v1489_v16, 5  ;;  %v1505_v40 = vshll.u32 %v5789_v57, 16 }
 0x1b3   : > { %v3205_v47 = vpack.c.b16 %v3189_v50, %v3188_v48  ;;  %v1497_v53 = vrot.slane %v1495_v20, 5  ;;  %v1501_v0 = vrot.slane %v1499_v28, 4  ;;  %v1582_v45 = vshrl.u32 %v1379_v30, 16  ;;  %v1804_v50 = vld [vmem:[#allocation2 + $0x60] sm:$0xe] }
 0x1b4   : > { %v3145_v54 = vpop.permute.xlu1 %3144  ;;  %v1585_v12 = vshll.u32 %v1379_v30, 16  ;;  %v3285_v29 = vpack.c.b16 %v3269_v21, %v3268_v2  ;;  %v3486_v9 = vsel %vm3466_vm3, %v3453_v49, %v5677_v14  ;;  %v1492_v60 = vor.u32 %v1491_v17, %v1488_v25 }
 0x1b5   : > { %3228 = vrot.lane.b32.xlu0 %v3201_v11, %s4248_s23  ;;  %3236 = vrot.lane.b32.xlu1 %v3205_v47, %s4248_s23  ;;  %v1507_v36 = vrot.slane %v1505_v40, 5  ;;  %v1502_v62 = vor.u32 %v1501_v0, %v1497_v53  ;;  %v1584_v35 = vrot.slane %v1582_v45, 4  ;;  %v1591_v19 = vshll.u32 %v5794_v58, 16 }
 0x1b6   : > { %v1587_v38 = vrot.slane %v1585_v12, 5  ;;  %v1493_v6 = vrot.slane %v1492_v60, 4  ;;  %v1595_v55 = vshrl.u32 %v5794_v58, 16  ;;  %v1601_v11 = vshll.u32 %v5797_v37, 16 }
 0x1b7   : > { %v3057_v32 = vpop.permute.xlu0 %3056  ;;  %3308 = vrot.lane.b32.xlu2 %v3281_v23, %s4250_s25  ;;  %v3879_v1 = vrot.slane %v1800_v3, 9  ;;  %v1503_v43 = vrot.slane %v1502_v62, 4  ;;  %v1593_v14 = vrot.slane %v1591_v19, 5  ;;  %v1884_v61 = vrot.slane %v1372_v59, 5  ;;  %v2409_v19 = vld [vmem:[#allocation2 + $0x3c] sm:$0xe] }
 0x1b8   : > { %v1588_v34 = vor.u32 %v1587_v38, %v1584_v35  ;;  %v3519_v48 = vsel %vm3499_vm5, %v3486_v9, %v3145_v54  ;;  %v1498_v8 = vsel %vm4323_vm10, %v1493_v6, %v1497_v53  ;;  %v1597_v44 = vrot.slane %v1595_v55, 4  ;;  %v1980_v53 = vld [vmem:[#allocation2 + $0x3c] sm:$0xf]  ;;  %v1981_v9 = vld [vmem:[#allocation2 + $0x40] sm:$0xf] }
 0x1b9   : > { %v1887_v49 = vrot.slane %v5789_v57, 5  ;;  %v1508_v13 = vsel %vm4323_vm10, %v1503_v43, %v1507_v36  ;;  %v2908_v23 = vunpack.c.l.b16 %v1498_v8  ;;  %v1885_v59 = vsel %vm4653_vm14, %v3879_v1, %v1884_v61  ;;  %v2009_v35 = vld [vmem:[#allocation2 + $0x44] sm:$0x1] }
 0x1ba   : > { %v1589_v2 = vrot.slane %v1588_v34, 4  ;;  %v2909_v42 = vunpack.c.l.b16 %v1508_v13  ;;  %v1598_v16 = vor.u32 %v1597_v44, %v1593_v14  ;;  %v1603_v54 = vrot.slane %v1601_v11, 5  ;;  %v5838_v11 = vpop.permute.xlu2 %3288 }
 0x1bb   : > { %v1886_v30 = vrot.slane %v1884_v61, 4  ;;  %v3494_v47 = vsel %vm3466_vm3, %v3461_v51, %v3057_v32  ;;  %v3883_v20 = vrot.slane %v1804_v50, 9  ;;  %v1912_v28 = vrot.slane %v5794_v58, 5 }
 0x1bc   : > { %v3233_v41 = vpop.permute.xlu1 %3232  ;;  %v1594_v57 = vsel %vm4323_vm10, %v1589_v2, %v1593_v14  ;;  %v2937_v25 = vpack.c.b16 %v2909_v42, %v2908_v23  ;;  %v1599_v17 = vrot.slane %v1598_v16, 4  ;;  %v2988_v40 = vunpack.c.l.b16 %v1885_v59 }
 0x1bd   : > { %3316 = vrot.lane.b32.xlu0 %v3285_v29, %s4250_s25  ;;  %v2916_v45 = vunpack.c.l.b16 %v1594_v57  ;;  %v1888_v51 = vsel %vm4653_vm14, %v1886_v30, %v1887_v49  ;;  %v1913_v32 = vsel %vm4653_vm14, %v3883_v20, %v1912_v28  ;;  %v1914_v3 = vrot.slane %v1912_v28, 4  ;;  %v1989_v49 = vld [vmem:[#allocation2 + $0x70] sm:$0xf]  ;;  %v1988_v30 = vld [vmem:[#allocation2 + $0x6c] sm:$0xf] }
 0x1be   : > { %2956 = vrot.lane.b32.xlu1 %v2937_v25, %s4246_s21  ;;  %v1604_v58 = vsel %vm4323_vm10, %v1599_v17, %v1603_v54  ;;  %v2989_v12 = vunpack.c.l.b16 %v1888_v51  ;;  %v1915_v29 = vrot.slane %v5797_v37, 5  ;;  %v3527_v60 = vsel %vm3499_vm5, %v3494_v47, %v5713_v63  ;;  %v2413_v54 = vld [vmem:[#allocation2 + $0x6c] sm:$0xe] }
 0x1bf   : > { %v3225_v26 = vpop.permute.xlu0 %3224  ;;  %v2996_v36 = vunpack.c.l.b16 %v1913_v32  ;;  %v2095_v38 = vshrl.u32 %v1980_v53, 16  ;;  %v3560_v55 = vsel %vm3532_vm6, %v3527_v60, %v3233_v41  ;;  %v2098_v37 = vshll.u32 %v1980_v53, 16  ;;  %v4175_v20 = vld [vmem:[#allocation2 + $0x6c] sm:$0xff] }
 0x1c0   : > { %v3552_v21 = vsel %vm3532_vm6, %v3519_v48, %v3225_v26  ;;  %v3017_v6 = vpack.c.b16 %v2989_v12, %v2988_v40  ;;  %v1916_v1 = vsel %vm4653_vm14, %v1914_v3, %v1915_v29  ;;  %v2104_v61 = vshll.u32 %v1981_v9, 16  ;;  %v2013_v26 = vld [vmem:[#allocation2 + $0x74] sm:$0x1] }
 0x1c1   : > { %v3585_v0 = vsel %vm3565_vm7, %v3552_v21, %v5745_v33  ;;  %v2917_v33 = vunpack.c.l.b16 %v1604_v58  ;;  %v2997_v34 = vunpack.c.l.b16 %v1916_v1  ;;  %v2097_v14 = vrot.slane %v2095_v38, 4 }
 0x1c2   : > { %4125 = vmatmul.msk.bf16.gmra.mxu2 %vm3638_vm8, %v3585_v0  ;;  %v2100_v63 = vrot.slane %v2098_v37, 5  ;;  %v2108_v48 = vshrl.u32 %v1981_v9, 16  ;;  %v2114_v8 = vshll.u32 %v2009_v35, 16  ;;  %v3895_v44 = vrot.slane %v2409_v19, 9 }
 0x1c3   : > { %v2941_v43 = vpack.c.b16 %v2917_v33, %v2916_v45  ;;  %v3021_v50 = vpack.c.b16 %v2997_v34, %v2996_v36  ;;  %v2106_v13 = vrot.slane %v2104_v61, 5  ;;  %v2493_v23 = vrot.slane %v1981_v9, 5  ;;  %v4171_v45 = vld [vmem:[#allocation2 + $0x3c] sm:$0xff]  ;;  %v2979_v33 = vpop.permute.xlu2 %2978 }
 0x1c4   : > { %v5835_v62 = vpop.permute.xlu1 %2960  ;;  %v2496_v2 = vrot.slane %v2009_v35, 5  ;;  %v2101_v42 = vor.u32 %v2100_v63, %v2097_v14  ;;  %v2110_v16 = vrot.slane %v2108_v48, 4  ;;  %v2521_v57 = vrot.slane %v1989_v49, 5 }
 0x1c5   : > { %3036 = vrot.lane.b32.xlu0 %v3017_v6, %s4247_s22  ;;  %2964 = vrot.lane.b32.xlu2 %v2941_v43, %s4246_s21  ;;  %v2495_v47 = vrot.slane %v2493_v23, 4  ;;  %v2116_v25 = vrot.slane %v2114_v8, 5  ;;  %v2494_v17 = vsel %vm4653_vm14, %v3895_v44, %v2493_v23  ;;  %v3899_v0 = vrot.slane %v2413_v54, 9 }
 0x1c6   : > { %3044 = vrot.lane.b32.xlu1 %v3021_v50, %s4247_s22  ;;  %v2102_v28 = vrot.slane %v2101_v42, 4  ;;  %v2111_v21 = vor.u32 %v2110_v16, %v2106_v13  ;;  %v2191_v51 = vshrl.u32 %v1988_v30, 16  ;;  %v2523_v12 = vrot.slane %v2521_v57, 4 }
 0x1c7   : > { %v3313_v41 = vpop.permute.xlu0 %3312  ;;  %v2497_v40 = vsel %vm4653_vm14, %v2495_v47, %v2496_v2  ;;  %v2524_v3 = vrot.slane %v2013_v26, 5  ;;  %v3244_v9 = vunpack.c.l.b16 %v2494_v17  ;;  %v2194_v38 = vshll.u32 %v1988_v30, 16 }
 0x1c8   : > { %v3593_v59 = vsel %vm3565_vm7, %v3560_v55, %v3313_v41  ;;  %v2107_v32 = vsel %vm4323_vm10, %v2102_v28, %v2106_v13  ;;  %v2112_v58 = vrot.slane %v2111_v21, 4  ;;  %v3245_v36 = vunpack.c.l.b16 %v2497_v40 }
 0x1c9   : > { %4129 = vmatmul.msk.bf16.gmra.mxu3 %vm3638_vm8, %v3593_v59  ;;  %v3164_v29 = vunpack.c.l.b16 %v2107_v32  ;;  %v2193_v35 = vrot.slane %v2191_v51, 4  ;;  %v2200_v55 = vshll.u32 %v1989_v49, 16  ;;  %v2204_v1 = vshrl.u32 %v1989_v49, 16 }
 0x1ca   : > { %v2117_v60 = vsel %vm4323_vm10, %v2112_v58, %v2116_v25  ;;  %v2210_v37 = vshll.u32 %v2013_v26, 16  ;;  %v2522_v43 = vsel %vm4653_vm14, %v3899_v0, %v2521_v57  ;;  %v2525_v34 = vsel %vm4653_vm14, %v2523_v12, %v2524_v3 }
 0x1cb   : > { %v3165_v6 = vunpack.c.l.b16 %v2117_v60  ;;  %v2196_v14 = vrot.slane %v2194_v38, 5  ;;  %v2202_v63 = vrot.slane %v2200_v55, 5  ;;  %v2206_v48 = vrot.slane %v2204_v1, 4 }
 0x1cc   : > { %v3129_v53 = vpop.permute.xlu1 %3128  ;;  %v3273_v8 = vpack.c.b16 %v3245_v36, %v3244_v9  ;;  %v3252_v41 = vunpack.c.l.b16 %v2522_v43  ;;  %v3253_v50 = vunpack.c.l.b16 %v2525_v34  ;;  %v2212_v49 = vrot.slane %v2210_v37, 5 }
 0x1cd   : > { %3140 = vrot.lane.b32.xlu0 %v4175_v20, %s4249_s24  ;;  %3132 = vrot.lane.b32.xlu2 %v4171_v45, %s4249_s24  ;;  %v3193_v61 = vpack.c.b16 %v3165_v6, %v3164_v29  ;;  %v2197_v44 = vor.u32 %v2196_v14, %v2193_v35  ;;  %v2207_v23 = vor.u32 %v2206_v48, %v2202_v63 }
 0x1ce   : > { %v3470_v2 = vsel %vm3466_vm3, %v5558_v10, %v5772_v4  ;;  %v3445_v16 = vsel %vm3433_vm4, %v5396_v22, %v5835_v62  ;;  %v3277_v47 = vpack.c.b16 %v3253_v50, %v3252_v41  ;;  %v3147_v10 = vpop.permute.xlu2 %3146  ;;  %v3463_v51 = vsel %vm3433_vm4, %v5502_v27, %v2979_v33 }
 0x1cf   : > { %v3041_v19 = vpop.permute.xlu0 %3040  ;;  %3212 = vrot.lane.b32.xlu1 %v3193_v61, %s4248_s23  ;;  %v2198_v59 = vrot.slane %v2197_v44, 4  ;;  %v3503_v56 = vsel %vm3499_vm5, %v3470_v2, %v3129_v53  ;;  %v2208_v42 = vrot.slane %v2207_v23, 4 }
 0x1d0   : > { %v3478_v28 = vsel %vm3466_vm3, %v3445_v16, %v3041_v19 }
 0x1d1   : > { %v2203_v54 = vsel %vm4323_vm10, %v2198_v59, %v2202_v63  ;;  %v2213_v26 = vsel %vm4323_vm10, %v2208_v42, %v2212_v49  ;;  %v3511_v31 = vsel %vm3499_vm5, %v3478_v28, %v5804_v18 }
 0x1d2   : > { %v3172_v57 = vunpack.c.l.b16 %v2203_v54  ;;  %v3173_v20 = vunpack.c.l.b16 %v2213_v26 }
 0x1d4   : > { %v3217_v13 = vpop.permute.xlu1 %3216  ;;  %v3197_v62 = vpack.c.b16 %v3173_v20, %v3172_v57 }
 0x1d5   : > { %3292 = vrot.lane.b32.xlu0 %v3273_v8, %s4250_s25  ;;  %v3544_v25 = vsel %vm3532_vm6, %v3511_v31, %v3217_v13 }
 0x1d6   : > { %3220 = vrot.lane.b32.xlu2 %v3197_v62, %s4248_s23 }
 0x1d7   : > { %v3209_v30 = vpop.permute.xlu0 %3208  ;;  %3300 = vrot.lane.b32.xlu1 %v3277_v47, %s4250_s25 }
 0x1d8   : > { %v3536_v4 = vsel %vm3532_vm6, %v3503_v56, %v3209_v30 }
 0x1d9   : > { %v3569_v22 = vsel %vm3565_vm7, %v3536_v4, %v5838_v11  ;;  %v3235_v53 = vpop.permute.xlu2 %3234 }
 0x1da   : > { %4117 = vmatmul.msk.bf16.gmra.mxu0 %vm3638_vm8, %v3569_v22 }
 0x1dc   : > { %v2971_v21 = vpop.permute.xlu1 %2970 }
 0x1dd   : > { %v3455_v18 = vsel %vm3433_vm4, %v5489_v5, %v2971_v21 }
 0x1df   : > { %v3297_v17 = vpop.permute.xlu0 %3296 }
 0x1e0   : > { %v3577_v40 = vsel %vm3565_vm7, %v3544_v25, %v3297_v17 }
 0x1e1   : > { %4121 = vmatmul.msk.bf16.gmra.mxu1 %vm3638_vm8, %v3577_v40  ;;  %v2955_v32 = vpop.permute.xlu2 %2954 }
 0x1e2   : > { %v3439_v37 = vsel %vm3433_vm4, %v5353_v15, %v2955_v32  ;;  %v5914_v15 = vld [vmem:[%s6054_s2] ss:$0 sm:$0xff] }
 0x1e4   : > { %v3059_v11 = vpop.permute.xlu1 %3058 }
 0x1e5   : > { %v3496_v58 = vsel %vm3466_vm3, %v3463_v51, %v3059_v11 }
 0x1e7   : > { %v3051_v0 = vpop.permute.xlu0 %3050 }
 0x1e8   : > { %v3488_v29 = vsel %vm3466_vm3, %v3455_v18, %v3051_v0 }
 0x1e9   : > { %v3521_v36 = vsel %vm3499_vm5, %v3488_v29, %v3147_v10  ;;  %v3043_v33 = vpop.permute.xlu2 %3042 }
 0x1ec   : > { %v3227_v45 = vpop.permute.xlu1 %3226 }
 0x1ed   : > { %v3554_v27 = vsel %vm3532_vm6, %v3521_v36, %v3227_v45 }
 0x1ef   : > { %v3155_v12 = vpop.permute.xlu0 %3154 }
 0x1f0   : > { %v3529_v3 = vsel %vm3499_vm5, %v3496_v58, %v3155_v12 }
 0x1f1   : > { %v3562_v60 = vsel %vm3532_vm6, %v3529_v3, %v3235_v53  ;;  %v3211_v55 = vpop.permute.xlu2 %3210 }
 0x1f4   : > { %v3315_v9 = vpop.permute.xlu1 %3314 }
 0x1f5   : > { %v3595_v35 = vsel %vm3565_vm7, %v3562_v60, %v3315_v9 }
 0x1f6   : > { %4130 = vmatmul.msk.bf16.gmra.mxu3 %vm3638_vm8, %v3595_v35 }
 0x1f7   : > { %v3307_v38 = vpop.permute.xlu0 %3306 }
 0x1f8   : > { %v3587_v5 = vsel %vm3565_vm7, %v3554_v27, %v3307_v38 }
 0x1f9   : > { %4126 = vmatmul.msk.bf16.gmra.mxu2 %vm3638_vm8, %v3587_v5  ;;  %v3299_v61 = vpop.permute.xlu2 %3298 }
 0x1fc   : > { %v3035_v19 = vpop.permute.xlu1 %3034 }
 0x1fd   : > { %v3472_v43 = vsel %vm3466_vm3, %v3439_v37, %v3035_v19 }
 0x1ff   : > { %v2963_v6 = vpop.permute.xlu0 %2962 }
 0x200   : > { %v3447_v14 = vsel %vm3433_vm4, %v5255_v46, %v2963_v6 }
 0x201   : > { %v3480_v48 = vsel %vm3466_vm3, %v3447_v14, %v3043_v33  ;;  %v3053_v59 = vpop.permute.xlu2 %3052 }
 0x204   : > { %v3139_v1 = vpop.permute.xlu1 %3138 }
 0x205   : > { %v3513_v8 = vsel %vm3499_vm5, %v3480_v48, %v3139_v1 }
 0x207   : > { %v3131_v34 = vpop.permute.xlu0 %3130 }
 0x208   : > { %v3505_v63 = vsel %vm3499_vm5, %v3472_v43, %v3131_v34 }
 0x209   : > { %v3538_v41 = vsel %vm3532_vm6, %v3505_v63, %v3211_v55  ;;  %v3157_v57 = vpop.permute.xlu2 %3156 }
 0x20c   : > { %v3291_v44 = vpop.permute.xlu1 %3290 }
 0x20d   : > { %v3571_v50 = vsel %vm3565_vm7, %v3538_v41, %v3291_v44 }
 0x20e   : > { %4118 = vmatmul.msk.bf16.gmra.mxu0 %vm3638_vm8, %v3571_v50 }
 0x20f   : > { %v3219_v13 = vpop.permute.xlu0 %3218 }
 0x210   : > { %v3546_v46 = vsel %vm3532_vm6, %v3513_v8, %v3219_v13 }
 0x211   : > { %v3724_v23 = vpop.f32.mrf.mxu2  ;;  %v3579_v49 = vsel %vm3565_vm7, %v3546_v46, %v3299_v61  ;;  %v3309_v53 = vpop.permute.xlu2 %3308 }
 0x212   : > { %v3725_v2 = vadd.f32 %v5914_v15, %v3724_v23  ;;  %4122 = vmatmul.msk.bf16.gmra.mxu1 %vm3638_vm8, %v3579_v49 }
 0x214   : > { %3780 = vst.msk [vmem:[%s5924_s13 + $0x80] sm:$0xff] %vm3318_vm15, %v3725_v2 }
 0x215   : > { %v3744_v56 = vpop.f32.mrf.mxu3 }
 0x216   : > { %v3745_v42 = vadd.f32 %v5914_v15, %v3744_v56  ;;  %v2981_v47 = vpop.permute.xlu1 %2980 }
 0x217   : > { %v2973_v16 = vpop.permute.xlu0 %2972  ;;  %v3465_v25 = vsel %vm3433_vm4, %v5379_v39, %v2981_v47 }
 0x218   : > { %3788 = vst.msk [vmem:[%s5924_s13 + $0xc0] sm:$0xff] %vm3318_vm15, %v3745_v42  ;;  %v3457_v20 = vsel %vm3433_vm4, %v5470_v24, %v2973_v16 }
 0x219   : > { %v3726_v54 = vpop.f32.mrf.mxu2  ;;  %v3490_v21 = vsel %vm3466_vm3, %v3457_v20, %v3053_v59 }
 0x21a   : > { %v3727_v30 = vadd.f32 %v5914_v15, %v3726_v54 }
 0x21c   : > { %3781 = vst.msk [vmem:[%s5924_s13 + $0x88] sm:$0xff] %vm3318_vm15, %v3727_v30 }
 0x21d   : > { %v3746_v26 = vpop.f32.mrf.mxu3 }
 0x21e   : > { %v3747_v10 = vadd.f32 %v5914_v15, %v3746_v26  ;;  %v3149_v28 = vpop.permute.xlu1 %3148 }
 0x21f   : > { %v3061_v4 = vpop.permute.xlu0 %3060  ;;  %v3523_v31 = vsel %vm3499_vm5, %v3490_v21, %v3149_v28  ;;  %v2965_v36 = vpop.permute.xlu2 %2964 }
 0x220   : > { %3789 = vst.msk [vmem:[%s5924_s13 + $0xc8] sm:$0xff] %vm3318_vm15, %v3747_v10  ;;  %v3498_v0 = vsel %vm3466_vm3, %v3465_v25, %v3061_v4  ;;  %v3449_v37 = vsel %vm3433_vm4, %v5441_v7, %v2965_v36 }
 0x221   : > { %v3531_v58 = vsel %vm3499_vm5, %v3498_v0, %v3157_v57 }
 0x223   : > { %v3684_v22 = vpop.f32.mrf.mxu0 }
 0x224   : > { %v3685_v62 = vadd.f32 %v5914_v15, %v3684_v22 }
 0x226   : > { %3764 = vst.msk [vmem:[%s5924_s13] sm:$0xff] %vm3318_vm15, %v3685_v62 }
 0x227   : > { %v3704_v17 = vpop.f32.mrf.mxu1  ;;  %v3229_v40 = vpop.permute.xlu0 %3228 }
 0x228   : > { %v3705_v11 = vadd.f32 %v5914_v15, %v3704_v17  ;;  %v3556_v24 = vsel %vm3532_vm6, %v3523_v31, %v3229_v40  ;;  %v3237_v51 = vpop.permute.xlu1 %3236  ;;  %v3133_v38 = vpop.permute.xlu2 %3132 }
 0x229   : > { %v3589_v45 = vsel %vm3565_vm7, %v3556_v24, %v3309_v53  ;;  %v3564_v18 = vsel %vm3532_vm6, %v3531_v58, %v3237_v51 }
 0x22a   : > { %3772 = vst.msk [vmem:[%s5924_s13 + $0x40] sm:$0xff] %vm3318_vm15, %v3705_v11  ;;  %4127 = vmatmul.msk.bf16.gmra.mxu2 %vm3638_vm8, %v3589_v45 }
 0x22b   : > { %v3686_v32 = vpop.f32.mrf.mxu0 }
 0x22c   : > { %v3687_v39 = vadd.f32 %v5914_v15, %v3686_v32 }
 0x22e   : > { %3765 = vst.msk [vmem:[%s5924_s13 + $0x8] sm:$0xff] %vm3318_vm15, %v3687_v39 }
 0x22f   : > { %v3706_v12 = vpop.f32.mrf.mxu1  ;;  %v3317_v3 = vpop.permute.xlu0 %3316 }
 0x230   : > { %v3707_v29 = vadd.f32 %v5914_v15, %v3706_v12  ;;  %v3597_v9 = vsel %vm3565_vm7, %v3564_v18, %v3317_v3  ;;  %v2957_v60 = vpop.permute.xlu1 %2956  ;;  %v3221_v48 = vpop.permute.xlu2 %3220 }
 0x231   : > { %4131 = vmatmul.msk.bf16.gmra.mxu3 %vm3638_vm8, %v3597_v9  ;;  %v3441_v33 = vsel %vm3433_vm4, %v5212_v52, %v2957_v60 }
 0x232   : > { %3773 = vst.msk [vmem:[%s5924_s13 + $0x48] sm:$0xff] %vm3318_vm15, %v3707_v29 }
 0x237   : > { %v3037_v35 = vpop.permute.xlu0 %3036 }
 0x238   : > { %v3045_v27 = vpop.permute.xlu1 %3044  ;;  %v3474_v19 = vsel %vm3466_vm3, %v3441_v33, %v3037_v35 }
 0x239   : > { %v3507_v6 = vsel %vm3499_vm5, %v3474_v19, %v3133_v38  ;;  %v3482_v14 = vsel %vm3466_vm3, %v3449_v37, %v3045_v27 }
 0x23f   : > { %v3141_v5 = vpop.permute.xlu0 %3140 }
 0x240   : > { %v3515_v63 = vsel %vm3499_vm5, %v3482_v14, %v3141_v5 }
 0x241   : > { %v3213_v1 = vpop.permute.xlu1 %3212  ;;  %v3548_v8 = vsel %vm3532_vm6, %v3515_v63, %v3221_v48 }
 0x242   : > { %v3540_v34 = vsel %vm3532_vm6, %v3507_v6, %v3213_v1 }
 0x245   : > { %v3729_v55 = vpop.f32.mrf.mxu2 }
 0x246   : > { %v3730_v43 = vadd.f32 %v5914_v15, %v3729_v55 }
 0x247   : > { %v3293_v52 = vpop.permute.xlu0 %3292 }
 0x248   : > { %3782 = vst.msk [vmem:[%s5924_s13 + $0x90] sm:$0xff] %vm3318_vm15, %v3730_v43  ;;  %v3573_v61 = vsel %vm3565_vm7, %v3540_v34, %v3293_v52 }
 0x249   : > { %4119 = vmatmul.msk.bf16.gmra.mxu0 %vm3638_vm8, %v3573_v61  ;;  %v3301_v50 = vpop.permute.xlu1 %3300 }
 0x24a   : > { %v3581_v46 = vsel %vm3565_vm7, %v3548_v8, %v3301_v50 }
 0x24b   : > { %4123 = vmatmul.msk.bf16.gmra.mxu1 %vm3638_vm8, %v3581_v46 }
 0x24c   : > { %v3749_v7 = vpop.f32.mrf.mxu3 }
 0x24d   : > { %v3750_v44 = vadd.f32 %v5914_v15, %v3749_v7  ;;  %v3731_v41 = vpop.f32.mrf.mxu2 }
 0x24e   : > { %v3732_v13 = vadd.f32 %v5914_v15, %v3731_v41 }
 0x24f   : > { %3790 = vst.msk [vmem:[%s5924_s13 + $0xd0] sm:$0xff] %vm3318_vm15, %v3750_v44 }
 0x250   : > { %3783 = vst.msk [vmem:[%s5924_s13 + $0x98] sm:$0xff] %vm3318_vm15, %v3732_v13 }
 0x254   : > { %v3751_v23 = vpop.f32.mrf.mxu3 }
 0x255   : > { %v3752_v49 = vadd.f32 %v5914_v15, %v3751_v23 }
 0x257   : > { %3791 = vst.msk [vmem:[%s5924_s13 + $0xd8] sm:$0xff] %vm3318_vm15, %v3752_v49  ;;  %v3689_v2 = vpop.f32.mrf.mxu0 }
 0x258   : > { %v3690_v59 = vadd.f32 %v5914_v15, %v3689_v2 }
 0x25a   : > { %3766 = vst.msk [vmem:[%s5924_s13 + $0x10] sm:$0xff] %vm3318_vm15, %v3690_v59 }
 0x25e   : > { %v3709_v56 = vpop.f32.mrf.mxu1 }
 0x25f   : > { %v3710_v42 = vadd.f32 %v5914_v15, %v3709_v56  ;;  %v3691_v16 = vpop.f32.mrf.mxu0 }
 0x260   : > { %v3692_v54 = vadd.f32 %v5914_v15, %v3691_v16 }
 0x261   : > { %3774 = vst.msk [vmem:[%s5924_s13 + $0x50] sm:$0xff] %vm3318_vm15, %v3710_v42 }
 0x262   : > { %3767 = vst.msk [vmem:[%s5924_s13 + $0x18] sm:$0xff] %vm3318_vm15, %v3692_v54 }
 0x266   : > { %v3711_v30 = vpop.f32.mrf.mxu1 }
 0x267   : > { %v3712_v47 = vadd.f32 %v5914_v15, %v3711_v30 }
 0x269   : > { %3775 = vst.msk [vmem:[%s5924_s13 + $0x58] sm:$0xff] %vm3318_vm15, %v3712_v47 }
 0x279   : > { %v3754_v26 = vpop.f32.mrf.mxu3 }
 0x27a   : > { %v3755_v57 = vadd.f32 %v5914_v15, %v3754_v26 }
 0x27c   : > { %3792 = vst.msk [vmem:[%s5924_s13 + $0xe0] sm:$0xff] %vm3318_vm15, %v3755_v57  ;;  %v3734_v10 = vpop.f32.mrf.mxu2 }
 0x27d   : > { %v3735_v4 = vadd.f32 %v5914_v15, %v3734_v10 }
 0x27f   : > { %3784 = vst.msk [vmem:[%s5924_s13 + $0xa0] sm:$0xff] %vm3318_vm15, %v3735_v4 }
 0x281   : > { %v3756_v20 = vpop.f32.mrf.mxu3 }
 0x282   : > { %v3757_v28 = vadd.f32 %v5914_v15, %v3756_v20 }
 0x284   : > { %3793 = vst.msk [vmem:[%s5924_s13 + $0xe8] sm:$0xff] %vm3318_vm15, %v3757_v28  ;;  %v3736_v22 = vpop.f32.mrf.mxu2 }
 0x285   : > { %v3737_v62 = vadd.f32 %v5914_v15, %v3736_v22 }
 0x287   : > { %3785 = vst.msk [vmem:[%s5924_s13 + $0xa8] sm:$0xff] %vm3318_vm15, %v3737_v62 }
 0x28b   : > { %v3694_v21 = vpop.f32.mrf.mxu0 }
 0x28c   : > { %v3695_v31 = vadd.f32 %v5914_v15, %v3694_v21 }
 0x28e   : > { %3768 = vst.msk [vmem:[%s5924_s13 + $0x20] sm:$0xff] %vm3318_vm15, %v3695_v31 }
 0x28f   : > { %v3714_v25 = vpop.f32.mrf.mxu1 }
 0x290   : > { %v3715_v17 = vadd.f32 %v5914_v15, %v3714_v25 }
 0x292   : > { %3776 = vst.msk [vmem:[%s5924_s13 + $0x60] sm:$0xff] %vm3318_vm15, %v3715_v17 }
 0x293   : > { %v3696_v40 = vpop.f32.mrf.mxu0 }
 0x294   : > { %v3697_v53 = vadd.f32 %v5914_v15, %v3696_v40 }
 0x296   : > { %3769 = vst.msk [vmem:[%s5924_s13 + $0x28] sm:$0xff] %vm3318_vm15, %v3697_v53 }
 0x297   : > { %v3716_v11 = vpop.f32.mrf.mxu1 }
 0x298   : > { %v3717_v24 = vadd.f32 %v5914_v15, %v3716_v11 }
 0x29a   : > { %3777 = vst.msk [vmem:[%s5924_s13 + $0x68] sm:$0xff] %vm3318_vm15, %v3717_v24 }
 0x2ad   : > { %v3739_v0 = vpop.f32.mrf.mxu2 }
 0x2ae   : > { %v3740_v45 = vadd.f32 %v5914_v15, %v3739_v0 }
 0x2b0   : > { %3786 = vst.msk [vmem:[%s5924_s13 + $0xb0] sm:$0xff] %vm3318_vm15, %v3740_v45 }
 0x2b4   : > { %v3759_v51 = vpop.f32.mrf.mxu3 }
 0x2b5   : > { %v3760_v32 = vadd.f32 %v5914_v15, %v3759_v51  ;;  %v3741_v39 = vpop.f32.mrf.mxu2 }
 0x2b6   : > { %v3742_v58 = vadd.f32 %v5914_v15, %v3741_v39 }
 0x2b7   : > { %3794 = vst.msk [vmem:[%s5924_s13 + $0xf0] sm:$0xff] %vm3318_vm15, %v3760_v32 }
 0x2b8   : > { %3787 = vst.msk [vmem:[%s5924_s13 + $0xb8] sm:$0xff] %vm3318_vm15, %v3742_v58 }
 0x2bc   : > { %v3761_v18 = vpop.f32.mrf.mxu3 }
 0x2bd   : > { %v3762_v12 = vadd.f32 %v5914_v15, %v3761_v18 }
 0x2bf   : > { %3795 = vst.msk [vmem:[%s5924_s13 + $0xf8] sm:$0xff] %vm3318_vm15, %v3762_v12 }
 0x2c6   : > { %v3699_v3 = vpop.f32.mrf.mxu0 }
 0x2c7   : > { %v3700_v29 = vadd.f32 %v5914_v15, %v3699_v3 }
 0x2c8   : > { %v3719_v9 = vpop.f32.mrf.mxu1 }
 0x2c9   : > { %3770 = vst.msk [vmem:[%s5924_s13 + $0x30] sm:$0xff] %vm3318_vm15, %v3700_v29  ;;  %v3720_v60 = vadd.f32 %v5914_v15, %v3719_v9 }
 0x2cb   : > { %3778 = vst.msk [vmem:[%s5924_s13 + $0x70] sm:$0xff] %vm3318_vm15, %v3720_v60 }
 0x2ce   : > { %v3701_v36 = vpop.f32.mrf.mxu0 }
 0x2cf   : > { %v3702_v35 = vadd.f32 %v5914_v15, %v3701_v36 }
 0x2d0   : > { %v3721_v27 = vpop.f32.mrf.mxu1 }
 0x2d1   : > { %3771 = vst.msk [vmem:[%s5924_s13 + $0x38] sm:$0xff] %vm3318_vm15, %v3702_v35  ;;  %v3722_v33 = vadd.f32 %v5914_v15, %v3721_v27 }
 0x2d3   : > { %3779 = vst.msk [vmem:[%s5924_s13 + $0x78] sm:$0xff] %vm3318_vm15, %v3722_v33 }
 0x2d4 PF: > { %s13_s12 = sadd.s32 1, %s4240_s12  }
 0x2d5   : > { %p10_p4 = scmp.ge.s32.totalorder %s13_s12, 4  }
 0x2d7   :  { %12 = sbr.rel (!%p10_p4) target bundleno = 1 (0x1), region = 65 }

</bundles_post_ra>
